<compile_context>
chip_gen: v6e
topology: v6e:2x2x1
jax: 0.10.0
libtpu: 0.0.40
codegen_flags: <defaults>
</compile_context>

<pallas_src>
import functools
import math

import jax
import jax.numpy as jnp
from jax.experimental import pallas as pl
from jax.experimental.pallas import tpu as pltpu


# ----------------------------------------------------------------------------
# Fused Pallas kernel: whole decoder forward for ONE batch element
# ----------------------------------------------------------------------------

_PER_LAYER_REFS = 20  # number of weight refs per decoder layer (see ordering below)


def _decoder_fwd_kernel(tok_ref, pos_ref, enc_ref, *refs,
                        n_layers, n_heads, hid_dim, scale, eps):
    """refs layout:
         [emb2_w,
          per layer: sa_wqkv, sa_bqkv, sa_wo, sa_bo, ln1_g, ln1_b,
                     ca_wq, ca_bq, ca_wkv, ca_bkv, ca_wo, ca_bo, ln2_g, ln2_b,
                     ff_w1, ff_b1, ff_w2, ff_b2, ln3_g, ln3_b,
          fc_out_w, fc_out_b,
          out_ref, attn_ref]
    """
    emb2_ref = refs[0]
    layer_refs = refs[1:1 + n_layers * _PER_LAYER_REFS]
    fc_w_ref, fc_b_ref, out_ref, attn_ref = refs[1 + n_layers * _PER_LAYER_REFS:]

    H = hid_dim
    dh = H // n_heads

    enc = enc_ref[0]                                   # (S, H) encoder output

    # ---- embedding linear (scale & positional add fused into epilogue) ----
    x = (jnp.dot(tok_ref[0], emb2_ref[...],
                 preferred_element_type=jnp.float32) * scale
         + pos_ref[...])                               # (T, H)

    def layer_norm(z, g, b):
        mu = jnp.mean(z, axis=-1, keepdims=True)
        var = jnp.mean((z - mu) ** 2, axis=-1, keepdims=True)   # biased variance
        return (z - mu) * jax.lax.rsqrt(var + eps) * g + b

    def attend(q, k, v, emit):
        """q: (T, H) — 1/sqrt(dh) already folded into its projection.
           k, v: (S, H). Per-head context kept in registers, no scratch."""
        ctx_parts = []
        attn_heads = []
        for h in range(n_heads):
            lo, hi = h * dh, (h + 1) * dh
            s = jax.lax.dot_general(q[:, lo:hi], k[:, lo:hi],
                                    (((1,), (1,)), ((), ())),
                                    preferred_element_type=jnp.float32)   # (T, S)
            m = jnp.max(s, axis=-1, keepdims=True)
            e = jnp.exp(s - m)
            denom = jnp.sum(e, axis=-1, keepdims=True)
            if emit:
                p = e / denom                           # exact: these probs are returned
                attn_heads.append(p)
            else:
                p = e * pl.reciprocal(denom, approx=True)   # EUP slot, ~free
            ctx_parts.append(jnp.dot(p, v[:, lo:hi],
                                     preferred_element_type=jnp.float32))
        return jnp.concatenate(ctx_parts, axis=-1), attn_heads   # (T, H)

    for li in range(n_layers):
        (sa_wqkv, sa_bqkv, sa_wo, sa_bo, ln1_g, ln1_b,
         ca_wq, ca_bq, ca_wkv, ca_bkv, ca_wo, ca_bo, ln2_g, ln2_b,
         ff_w1, ff_b1, ff_w2, ff_b2, ln3_g, ln3_b) = \
            layer_refs[li * _PER_LAYER_REFS:(li + 1) * _PER_LAYER_REFS]

        # ---- self attention: single fused QKV matmul ----
        qkv = jnp.dot(x, sa_wqkv[...],
                      preferred_element_type=jnp.float32) + sa_bqkv[...]   # (T, 3H)
        ctx, _ = attend(qkv[:, :H], qkv[:, H:2 * H], qkv[:, 2 * H:], emit=False)
        o = jnp.dot(ctx, sa_wo[...], preferred_element_type=jnp.float32) + sa_bo[...]
        x = layer_norm(x + o, ln1_g[...], ln1_b[...])

        # ---- cross attention: Q from x, fused KV from encoder output ----
        q = jnp.dot(x, ca_wq[...], preferred_element_type=jnp.float32) + ca_bq[...]
        kv = jnp.dot(enc, ca_wkv[...], preferred_element_type=jnp.float32) + ca_bkv[...]
        emit = (li == n_layers - 1)                    # only the last layer's probs are returned
        ctx, attn_heads = attend(q, kv[:, :H], kv[:, H:], emit=emit)
        if emit:
            for h in range(n_heads):
                attn_ref[0, h, :, :] = attn_heads[h].astype(attn_ref.dtype)
        o = jnp.dot(ctx, ca_wo[...], preferred_element_type=jnp.float32) + ca_bo[...]
        x = layer_norm(x + o, ln2_g[...], ln2_b[...])

        # ---- position-wise feed-forward ----
        hdn = jnp.maximum(
            jnp.dot(x, ff_w1[...], preferred_element_type=jnp.float32) + ff_b1[...],
            0.0)
        y = jnp.dot(hdn, ff_w2[...], preferred_element_type=jnp.float32) + ff_b2[...]
        x = layer_norm(x + y, ln3_g[...], ln3_b[...])

    # ---- final vocabulary projection ----
    out_ref[0] = (jnp.dot(x, fc_w_ref[...], preferred_element_type=jnp.float32)
                  + fc_b_ref[...]).astype(out_ref.dtype)


# ----------------------------------------------------------------------------
# Wrapper: one pallas_call for the whole forward pass
# ----------------------------------------------------------------------------

def decoder_forward(params, trg_tokens, enc_src, trg_mask, src_mask,
                    hid_dim, n_heads):
    # NOTE: trg_mask / src_mask accepted for API parity but have no effect — the
    # reference uses a non-in-place masked_fill whose result is discarded.
    del trg_mask, src_mask
    B, T = trg_tokens.shape
    S = enc_src.shape[1]
    n_layers = len(params["layers"])
    V = params["fc_out_w"].shape[1]

    # TODO(synk): token-embedding gather stays in XLA (data-dependent row gather).
    tok = jnp.take(params["emb1"], trg_tokens, axis=0)           # (B, T, L1)
    L1 = tok.shape[-1]
    pos = params["pos_emb"][:T]                                  # (T, H)

    weights = [params["emb2_w"]]
    for lp in params["layers"]:
        weights += [lp["sa_wqkv"], lp["sa_bqkv"], lp["sa_wo"], lp["sa_bo"],
                    lp["ln1_g"], lp["ln1_b"],
                    lp["ca_wq"], lp["ca_bq"], lp["ca_wkv"], lp["ca_bkv"],
                    lp["ca_wo"], lp["ca_bo"], lp["ln2_g"], lp["ln2_b"],
                    lp["ff_w1"], lp["ff_b1"], lp["ff_w2"], lp["ff_b2"],
                    lp["ln3_g"], lp["ln3_b"]]
    weights += [params["fc_out_w"], params["fc_out_b"]]

    def shared2d(a):  # whole (small) weight resident for every grid step
        return pl.BlockSpec(a.shape, lambda b: (0, 0))

    in_specs = ([pl.BlockSpec((1, T, L1), lambda b: (b, 0, 0)),      # token embeddings
                 pl.BlockSpec((T, hid_dim), lambda b: (0, 0)),       # positional slice
                 pl.BlockSpec((1, S, hid_dim), lambda b: (b, 0, 0))]  # encoder output
                + [shared2d(w) for w in weights])

    out_shape = (jax.ShapeDtypeStruct((B, T, V), jnp.float32),
                 jax.ShapeDtypeStruct((B, n_heads, T, S), jnp.float32))
    out_specs = (pl.BlockSpec((1, T, V), lambda b: (b, 0, 0)),
                 pl.BlockSpec((1, n_heads, T, S), lambda b: (b, 0, 0, 0)))

    kernel = functools.partial(_decoder_fwd_kernel,
                               n_layers=n_layers, n_heads=n_heads,
                               hid_dim=hid_dim,
                               scale=float(math.sqrt(hid_dim)), eps=1e-5)

    out, attn = pl.pallas_call(
        kernel,
        grid=(B,),
        out_shape=out_shape,
        in_specs=in_specs,
        out_specs=out_specs,
        compiler_params=pltpu.CompilerParams(dimension_semantics=("parallel",)),
    )(tok, pos, enc_src, *weights)
    return out, attn


# ----------------------------------------------------------------------------
# Pure-JAX reference (same math, same fused params) for correctness checking
# ----------------------------------------------------------------------------

def decoder_forward_ref(params, trg_tokens, enc_src, hid_dim, n_heads):
    H = hid_dim
    dh = H // n_heads
    B, T = trg_tokens.shape

    tok = jnp.take(params["emb1"], trg_tokens, axis=0)
    x = (jnp.einsum("btl,lh->bth", tok, params["emb2_w"]) * math.sqrt(H)
         + params["pos_emb"][:T][None])

    def ln(z, g, b, eps=1e-5):
        mu = jnp.mean(z, -1, keepdims=True)
        var = jnp.mean((z - mu) ** 2, -1, keepdims=True)
        return (z - mu) * jax.lax.rsqrt(var + eps) * g + b

    def mha(q, k, v):
        def split(t):
            return t.reshape(t.shape[0], t.shape[1], n_heads, dh).transpose(0, 2, 1, 3)
        qh, kh, vh = split(q), split(k), split(v)
        s = jnp.einsum("bhtd,bhsd->bhts", qh, kh)
        p = jax.nn.softmax(s, axis=-1)
        ctx = jnp.einsum("bhts,bhsd->bhtd", p, vh)
        return ctx.transpose(0, 2, 1, 3).reshape(q.shape[0], q.shape[1], H), p

    attn = None
    for lp in params["layers"]:
        qkv = x @ lp["sa_wqkv"] + lp["sa_bqkv"]
        ctx, _ = mha(qkv[..., :H], qkv[..., H:2 * H], qkv[..., 2 * H:])
        x = ln(x + ctx @ lp["sa_wo"] + lp["sa_bo"], lp["ln1_g"], lp["ln1_b"])

        q = x @ lp["ca_wq"] + lp["ca_bq"]
        kv = enc_src @ lp["ca_wkv"] + lp["ca_bkv"]
        ctx, attn = mha(q, kv[..., :H], kv[..., H:])
        x = ln(x + ctx @ lp["ca_wo"] + lp["ca_bo"], lp["ln2_g"], lp["ln2_b"])

        h1 = jax.nn.relu(x @ lp["ff_w1"] + lp["ff_b1"])
        x = ln(x + h1 @ lp["ff_w2"] + lp["ff_b2"], lp["ln3_g"], lp["ln3_b"])

    out = x @ params["fc_out_w"] + params["fc_out_b"]
    return out, attn


# ----------------------------------------------------------------------------
# Deterministic parameter init (+ one-time fuse / scale-fold weight transform)
# ----------------------------------------------------------------------------

def init_params(key, output_dim, hid_dim, layer1_dim, n_layers, n_heads,
                pf_dim, max_length):
    def nrm(k, shape, s=0.05):
        return jax.random.normal(k, shape, jnp.float32) * s

    keys = iter(jax.random.split(key, 512))
    inv_scale = 1.0 / math.sqrt(hid_dim // n_heads)   # folded into Q projections

    def attn_raw():
        return {n: nrm(next(keys), (hid_dim, hid_dim)) if n.startswith("w")
                else nrm(next(keys), (1, hid_dim))
                for n in ("wq", "bq", "wk", "bk", "wv", "bv", "wo", "bo")}

    params = {
        "emb1": nrm(next(keys), (output_dim, layer1_dim)),
        "emb2_w": nrm(next(keys), (layer1_dim, hid_dim)),
        "pos_emb": nrm(next(keys), (max_length, hid_dim)),
        "fc_out_w": nrm(next(keys), (hid_dim, output_dim)),
        "fc_out_b": nrm(next(keys), (1, output_dim)),
        "layers": [],
    }

    for _ in range(n_layers):
        sa, ca = attn_raw(), attn_raw()
        params["layers"].append({
            # self-attn: fused Q|K|V projection, 1/sqrt(dh) pre-folded into Q
            "sa_wqkv": jnp.concatenate(
                [sa["wq"] * inv_scale, sa["wk"], sa["wv"]], axis=1),
            "sa_bqkv": jnp.concatenate(
                [sa["bq"] * inv_scale, sa["bk"], sa["bv"]], axis=1),
            "sa_wo": sa["wo"], "sa_bo": sa["bo"],
            "ln1_g": jnp.ones((1, hid_dim), jnp.float32),
            "ln1_b": jnp.zeros((1, hid_dim), jnp.float32),
            # cross-attn: Q separate (different source), fused K|V
            "ca_wq": ca["wq"] * inv_scale, "ca_bq": ca["bq"] * inv_scale,
            "ca_wkv": jnp.concatenate([ca["wk"], ca["wv"]], axis=1),
            "ca_bkv": jnp.concatenate([ca["bk"], ca["bv"]], axis=1),
            "ca_wo": ca["wo"], "ca_bo": ca["bo"],
            "ln2_g": jnp.ones((1, hid_dim), jnp.float32),
            "ln2_b": jnp.zeros((1, hid_dim), jnp.float32),
            # FFN
            "ff_w1": nrm(next(keys), (hid_dim, pf_dim)),
            "ff_b1": nrm(next(keys), (1, pf_dim)),
            "ff_w2": nrm(next(keys), (pf_dim, hid_dim)),
            "ff_b2": nrm(next(keys), (1, hid_dim)),
            "ln3_g": jnp.ones((1, hid_dim), jnp.float32),
            "ln3_b": jnp.zeros((1, hid_dim), jnp.float32),
        })
    return params


# ----------------------------------------------------------------------------
# Main
# ----------------------------------------------------------------------------

if __name__ == "__main__":
    OUTPUT_DIM = 50      # vocab size
    HID_DIM = 32
    LAYER1_DIM = 16
    N_LAYERS = 2
    N_HEADS = 4
    PF_DIM = 64
    MAX_LEN = 100
    B, T, S = 2, 8, 10

    root = jax.random.PRNGKey(0)
    kp, kt, ke = jax.random.split(root, 3)

    params = init_params(kp, OUTPUT_DIM, HID_DIM, LAYER1_DIM, N_LAYERS, N_HEADS,
                         PF_DIM, MAX_LEN)

    trg_tokens = jax.random.randint(kt, (B, T), 0, OUTPUT_DIM, dtype=jnp.int32)
    enc_src = jax.random.normal(ke, (B, S, HID_DIM), jnp.float32)
    # masks accepted for API parity but have no effect (see header note)
    trg_mask = jnp.tril(jnp.ones((T, T), jnp.int32))[None, None]   # (1,1,T,T)
    src_mask = jnp.ones((B, 1, 1, S), jnp.int32)

    fwd = jax.jit(functools.partial(decoder_forward,
                                    hid_dim=HID_DIM, n_heads=N_HEADS))
    output, attention_probs = fwd(params, trg_tokens, enc_src, trg_mask, src_mask)
    jax.block_until_ready((output, attention_probs))

    assert output.shape == (B, T, OUTPUT_DIM)
    assert attention_probs.shape == (B, N_HEADS, T, S)
    assert bool(jnp.all(jnp.isfinite(output)))
    # attention rows must sum to ~1 (exact softmax on the emitted path)
    assert bool(jnp.allclose(jnp.sum(attention_probs, axis=-1), 1.0, atol=1e-4))

    # cross-check against a pure-JAX reference using the same parameters
    out_ref, attn_ref = decoder_forward_ref(params, trg_tokens, enc_src,
                                            HID_DIM, N_HEADS)
    assert bool(jnp.allclose(output, out_ref, atol=2e-2, rtol=2e-2))
    assert bool(jnp.allclose(attention_probs, attn_ref, atol=2e-3, rtol=2e-3))

    print("KERNEL_OK")
</pallas_src>

<mosaic_0001>
module attributes {stable_mosaic.version = 11 : i64} {
  func.func @_decoder_fwd_kernel(%arg0: i32, %arg1: memref<1x8x16xf32, #tpu.memory_space<vmem>>, %arg2: memref<8x32xf32, #tpu.memory_space<vmem>>, %arg3: memref<1x10x32xf32, #tpu.memory_space<vmem>>, %arg4: memref<16x32xf32, #tpu.memory_space<vmem>>, %arg5: memref<32x96xf32, #tpu.memory_space<vmem>>, %arg6: memref<1x96xf32, #tpu.memory_space<vmem>>, %arg7: memref<32x32xf32, #tpu.memory_space<vmem>>, %arg8: memref<1x32xf32, #tpu.memory_space<vmem>>, %arg9: memref<1x32xf32, #tpu.memory_space<vmem>>, %arg10: memref<1x32xf32, #tpu.memory_space<vmem>>, %arg11: memref<32x32xf32, #tpu.memory_space<vmem>>, %arg12: memref<1x32xf32, #tpu.memory_space<vmem>>, %arg13: memref<32x64xf32, #tpu.memory_space<vmem>>, %arg14: memref<1x64xf32, #tpu.memory_space<vmem>>, %arg15: memref<32x32xf32, #tpu.memory_space<vmem>>, %arg16: memref<1x32xf32, #tpu.memory_space<vmem>>, %arg17: memref<1x32xf32, #tpu.memory_space<vmem>>, %arg18: memref<1x32xf32, #tpu.memory_space<vmem>>, %arg19: memref<32x64xf32, #tpu.memory_space<vmem>>, %arg20: memref<1x64xf32, #tpu.memory_space<vmem>>, %arg21: memref<64x32xf32, #tpu.memory_space<vmem>>, %arg22: memref<1x32xf32, #tpu.memory_space<vmem>>, %arg23: memref<1x32xf32, #tpu.memory_space<vmem>>, %arg24: memref<1x32xf32, #tpu.memory_space<vmem>>, %arg25: memref<32x96xf32, #tpu.memory_space<vmem>>, %arg26: memref<1x96xf32, #tpu.memory_space<vmem>>, %arg27: memref<32x32xf32, #tpu.memory_space<vmem>>, %arg28: memref<1x32xf32, #tpu.memory_space<vmem>>, %arg29: memref<1x32xf32, #tpu.memory_space<vmem>>, %arg30: memref<1x32xf32, #tpu.memory_space<vmem>>, %arg31: memref<32x32xf32, #tpu.memory_space<vmem>>, %arg32: memref<1x32xf32, #tpu.memory_space<vmem>>, %arg33: memref<32x64xf32, #tpu.memory_space<vmem>>, %arg34: memref<1x64xf32, #tpu.memory_space<vmem>>, %arg35: memref<32x32xf32, #tpu.memory_space<vmem>>, %arg36: memref<1x32xf32, #tpu.memory_space<vmem>>, %arg37: memref<1x32xf32, #tpu.memory_space<vmem>>, %arg38: memref<1x32xf32, #tpu.memory_space<vmem>>, %arg39: memref<32x64xf32, #tpu.memory_space<vmem>>, %arg40: memref<1x64xf32, #tpu.memory_space<vmem>>, %arg41: memref<64x32xf32, #tpu.memory_space<vmem>>, %arg42: memref<1x32xf32, #tpu.memory_space<vmem>>, %arg43: memref<1x32xf32, #tpu.memory_space<vmem>>, %arg44: memref<1x32xf32, #tpu.memory_space<vmem>>, %arg45: memref<32x50xf32, #tpu.memory_space<vmem>>, %arg46: memref<1x50xf32, #tpu.memory_space<vmem>>, %arg47: memref<1x8x50xf32, #tpu.memory_space<vmem>>, %arg48: memref<1x4x8x10xf32, #tpu.memory_space<vmem>>) attributes {dimension_semantics = [#tpu.dimension_semantics<parallel>], iteration_bounds = array<i64: 2>, scalar_prefetch = 0 : i64, scratch_operands = 0 : i64, tpu.core_type = #tpu.core_type<tc>, window_params = [{transform_indices = @transform_0, window_bounds = array<i64: 1, 8, 16>}, {pipeline_mode = #tpu.pipeline_mode<synchronous>, transform_indices = @transform_1, window_bounds = array<i64: 8, 32>}, {transform_indices = @transform_2, window_bounds = array<i64: 1, 10, 32>}, {pipeline_mode = #tpu.pipeline_mode<synchronous>, transform_indices = @transform_3, window_bounds = array<i64: 16, 32>}, {pipeline_mode = #tpu.pipeline_mode<synchronous>, transform_indices = @transform_4, window_bounds = array<i64: 32, 96>}, {pipeline_mode = #tpu.pipeline_mode<synchronous>, transform_indices = @transform_5, window_bounds = array<i64: 1, 96>}, {pipeline_mode = #tpu.pipeline_mode<synchronous>, transform_indices = @transform_6, window_bounds = array<i64: 32, 32>}, {pipeline_mode = #tpu.pipeline_mode<synchronous>, transform_indices = @transform_7, window_bounds = array<i64: 1, 32>}, {pipeline_mode = #tpu.pipeline_mode<synchronous>, transform_indices = @transform_8, window_bounds = array<i64: 1, 32>}, {pipeline_mode = #tpu.pipeline_mode<synchronous>, transform_indices = @transform_9, window_bounds = array<i64: 1, 32>}, {pipeline_mode = #tpu.pipeline_mode<synchronous>, transform_indices = @transform_10, window_bounds = array<i64: 32, 32>}, {pipeline_mode = #tpu.pipeline_mode<synchronous>, transform_indices = @transform_11, window_bounds = array<i64: 1, 32>}, {pipeline_mode = #tpu.pipeline_mode<synchronous>, transform_indices = @transform_12, window_bounds = array<i64: 32, 64>}, {pipeline_mode = #tpu.pipeline_mode<synchronous>, transform_indices = @transform_13, window_bounds = array<i64: 1, 64>}, {pipeline_mode = #tpu.pipeline_mode<synchronous>, transform_indices = @transform_14, window_bounds = array<i64: 32, 32>}, {pipeline_mode = #tpu.pipeline_mode<synchronous>, transform_indices = @transform_15, window_bounds = array<i64: 1, 32>}, {pipeline_mode = #tpu.pipeline_mode<synchronous>, transform_indices = @transform_16, window_bounds = array<i64: 1, 32>}, {pipeline_mode = #tpu.pipeline_mode<synchronous>, transform_indices = @transform_17, window_bounds = array<i64: 1, 32>}, {pipeline_mode = #tpu.pipeline_mode<synchronous>, transform_indices = @transform_18, window_bounds = array<i64: 32, 64>}, {pipeline_mode = #tpu.pipeline_mode<synchronous>, transform_indices = @transform_19, window_bounds = array<i64: 1, 64>}, {pipeline_mode = #tpu.pipeline_mode<synchronous>, transform_indices = @transform_20, window_bounds = array<i64: 64, 32>}, {pipeline_mode = #tpu.pipeline_mode<synchronous>, transform_indices = @transform_21, window_bounds = array<i64: 1, 32>}, {pipeline_mode = #tpu.pipeline_mode<synchronous>, transform_indices = @transform_22, window_bounds = array<i64: 1, 32>}, {pipeline_mode = #tpu.pipeline_mode<synchronous>, transform_indices = @transform_23, window_bounds = array<i64: 1, 32>}, {pipeline_mode = #tpu.pipeline_mode<synchronous>, transform_indices = @transform_24, window_bounds = array<i64: 32, 96>}, {pipeline_mode = #tpu.pipeline_mode<synchronous>, transform_indices = @transform_25, window_bounds = array<i64: 1, 96>}, {pipeline_mode = #tpu.pipeline_mode<synchronous>, transform_indices = @transform_26, window_bounds = array<i64: 32, 32>}, {pipeline_mode = #tpu.pipeline_mode<synchronous>, transform_indices = @transform_27, window_bounds = array<i64: 1, 32>}, {pipeline_mode = #tpu.pipeline_mode<synchronous>, transform_indices = @transform_28, window_bounds = array<i64: 1, 32>}, {pipeline_mode = #tpu.pipeline_mode<synchronous>, transform_indices = @transform_29, window_bounds = array<i64: 1, 32>}, {pipeline_mode = #tpu.pipeline_mode<synchronous>, transform_indices = @transform_30, window_bounds = array<i64: 32, 32>}, {pipeline_mode = #tpu.pipeline_mode<synchronous>, transform_indices = @transform_31, window_bounds = array<i64: 1, 32>}, {pipeline_mode = #tpu.pipeline_mode<synchronous>, transform_indices = @transform_32, window_bounds = array<i64: 32, 64>}, {pipeline_mode = #tpu.pipeline_mode<synchronous>, transform_indices = @transform_33, window_bounds = array<i64: 1, 64>}, {pipeline_mode = #tpu.pipeline_mode<synchronous>, transform_indices = @transform_34, window_bounds = array<i64: 32, 32>}, {pipeline_mode = #tpu.pipeline_mode<synchronous>, transform_indices = @transform_35, window_bounds = array<i64: 1, 32>}, {pipeline_mode = #tpu.pipeline_mode<synchronous>, transform_indices = @transform_36, window_bounds = array<i64: 1, 32>}, {pipeline_mode = #tpu.pipeline_mode<synchronous>, transform_indices = @transform_37, window_bounds = array<i64: 1, 32>}, {pipeline_mode = #tpu.pipeline_mode<synchronous>, transform_indices = @transform_38, window_bounds = array<i64: 32, 64>}, {pipeline_mode = #tpu.pipeline_mode<synchronous>, transform_indices = @transform_39, window_bounds = array<i64: 1, 64>}, {pipeline_mode = #tpu.pipeline_mode<synchronous>, transform_indices = @transform_40, window_bounds = array<i64: 64, 32>}, {pipeline_mode = #tpu.pipeline_mode<synchronous>, transform_indices = @transform_41, window_bounds = array<i64: 1, 32>}, {pipeline_mode = #tpu.pipeline_mode<synchronous>, transform_indices = @transform_42, window_bounds = array<i64: 1, 32>}, {pipeline_mode = #tpu.pipeline_mode<synchronous>, transform_indices = @transform_43, window_bounds = array<i64: 1, 32>}, {pipeline_mode = #tpu.pipeline_mode<synchronous>, transform_indices = @transform_44, window_bounds = array<i64: 32, 50>}, {pipeline_mode = #tpu.pipeline_mode<synchronous>, transform_indices = @transform_45, window_bounds = array<i64: 1, 50>}, {transform_indices = @transform_46, window_bounds = array<i64: 1, 8, 50>}, {transform_indices = @transform_47, window_bounds = array<i64: 1, 4, 8, 10>}]} {
    %c0 = arith.constant 0 : index
    %c0_0 = arith.constant 0 : index
    %c0_1 = arith.constant 0 : index
    %0 = vector.load %arg3[%c0, %c0_0, %c0_1] : memref<1x10x32xf32, #tpu.memory_space<vmem>>, vector<1x10x32xf32>
    %1 = vector.shape_cast %0 : vector<1x10x32xf32> to vector<10x32xf32>
    %c0_2 = arith.constant 0 : index
    %c0_3 = arith.constant 0 : index
    %c0_4 = arith.constant 0 : index
    %2 = vector.load %arg1[%c0_2, %c0_3, %c0_4] : memref<1x8x16xf32, #tpu.memory_space<vmem>>, vector<1x8x16xf32>
    %3 = vector.shape_cast %2 : vector<1x8x16xf32> to vector<8x16xf32>
    %c0_5 = arith.constant 0 : index
    %c0_6 = arith.constant 0 : index
    %4 = vector.load %arg4[%c0_5, %c0_6] : memref<16x32xf32, #tpu.memory_space<vmem>>, vector<16x32xf32>
    %cst = arith.constant dense<0.000000e+00> : vector<8x32xf32>
    %5 = tpu.matmul %3, %4, %cst {dimension_numbers = #tpu.dot_dimension_numbers<[1], [0], [0], [1], [0, 0, 1, 1], [], []>} : vector<8x16xf32>, vector<16x32xf32>, vector<8x32xf32> -> vector<8x32xf32>
    %cst_7 = arith.constant 5.65685415 : f32
    %6 = vector.broadcast %cst_7 : f32 to vector<8x32xf32>
    %7 = arith.mulf %5, %6 : vector<8x32xf32>
    %c0_8 = arith.constant 0 : index
    %c0_9 = arith.constant 0 : index
    %8 = vector.load %arg2[%c0_8, %c0_9] : memref<8x32xf32, #tpu.memory_space<vmem>>, vector<8x32xf32>
    %9 = arith.addf %7, %8 : vector<8x32xf32>
    %c0_10 = arith.constant 0 : index
    %c0_11 = arith.constant 0 : index
    %10 = vector.load %arg5[%c0_10, %c0_11] : memref<32x96xf32, #tpu.memory_space<vmem>>, vector<32x96xf32>
    %cst_12 = arith.constant dense<0.000000e+00> : vector<8x96xf32>
    %11 = tpu.matmul %9, %10, %cst_12 {dimension_numbers = #tpu.dot_dimension_numbers<[1], [0], [0], [1], [0, 0, 1, 1], [], []>} : vector<8x32xf32>, vector<32x96xf32>, vector<8x96xf32> -> vector<8x96xf32>
    %c0_13 = arith.constant 0 : index
    %c0_14 = arith.constant 0 : index
    %12 = vector.load %arg6[%c0_13, %c0_14] : memref<1x96xf32, #tpu.memory_space<vmem>>, vector<1x96xf32>
    %13 = vector.broadcast %12 : vector<1x96xf32> to vector<8x96xf32>
    %14 = arith.addf %11, %13 : vector<8x96xf32>
    %15 = vector.extract_strided_slice %14 {offsets = [0, 0], sizes = [8, 32], strides = [1, 1]} : vector<8x96xf32> to vector<8x32xf32>
    %16 = vector.extract_strided_slice %14 {offsets = [0, 32], sizes = [8, 32], strides = [1, 1]} : vector<8x96xf32> to vector<8x32xf32>
    %17 = vector.extract_strided_slice %14 {offsets = [0, 64], sizes = [8, 32], strides = [1, 1]} : vector<8x96xf32> to vector<8x32xf32>
    %18 = vector.extract_strided_slice %15 {offsets = [0, 0], sizes = [8, 8], strides = [1, 1]} : vector<8x32xf32> to vector<8x8xf32>
    %19 = vector.extract_strided_slice %16 {offsets = [0, 0], sizes = [8, 8], strides = [1, 1]} : vector<8x32xf32> to vector<8x8xf32>
    %cst_15 = arith.constant dense<0.000000e+00> : vector<8x8xf32>
    %20 = tpu.matmul %18, %19, %cst_15 {dimension_numbers = #tpu.dot_dimension_numbers<[1], [1], [0], [0], [0, 0, 1, 0], [], []>} : vector<8x8xf32>, vector<8x8xf32>, vector<8x8xf32> -> vector<8x8xf32>
    %cst_16 = arith.constant dense<0xFF800000> : vector<8xf32>
    %21 = vector.multi_reduction <maximumf>, %20, %cst_16 [1] : vector<8x8xf32> to vector<8xf32>
    %22 = vector.shape_cast %21 : vector<8xf32> to vector<8x1xf32>
    %23 = vector.broadcast %22 : vector<8x1xf32> to vector<8x8xf32>
    %24 = arith.subf %20, %23 : vector<8x8xf32>
    %25 = math.exp %24 : vector<8x8xf32>
    %cst_17 = arith.constant dense<0.000000e+00> : vector<8xf32>
    %26 = vector.multi_reduction <add>, %25, %cst_17 [1] : vector<8x8xf32> to vector<8xf32>
    %27 = vector.shape_cast %26 : vector<8xf32> to vector<8x1xf32>
    %28 = tpu.reciprocal %27 {approx = true} : vector<8x1xf32> -> vector<8x1xf32>
    %29 = vector.broadcast %28 : vector<8x1xf32> to vector<8x8xf32>
    %30 = arith.mulf %25, %29 : vector<8x8xf32>
    %31 = vector.extract_strided_slice %17 {offsets = [0, 0], sizes = [8, 8], strides = [1, 1]} : vector<8x32xf32> to vector<8x8xf32>
    %cst_18 = arith.constant dense<0.000000e+00> : vector<8x8xf32>
    %32 = tpu.matmul %30, %31, %cst_18 {dimension_numbers = #tpu.dot_dimension_numbers<[1], [0], [0], [1], [0, 0, 1, 1], [], []>} : vector<8x8xf32>, vector<8x8xf32>, vector<8x8xf32> -> vector<8x8xf32>
    %33 = vector.extract_strided_slice %15 {offsets = [0, 8], sizes = [8, 8], strides = [1, 1]} : vector<8x32xf32> to vector<8x8xf32>
    %34 = vector.extract_strided_slice %16 {offsets = [0, 8], sizes = [8, 8], strides = [1, 1]} : vector<8x32xf32> to vector<8x8xf32>
    %cst_19 = arith.constant dense<0.000000e+00> : vector<8x8xf32>
    %35 = tpu.matmul %33, %34, %cst_19 {dimension_numbers = #tpu.dot_dimension_numbers<[1], [1], [0], [0], [0, 0, 1, 0], [], []>} : vector<8x8xf32>, vector<8x8xf32>, vector<8x8xf32> -> vector<8x8xf32>
    %cst_20 = arith.constant dense<0xFF800000> : vector<8xf32>
    %36 = vector.multi_reduction <maximumf>, %35, %cst_20 [1] : vector<8x8xf32> to vector<8xf32>
    %37 = vector.shape_cast %36 : vector<8xf32> to vector<8x1xf32>
    %38 = vector.broadcast %37 : vector<8x1xf32> to vector<8x8xf32>
    %39 = arith.subf %35, %38 : vector<8x8xf32>
    %40 = math.exp %39 : vector<8x8xf32>
    %cst_21 = arith.constant dense<0.000000e+00> : vector<8xf32>
    %41 = vector.multi_reduction <add>, %40, %cst_21 [1] : vector<8x8xf32> to vector<8xf32>
    %42 = vector.shape_cast %41 : vector<8xf32> to vector<8x1xf32>
    %43 = tpu.reciprocal %42 {approx = true} : vector<8x1xf32> -> vector<8x1xf32>
    %44 = vector.broadcast %43 : vector<8x1xf32> to vector<8x8xf32>
    %45 = arith.mulf %40, %44 : vector<8x8xf32>
    %46 = vector.extract_strided_slice %17 {offsets = [0, 8], sizes = [8, 8], strides = [1, 1]} : vector<8x32xf32> to vector<8x8xf32>
    %cst_22 = arith.constant dense<0.000000e+00> : vector<8x8xf32>
    %47 = tpu.matmul %45, %46, %cst_22 {dimension_numbers = #tpu.dot_dimension_numbers<[1], [0], [0], [1], [0, 0, 1, 1], [], []>} : vector<8x8xf32>, vector<8x8xf32>, vector<8x8xf32> -> vector<8x8xf32>
    %48 = vector.extract_strided_slice %15 {offsets = [0, 16], sizes = [8, 8], strides = [1, 1]} : vector<8x32xf32> to vector<8x8xf32>
    %49 = vector.extract_strided_slice %16 {offsets = [0, 16], sizes = [8, 8], strides = [1, 1]} : vector<8x32xf32> to vector<8x8xf32>
    %cst_23 = arith.constant dense<0.000000e+00> : vector<8x8xf32>
    %50 = tpu.matmul %48, %49, %cst_23 {dimension_numbers = #tpu.dot_dimension_numbers<[1], [1], [0], [0], [0, 0, 1, 0], [], []>} : vector<8x8xf32>, vector<8x8xf32>, vector<8x8xf32> -> vector<8x8xf32>
    %cst_24 = arith.constant dense<0xFF800000> : vector<8xf32>
    %51 = vector.multi_reduction <maximumf>, %50, %cst_24 [1] : vector<8x8xf32> to vector<8xf32>
    %52 = vector.shape_cast %51 : vector<8xf32> to vector<8x1xf32>
    %53 = vector.broadcast %52 : vector<8x1xf32> to vector<8x8xf32>
    %54 = arith.subf %50, %53 : vector<8x8xf32>
    %55 = math.exp %54 : vector<8x8xf32>
    %cst_25 = arith.constant dense<0.000000e+00> : vector<8xf32>
    %56 = vector.multi_reduction <add>, %55, %cst_25 [1] : vector<8x8xf32> to vector<8xf32>
    %57 = vector.shape_cast %56 : vector<8xf32> to vector<8x1xf32>
    %58 = tpu.reciprocal %57 {approx = true} : vector<8x1xf32> -> vector<8x1xf32>
    %59 = vector.broadcast %58 : vector<8x1xf32> to vector<8x8xf32>
    %60 = arith.mulf %55, %59 : vector<8x8xf32>
    %61 = vector.extract_strided_slice %17 {offsets = [0, 16], sizes = [8, 8], strides = [1, 1]} : vector<8x32xf32> to vector<8x8xf32>
    %cst_26 = arith.constant dense<0.000000e+00> : vector<8x8xf32>
    %62 = tpu.matmul %60, %61, %cst_26 {dimension_numbers = #tpu.dot_dimension_numbers<[1], [0], [0], [1], [0, 0, 1, 1], [], []>} : vector<8x8xf32>, vector<8x8xf32>, vector<8x8xf32> -> vector<8x8xf32>
    %63 = vector.extract_strided_slice %15 {offsets = [0, 24], sizes = [8, 8], strides = [1, 1]} : vector<8x32xf32> to vector<8x8xf32>
    %64 = vector.extract_strided_slice %16 {offsets = [0, 24], sizes = [8, 8], strides = [1, 1]} : vector<8x32xf32> to vector<8x8xf32>
    %cst_27 = arith.constant dense<0.000000e+00> : vector<8x8xf32>
    %65 = tpu.matmul %63, %64, %cst_27 {dimension_numbers = #tpu.dot_dimension_numbers<[1], [1], [0], [0], [0, 0, 1, 0], [], []>} : vector<8x8xf32>, vector<8x8xf32>, vector<8x8xf32> -> vector<8x8xf32>
    %cst_28 = arith.constant dense<0xFF800000> : vector<8xf32>
    %66 = vector.multi_reduction <maximumf>, %65, %cst_28 [1] : vector<8x8xf32> to vector<8xf32>
    %67 = vector.shape_cast %66 : vector<8xf32> to vector<8x1xf32>
    %68 = vector.broadcast %67 : vector<8x1xf32> to vector<8x8xf32>
    %69 = arith.subf %65, %68 : vector<8x8xf32>
    %70 = math.exp %69 : vector<8x8xf32>
    %cst_29 = arith.constant dense<0.000000e+00> : vector<8xf32>
    %71 = vector.multi_reduction <add>, %70, %cst_29 [1] : vector<8x8xf32> to vector<8xf32>
    %72 = vector.shape_cast %71 : vector<8xf32> to vector<8x1xf32>
    %73 = tpu.reciprocal %72 {approx = true} : vector<8x1xf32> -> vector<8x1xf32>
    %74 = vector.broadcast %73 : vector<8x1xf32> to vector<8x8xf32>
    %75 = arith.mulf %70, %74 : vector<8x8xf32>
    %76 = vector.extract_strided_slice %17 {offsets = [0, 24], sizes = [8, 8], strides = [1, 1]} : vector<8x32xf32> to vector<8x8xf32>
    %cst_30 = arith.constant dense<0.000000e+00> : vector<8x8xf32>
    %77 = tpu.matmul %75, %76, %cst_30 {dimension_numbers = #tpu.dot_dimension_numbers<[1], [0], [0], [1], [0, 0, 1, 1], [], []>} : vector<8x8xf32>, vector<8x8xf32>, vector<8x8xf32> -> vector<8x8xf32>
    %78 = tpu.concatenate %32, %47, %62, %77 in 1 : vector<8x8xf32>, vector<8x8xf32>, vector<8x8xf32>, vector<8x8xf32> -> vector<8x32xf32>
    %c0_31 = arith.constant 0 : index
    %c0_32 = arith.constant 0 : index
    %79 = vector.load %arg7[%c0_31, %c0_32] : memref<32x32xf32, #tpu.memory_space<vmem>>, vector<32x32xf32>
    %cst_33 = arith.constant dense<0.000000e+00> : vector<8x32xf32>
    %80 = tpu.matmul %78, %79, %cst_33 {dimension_numbers = #tpu.dot_dimension_numbers<[1], [0], [0], [1], [0, 0, 1, 1], [], []>} : vector<8x32xf32>, vector<32x32xf32>, vector<8x32xf32> -> vector<8x32xf32>
    %c0_34 = arith.constant 0 : index
    %c0_35 = arith.constant 0 : index
    %81 = vector.load %arg8[%c0_34, %c0_35] : memref<1x32xf32, #tpu.memory_space<vmem>>, vector<1x32xf32>
    %82 = vector.broadcast %81 : vector<1x32xf32> to vector<8x32xf32>
    %83 = arith.addf %80, %82 : vector<8x32xf32>
    %84 = arith.addf %9, %83 : vector<8x32xf32>
    %c0_36 = arith.constant 0 : index
    %c0_37 = arith.constant 0 : index
    %85 = vector.load %arg9[%c0_36, %c0_37] : memref<1x32xf32, #tpu.memory_space<vmem>>, vector<1x32xf32>
    %c0_38 = arith.constant 0 : index
    %c0_39 = arith.constant 0 : index
    %86 = vector.load %arg10[%c0_38, %c0_39] : memref<1x32xf32, #tpu.memory_space<vmem>>, vector<1x32xf32>
    %cst_40 = arith.constant dense<0.000000e+00> : vector<8xf32>
    %87 = vector.multi_reduction <add>, %84, %cst_40 [1] : vector<8x32xf32> to vector<8xf32>
    %88 = vector.shape_cast %87 : vector<8xf32> to vector<8x1xf32>
    %cst_41 = arith.constant 3.200000e+01 : f32
    %89 = vector.broadcast %cst_41 : f32 to vector<8x1xf32>
    %90 = arith.divf %88, %89 : vector<8x1xf32>
    %91 = vector.broadcast %90 : vector<8x1xf32> to vector<8x32xf32>
    %92 = arith.subf %84, %91 : vector<8x32xf32>
    %93 = arith.mulf %92, %92 : vector<8x32xf32>
    %cst_42 = arith.constant dense<0.000000e+00> : vector<8xf32>
    %94 = vector.multi_reduction <add>, %93, %cst_42 [1] : vector<8x32xf32> to vector<8xf32>
    %95 = vector.shape_cast %94 : vector<8xf32> to vector<8x1xf32>
    %cst_43 = arith.constant 3.200000e+01 : f32
    %96 = vector.broadcast %cst_43 : f32 to vector<8x1xf32>
    %97 = arith.divf %95, %96 : vector<8x1xf32>
    %98 = vector.broadcast %90 : vector<8x1xf32> to vector<8x32xf32>
    %99 = arith.subf %84, %98 : vector<8x32xf32>
    %cst_44 = arith.constant 9.99999974E-6 : f32
    %100 = vector.broadcast %cst_44 : f32 to vector<8x1xf32>
    %101 = arith.addf %97, %100 : vector<8x1xf32>
    %102 = math.rsqrt %101 : vector<8x1xf32>
    %103 = vector.broadcast %102 : vector<8x1xf32> to vector<8x32xf32>
    %104 = arith.mulf %99, %103 : vector<8x32xf32>
    %105 = vector.broadcast %85 : vector<1x32xf32> to vector<8x32xf32>
    %106 = arith.mulf %104, %105 : vector<8x32xf32>
    %107 = vector.broadcast %86 : vector<1x32xf32> to vector<8x32xf32>
    %108 = arith.addf %106, %107 : vector<8x32xf32>
    %c0_45 = arith.constant 0 : index
    %c0_46 = arith.constant 0 : index
    %109 = vector.load %arg11[%c0_45, %c0_46] : memref<32x32xf32, #tpu.memory_space<vmem>>, vector<32x32xf32>
    %cst_47 = arith.constant dense<0.000000e+00> : vector<8x32xf32>
    %110 = tpu.matmul %108, %109, %cst_47 {dimension_numbers = #tpu.dot_dimension_numbers<[1], [0], [0], [1], [0, 0, 1, 1], [], []>} : vector<8x32xf32>, vector<32x32xf32>, vector<8x32xf32> -> vector<8x32xf32>
    %c0_48 = arith.constant 0 : index
    %c0_49 = arith.constant 0 : index
    %111 = vector.load %arg12[%c0_48, %c0_49] : memref<1x32xf32, #tpu.memory_space<vmem>>, vector<1x32xf32>
    %112 = vector.broadcast %111 : vector<1x32xf32> to vector<8x32xf32>
    %113 = arith.addf %110, %112 : vector<8x32xf32>
    %c0_50 = arith.constant 0 : index
    %c0_51 = arith.constant 0 : index
    %114 = vector.load %arg13[%c0_50, %c0_51] : memref<32x64xf32, #tpu.memory_space<vmem>>, vector<32x64xf32>
    %cst_52 = arith.constant dense<0.000000e+00> : vector<10x64xf32>
    %115 = tpu.matmul %1, %114, %cst_52 {dimension_numbers = #tpu.dot_dimension_numbers<[1], [0], [0], [1], [0, 0, 1, 1], [], []>} : vector<10x32xf32>, vector<32x64xf32>, vector<10x64xf32> -> vector<10x64xf32>
    %c0_53 = arith.constant 0 : index
    %c0_54 = arith.constant 0 : index
    %116 = vector.load %arg14[%c0_53, %c0_54] : memref<1x64xf32, #tpu.memory_space<vmem>>, vector<1x64xf32>
    %117 = vector.broadcast %116 : vector<1x64xf32> to vector<10x64xf32>
    %118 = arith.addf %115, %117 : vector<10x64xf32>
    %119 = vector.extract_strided_slice %118 {offsets = [0, 0], sizes = [10, 32], strides = [1, 1]} : vector<10x64xf32> to vector<10x32xf32>
    %120 = vector.extract_strided_slice %118 {offsets = [0, 32], sizes = [10, 32], strides = [1, 1]} : vector<10x64xf32> to vector<10x32xf32>
    %121 = vector.extract_strided_slice %113 {offsets = [0, 0], sizes = [8, 8], strides = [1, 1]} : vector<8x32xf32> to vector<8x8xf32>
    %122 = vector.extract_strided_slice %119 {offsets = [0, 0], sizes = [10, 8], strides = [1, 1]} : vector<10x32xf32> to vector<10x8xf32>
    %cst_55 = arith.constant dense<0.000000e+00> : vector<8x10xf32>
    %123 = tpu.matmul %121, %122, %cst_55 {dimension_numbers = #tpu.dot_dimension_numbers<[1], [1], [0], [0], [0, 0, 1, 0], [], []>} : vector<8x8xf32>, vector<10x8xf32>, vector<8x10xf32> -> vector<8x10xf32>
    %cst_56 = arith.constant dense<0xFF800000> : vector<8xf32>
    %124 = vector.multi_reduction <maximumf>, %123, %cst_56 [1] : vector<8x10xf32> to vector<8xf32>
    %125 = vector.shape_cast %124 : vector<8xf32> to vector<8x1xf32>
    %126 = vector.broadcast %125 : vector<8x1xf32> to vector<8x10xf32>
    %127 = arith.subf %123, %126 : vector<8x10xf32>
    %128 = math.exp %127 : vector<8x10xf32>
    %cst_57 = arith.constant dense<0.000000e+00> : vector<8xf32>
    %129 = vector.multi_reduction <add>, %128, %cst_57 [1] : vector<8x10xf32> to vector<8xf32>
    %130 = vector.shape_cast %129 : vector<8xf32> to vector<8x1xf32>
    %131 = tpu.reciprocal %130 {approx = true} : vector<8x1xf32> -> vector<8x1xf32>
    %132 = vector.broadcast %131 : vector<8x1xf32> to vector<8x10xf32>
    %133 = arith.mulf %128, %132 : vector<8x10xf32>
    %134 = vector.extract_strided_slice %120 {offsets = [0, 0], sizes = [10, 8], strides = [1, 1]} : vector<10x32xf32> to vector<10x8xf32>
    %cst_58 = arith.constant dense<0.000000e+00> : vector<8x8xf32>
    %135 = tpu.matmul %133, %134, %cst_58 {dimension_numbers = #tpu.dot_dimension_numbers<[1], [0], [0], [1], [0, 0, 1, 1], [], []>} : vector<8x10xf32>, vector<10x8xf32>, vector<8x8xf32> -> vector<8x8xf32>
    %136 = vector.extract_strided_slice %113 {offsets = [0, 8], sizes = [8, 8], strides = [1, 1]} : vector<8x32xf32> to vector<8x8xf32>
    %137 = vector.extract_strided_slice %119 {offsets = [0, 8], sizes = [10, 8], strides = [1, 1]} : vector<10x32xf32> to vector<10x8xf32>
    %cst_59 = arith.constant dense<0.000000e+00> : vector<8x10xf32>
    %138 = tpu.matmul %136, %137, %cst_59 {dimension_numbers = #tpu.dot_dimension_numbers<[1], [1], [0], [0], [0, 0, 1, 0], [], []>} : vector<8x8xf32>, vector<10x8xf32>, vector<8x10xf32> -> vector<8x10xf32>
    %cst_60 = arith.constant dense<0xFF800000> : vector<8xf32>
    %139 = vector.multi_reduction <maximumf>, %138, %cst_60 [1] : vector<8x10xf32> to vector<8xf32>
    %140 = vector.shape_cast %139 : vector<8xf32> to vector<8x1xf32>
    %141 = vector.broadcast %140 : vector<8x1xf32> to vector<8x10xf32>
    %142 = arith.subf %138, %141 : vector<8x10xf32>
    %143 = math.exp %142 : vector<8x10xf32>
    %cst_61 = arith.constant dense<0.000000e+00> : vector<8xf32>
    %144 = vector.multi_reduction <add>, %143, %cst_61 [1] : vector<8x10xf32> to vector<8xf32>
    %145 = vector.shape_cast %144 : vector<8xf32> to vector<8x1xf32>
    %146 = tpu.reciprocal %145 {approx = true} : vector<8x1xf32> -> vector<8x1xf32>
    %147 = vector.broadcast %146 : vector<8x1xf32> to vector<8x10xf32>
    %148 = arith.mulf %143, %147 : vector<8x10xf32>
    %149 = vector.extract_strided_slice %120 {offsets = [0, 8], sizes = [10, 8], strides = [1, 1]} : vector<10x32xf32> to vector<10x8xf32>
    %cst_62 = arith.constant dense<0.000000e+00> : vector<8x8xf32>
    %150 = tpu.matmul %148, %149, %cst_62 {dimension_numbers = #tpu.dot_dimension_numbers<[1], [0], [0], [1], [0, 0, 1, 1], [], []>} : vector<8x10xf32>, vector<10x8xf32>, vector<8x8xf32> -> vector<8x8xf32>
    %151 = vector.extract_strided_slice %113 {offsets = [0, 16], sizes = [8, 8], strides = [1, 1]} : vector<8x32xf32> to vector<8x8xf32>
    %152 = vector.extract_strided_slice %119 {offsets = [0, 16], sizes = [10, 8], strides = [1, 1]} : vector<10x32xf32> to vector<10x8xf32>
    %cst_63 = arith.constant dense<0.000000e+00> : vector<8x10xf32>
    %153 = tpu.matmul %151, %152, %cst_63 {dimension_numbers = #tpu.dot_dimension_numbers<[1], [1], [0], [0], [0, 0, 1, 0], [], []>} : vector<8x8xf32>, vector<10x8xf32>, vector<8x10xf32> -> vector<8x10xf32>
    %cst_64 = arith.constant dense<0xFF800000> : vector<8xf32>
    %154 = vector.multi_reduction <maximumf>, %153, %cst_64 [1] : vector<8x10xf32> to vector<8xf32>
    %155 = vector.shape_cast %154 : vector<8xf32> to vector<8x1xf32>
    %156 = vector.broadcast %155 : vector<8x1xf32> to vector<8x10xf32>
    %157 = arith.subf %153, %156 : vector<8x10xf32>
    %158 = math.exp %157 : vector<8x10xf32>
    %cst_65 = arith.constant dense<0.000000e+00> : vector<8xf32>
    %159 = vector.multi_reduction <add>, %158, %cst_65 [1] : vector<8x10xf32> to vector<8xf32>
    %160 = vector.shape_cast %159 : vector<8xf32> to vector<8x1xf32>
    %161 = tpu.reciprocal %160 {approx = true} : vector<8x1xf32> -> vector<8x1xf32>
    %162 = vector.broadcast %161 : vector<8x1xf32> to vector<8x10xf32>
    %163 = arith.mulf %158, %162 : vector<8x10xf32>
    %164 = vector.extract_strided_slice %120 {offsets = [0, 16], sizes = [10, 8], strides = [1, 1]} : vector<10x32xf32> to vector<10x8xf32>
    %cst_66 = arith.constant dense<0.000000e+00> : vector<8x8xf32>
    %165 = tpu.matmul %163, %164, %cst_66 {dimension_numbers = #tpu.dot_dimension_numbers<[1], [0], [0], [1], [0, 0, 1, 1], [], []>} : vector<8x10xf32>, vector<10x8xf32>, vector<8x8xf32> -> vector<8x8xf32>
    %166 = vector.extract_strided_slice %113 {offsets = [0, 24], sizes = [8, 8], strides = [1, 1]} : vector<8x32xf32> to vector<8x8xf32>
    %167 = vector.extract_strided_slice %119 {offsets = [0, 24], sizes = [10, 8], strides = [1, 1]} : vector<10x32xf32> to vector<10x8xf32>
    %cst_67 = arith.constant dense<0.000000e+00> : vector<8x10xf32>
    %168 = tpu.matmul %166, %167, %cst_67 {dimension_numbers = #tpu.dot_dimension_numbers<[1], [1], [0], [0], [0, 0, 1, 0], [], []>} : vector<8x8xf32>, vector<10x8xf32>, vector<8x10xf32> -> vector<8x10xf32>
    %cst_68 = arith.constant dense<0xFF800000> : vector<8xf32>
    %169 = vector.multi_reduction <maximumf>, %168, %cst_68 [1] : vector<8x10xf32> to vector<8xf32>
    %170 = vector.shape_cast %169 : vector<8xf32> to vector<8x1xf32>
    %171 = vector.broadcast %170 : vector<8x1xf32> to vector<8x10xf32>
    %172 = arith.subf %168, %171 : vector<8x10xf32>
    %173 = math.exp %172 : vector<8x10xf32>
    %cst_69 = arith.constant dense<0.000000e+00> : vector<8xf32>
    %174 = vector.multi_reduction <add>, %173, %cst_69 [1] : vector<8x10xf32> to vector<8xf32>
    %175 = vector.shape_cast %174 : vector<8xf32> to vector<8x1xf32>
    %176 = tpu.reciprocal %175 {approx = true} : vector<8x1xf32> -> vector<8x1xf32>
    %177 = vector.broadcast %176 : vector<8x1xf32> to vector<8x10xf32>
    %178 = arith.mulf %173, %177 : vector<8x10xf32>
    %179 = vector.extract_strided_slice %120 {offsets = [0, 24], sizes = [10, 8], strides = [1, 1]} : vector<10x32xf32> to vector<10x8xf32>
    %cst_70 = arith.constant dense<0.000000e+00> : vector<8x8xf32>
    %180 = tpu.matmul %178, %179, %cst_70 {dimension_numbers = #tpu.dot_dimension_numbers<[1], [0], [0], [1], [0, 0, 1, 1], [], []>} : vector<8x10xf32>, vector<10x8xf32>, vector<8x8xf32> -> vector<8x8xf32>
    %181 = tpu.concatenate %135, %150, %165, %180 in 1 : vector<8x8xf32>, vector<8x8xf32>, vector<8x8xf32>, vector<8x8xf32> -> vector<8x32xf32>
    %c0_71 = arith.constant 0 : index
    %c0_72 = arith.constant 0 : index
    %182 = vector.load %arg15[%c0_71, %c0_72] : memref<32x32xf32, #tpu.memory_space<vmem>>, vector<32x32xf32>
    %cst_73 = arith.constant dense<0.000000e+00> : vector<8x32xf32>
    %183 = tpu.matmul %181, %182, %cst_73 {dimension_numbers = #tpu.dot_dimension_numbers<[1], [0], [0], [1], [0, 0, 1, 1], [], []>} : vector<8x32xf32>, vector<32x32xf32>, vector<8x32xf32> -> vector<8x32xf32>
    %c0_74 = arith.constant 0 : index
    %c0_75 = arith.constant 0 : index
    %184 = vector.load %arg16[%c0_74, %c0_75] : memref<1x32xf32, #tpu.memory_space<vmem>>, vector<1x32xf32>
    %185 = vector.broadcast %184 : vector<1x32xf32> to vector<8x32xf32>
    %186 = arith.addf %183, %185 : vector<8x32xf32>
    %187 = arith.addf %108, %186 : vector<8x32xf32>
    %c0_76 = arith.constant 0 : index
    %c0_77 = arith.constant 0 : index
    %188 = vector.load %arg17[%c0_76, %c0_77] : memref<1x32xf32, #tpu.memory_space<vmem>>, vector<1x32xf32>
    %c0_78 = arith.constant 0 : index
    %c0_79 = arith.constant 0 : index
    %189 = vector.load %arg18[%c0_78, %c0_79] : memref<1x32xf32, #tpu.memory_space<vmem>>, vector<1x32xf32>
    %cst_80 = arith.constant dense<0.000000e+00> : vector<8xf32>
    %190 = vector.multi_reduction <add>, %187, %cst_80 [1] : vector<8x32xf32> to vector<8xf32>
    %191 = vector.shape_cast %190 : vector<8xf32> to vector<8x1xf32>
    %cst_81 = arith.constant 3.200000e+01 : f32
    %192 = vector.broadcast %cst_81 : f32 to vector<8x1xf32>
    %193 = arith.divf %191, %192 : vector<8x1xf32>
    %194 = vector.broadcast %193 : vector<8x1xf32> to vector<8x32xf32>
    %195 = arith.subf %187, %194 : vector<8x32xf32>
    %196 = arith.mulf %195, %195 : vector<8x32xf32>
    %cst_82 = arith.constant dense<0.000000e+00> : vector<8xf32>
    %197 = vector.multi_reduction <add>, %196, %cst_82 [1] : vector<8x32xf32> to vector<8xf32>
    %198 = vector.shape_cast %197 : vector<8xf32> to vector<8x1xf32>
    %cst_83 = arith.constant 3.200000e+01 : f32
    %199 = vector.broadcast %cst_83 : f32 to vector<8x1xf32>
    %200 = arith.divf %198, %199 : vector<8x1xf32>
    %201 = vector.broadcast %193 : vector<8x1xf32> to vector<8x32xf32>
    %202 = arith.subf %187, %201 : vector<8x32xf32>
    %cst_84 = arith.constant 9.99999974E-6 : f32
    %203 = vector.broadcast %cst_84 : f32 to vector<8x1xf32>
    %204 = arith.addf %200, %203 : vector<8x1xf32>
    %205 = math.rsqrt %204 : vector<8x1xf32>
    %206 = vector.broadcast %205 : vector<8x1xf32> to vector<8x32xf32>
    %207 = arith.mulf %202, %206 : vector<8x32xf32>
    %208 = vector.broadcast %188 : vector<1x32xf32> to vector<8x32xf32>
    %209 = arith.mulf %207, %208 : vector<8x32xf32>
    %210 = vector.broadcast %189 : vector<1x32xf32> to vector<8x32xf32>
    %211 = arith.addf %209, %210 : vector<8x32xf32>
    %c0_85 = arith.constant 0 : index
    %c0_86 = arith.constant 0 : index
    %212 = vector.load %arg19[%c0_85, %c0_86] : memref<32x64xf32, #tpu.memory_space<vmem>>, vector<32x64xf32>
    %cst_87 = arith.constant dense<0.000000e+00> : vector<8x64xf32>
    %213 = tpu.matmul %211, %212, %cst_87 {dimension_numbers = #tpu.dot_dimension_numbers<[1], [0], [0], [1], [0, 0, 1, 1], [], []>} : vector<8x32xf32>, vector<32x64xf32>, vector<8x64xf32> -> vector<8x64xf32>
    %c0_88 = arith.constant 0 : index
    %c0_89 = arith.constant 0 : index
    %214 = vector.load %arg20[%c0_88, %c0_89] : memref<1x64xf32, #tpu.memory_space<vmem>>, vector<1x64xf32>
    %215 = vector.broadcast %214 : vector<1x64xf32> to vector<8x64xf32>
    %216 = arith.addf %213, %215 : vector<8x64xf32>
    %cst_90 = arith.constant 0.000000e+00 : f32
    %217 = vector.broadcast %cst_90 : f32 to vector<8x64xf32>
    %218 = arith.maximumf %216, %217 : vector<8x64xf32>
    %c0_91 = arith.constant 0 : index
    %c0_92 = arith.constant 0 : index
    %219 = vector.load %arg21[%c0_91, %c0_92] : memref<64x32xf32, #tpu.memory_space<vmem>>, vector<64x32xf32>
    %cst_93 = arith.constant dense<0.000000e+00> : vector<8x32xf32>
    %220 = tpu.matmul %218, %219, %cst_93 {dimension_numbers = #tpu.dot_dimension_numbers<[1], [0], [0], [1], [0, 0, 1, 1], [], []>} : vector<8x64xf32>, vector<64x32xf32>, vector<8x32xf32> -> vector<8x32xf32>
    %c0_94 = arith.constant 0 : index
    %c0_95 = arith.constant 0 : index
    %221 = vector.load %arg22[%c0_94, %c0_95] : memref<1x32xf32, #tpu.memory_space<vmem>>, vector<1x32xf32>
    %222 = vector.broadcast %221 : vector<1x32xf32> to vector<8x32xf32>
    %223 = arith.addf %220, %222 : vector<8x32xf32>
    %224 = arith.addf %211, %223 : vector<8x32xf32>
    %c0_96 = arith.constant 0 : index
    %c0_97 = arith.constant 0 : index
    %225 = vector.load %arg23[%c0_96, %c0_97] : memref<1x32xf32, #tpu.memory_space<vmem>>, vector<1x32xf32>
    %c0_98 = arith.constant 0 : index
    %c0_99 = arith.constant 0 : index
    %226 = vector.load %arg24[%c0_98, %c0_99] : memref<1x32xf32, #tpu.memory_space<vmem>>, vector<1x32xf32>
    %cst_100 = arith.constant dense<0.000000e+00> : vector<8xf32>
    %227 = vector.multi_reduction <add>, %224, %cst_100 [1] : vector<8x32xf32> to vector<8xf32>
    %228 = vector.shape_cast %227 : vector<8xf32> to vector<8x1xf32>
    %cst_101 = arith.constant 3.200000e+01 : f32
    %229 = vector.broadcast %cst_101 : f32 to vector<8x1xf32>
    %230 = arith.divf %228, %229 : vector<8x1xf32>
    %231 = vector.broadcast %230 : vector<8x1xf32> to vector<8x32xf32>
    %232 = arith.subf %224, %231 : vector<8x32xf32>
    %233 = arith.mulf %232, %232 : vector<8x32xf32>
    %cst_102 = arith.constant dense<0.000000e+00> : vector<8xf32>
    %234 = vector.multi_reduction <add>, %233, %cst_102 [1] : vector<8x32xf32> to vector<8xf32>
    %235 = vector.shape_cast %234 : vector<8xf32> to vector<8x1xf32>
    %cst_103 = arith.constant 3.200000e+01 : f32
    %236 = vector.broadcast %cst_103 : f32 to vector<8x1xf32>
    %237 = arith.divf %235, %236 : vector<8x1xf32>
    %238 = vector.broadcast %230 : vector<8x1xf32> to vector<8x32xf32>
    %239 = arith.subf %224, %238 : vector<8x32xf32>
    %cst_104 = arith.constant 9.99999974E-6 : f32
    %240 = vector.broadcast %cst_104 : f32 to vector<8x1xf32>
    %241 = arith.addf %237, %240 : vector<8x1xf32>
    %242 = math.rsqrt %241 : vector<8x1xf32>
    %243 = vector.broadcast %242 : vector<8x1xf32> to vector<8x32xf32>
    %244 = arith.mulf %239, %243 : vector<8x32xf32>
    %245 = vector.broadcast %225 : vector<1x32xf32> to vector<8x32xf32>
    %246 = arith.mulf %244, %245 : vector<8x32xf32>
    %247 = vector.broadcast %226 : vector<1x32xf32> to vector<8x32xf32>
    %248 = arith.addf %246, %247 : vector<8x32xf32>
    %c0_105 = arith.constant 0 : index
    %c0_106 = arith.constant 0 : index
    %249 = vector.load %arg25[%c0_105, %c0_106] : memref<32x96xf32, #tpu.memory_space<vmem>>, vector<32x96xf32>
    %cst_107 = arith.constant dense<0.000000e+00> : vector<8x96xf32>
    %250 = tpu.matmul %248, %249, %cst_107 {dimension_numbers = #tpu.dot_dimension_numbers<[1], [0], [0], [1], [0, 0, 1, 1], [], []>} : vector<8x32xf32>, vector<32x96xf32>, vector<8x96xf32> -> vector<8x96xf32>
    %c0_108 = arith.constant 0 : index
    %c0_109 = arith.constant 0 : index
    %251 = vector.load %arg26[%c0_108, %c0_109] : memref<1x96xf32, #tpu.memory_space<vmem>>, vector<1x96xf32>
    %252 = vector.broadcast %251 : vector<1x96xf32> to vector<8x96xf32>
    %253 = arith.addf %250, %252 : vector<8x96xf32>
    %254 = vector.extract_strided_slice %253 {offsets = [0, 0], sizes = [8, 32], strides = [1, 1]} : vector<8x96xf32> to vector<8x32xf32>
    %255 = vector.extract_strided_slice %253 {offsets = [0, 32], sizes = [8, 32], strides = [1, 1]} : vector<8x96xf32> to vector<8x32xf32>
    %256 = vector.extract_strided_slice %253 {offsets = [0, 64], sizes = [8, 32], strides = [1, 1]} : vector<8x96xf32> to vector<8x32xf32>
    %257 = vector.extract_strided_slice %254 {offsets = [0, 0], sizes = [8, 8], strides = [1, 1]} : vector<8x32xf32> to vector<8x8xf32>
    %258 = vector.extract_strided_slice %255 {offsets = [0, 0], sizes = [8, 8], strides = [1, 1]} : vector<8x32xf32> to vector<8x8xf32>
    %cst_110 = arith.constant dense<0.000000e+00> : vector<8x8xf32>
    %259 = tpu.matmul %257, %258, %cst_110 {dimension_numbers = #tpu.dot_dimension_numbers<[1], [1], [0], [0], [0, 0, 1, 0], [], []>} : vector<8x8xf32>, vector<8x8xf32>, vector<8x8xf32> -> vector<8x8xf32>
    %cst_111 = arith.constant dense<0xFF800000> : vector<8xf32>
    %260 = vector.multi_reduction <maximumf>, %259, %cst_111 [1] : vector<8x8xf32> to vector<8xf32>
    %261 = vector.shape_cast %260 : vector<8xf32> to vector<8x1xf32>
    %262 = vector.broadcast %261 : vector<8x1xf32> to vector<8x8xf32>
    %263 = arith.subf %259, %262 : vector<8x8xf32>
    %264 = math.exp %263 : vector<8x8xf32>
    %cst_112 = arith.constant dense<0.000000e+00> : vector<8xf32>
    %265 = vector.multi_reduction <add>, %264, %cst_112 [1] : vector<8x8xf32> to vector<8xf32>
    %266 = vector.shape_cast %265 : vector<8xf32> to vector<8x1xf32>
    %267 = tpu.reciprocal %266 {approx = true} : vector<8x1xf32> -> vector<8x1xf32>
    %268 = vector.broadcast %267 : vector<8x1xf32> to vector<8x8xf32>
    %269 = arith.mulf %264, %268 : vector<8x8xf32>
    %270 = vector.extract_strided_slice %256 {offsets = [0, 0], sizes = [8, 8], strides = [1, 1]} : vector<8x32xf32> to vector<8x8xf32>
    %cst_113 = arith.constant dense<0.000000e+00> : vector<8x8xf32>
    %271 = tpu.matmul %269, %270, %cst_113 {dimension_numbers = #tpu.dot_dimension_numbers<[1], [0], [0], [1], [0, 0, 1, 1], [], []>} : vector<8x8xf32>, vector<8x8xf32>, vector<8x8xf32> -> vector<8x8xf32>
    %272 = vector.extract_strided_slice %254 {offsets = [0, 8], sizes = [8, 8], strides = [1, 1]} : vector<8x32xf32> to vector<8x8xf32>
    %273 = vector.extract_strided_slice %255 {offsets = [0, 8], sizes = [8, 8], strides = [1, 1]} : vector<8x32xf32> to vector<8x8xf32>
    %cst_114 = arith.constant dense<0.000000e+00> : vector<8x8xf32>
    %274 = tpu.matmul %272, %273, %cst_114 {dimension_numbers = #tpu.dot_dimension_numbers<[1], [1], [0], [0], [0, 0, 1, 0], [], []>} : vector<8x8xf32>, vector<8x8xf32>, vector<8x8xf32> -> vector<8x8xf32>
    %cst_115 = arith.constant dense<0xFF800000> : vector<8xf32>
    %275 = vector.multi_reduction <maximumf>, %274, %cst_115 [1] : vector<8x8xf32> to vector<8xf32>
    %276 = vector.shape_cast %275 : vector<8xf32> to vector<8x1xf32>
    %277 = vector.broadcast %276 : vector<8x1xf32> to vector<8x8xf32>
    %278 = arith.subf %274, %277 : vector<8x8xf32>
    %279 = math.exp %278 : vector<8x8xf32>
    %cst_116 = arith.constant dense<0.000000e+00> : vector<8xf32>
    %280 = vector.multi_reduction <add>, %279, %cst_116 [1] : vector<8x8xf32> to vector<8xf32>
    %281 = vector.shape_cast %280 : vector<8xf32> to vector<8x1xf32>
    %282 = tpu.reciprocal %281 {approx = true} : vector<8x1xf32> -> vector<8x1xf32>
    %283 = vector.broadcast %282 : vector<8x1xf32> to vector<8x8xf32>
    %284 = arith.mulf %279, %283 : vector<8x8xf32>
    %285 = vector.extract_strided_slice %256 {offsets = [0, 8], sizes = [8, 8], strides = [1, 1]} : vector<8x32xf32> to vector<8x8xf32>
    %cst_117 = arith.constant dense<0.000000e+00> : vector<8x8xf32>
    %286 = tpu.matmul %284, %285, %cst_117 {dimension_numbers = #tpu.dot_dimension_numbers<[1], [0], [0], [1], [0, 0, 1, 1], [], []>} : vector<8x8xf32>, vector<8x8xf32>, vector<8x8xf32> -> vector<8x8xf32>
    %287 = vector.extract_strided_slice %254 {offsets = [0, 16], sizes = [8, 8], strides = [1, 1]} : vector<8x32xf32> to vector<8x8xf32>
    %288 = vector.extract_strided_slice %255 {offsets = [0, 16], sizes = [8, 8], strides = [1, 1]} : vector<8x32xf32> to vector<8x8xf32>
    %cst_118 = arith.constant dense<0.000000e+00> : vector<8x8xf32>
    %289 = tpu.matmul %287, %288, %cst_118 {dimension_numbers = #tpu.dot_dimension_numbers<[1], [1], [0], [0], [0, 0, 1, 0], [], []>} : vector<8x8xf32>, vector<8x8xf32>, vector<8x8xf32> -> vector<8x8xf32>
    %cst_119 = arith.constant dense<0xFF800000> : vector<8xf32>
    %290 = vector.multi_reduction <maximumf>, %289, %cst_119 [1] : vector<8x8xf32> to vector<8xf32>
    %291 = vector.shape_cast %290 : vector<8xf32> to vector<8x1xf32>
    %292 = vector.broadcast %291 : vector<8x1xf32> to vector<8x8xf32>
    %293 = arith.subf %289, %292 : vector<8x8xf32>
    %294 = math.exp %293 : vector<8x8xf32>
    %cst_120 = arith.constant dense<0.000000e+00> : vector<8xf32>
    %295 = vector.multi_reduction <add>, %294, %cst_120 [1] : vector<8x8xf32> to vector<8xf32>
    %296 = vector.shape_cast %295 : vector<8xf32> to vector<8x1xf32>
    %297 = tpu.reciprocal %296 {approx = true} : vector<8x1xf32> -> vector<8x1xf32>
    %298 = vector.broadcast %297 : vector<8x1xf32> to vector<8x8xf32>
    %299 = arith.mulf %294, %298 : vector<8x8xf32>
    %300 = vector.extract_strided_slice %256 {offsets = [0, 16], sizes = [8, 8], strides = [1, 1]} : vector<8x32xf32> to vector<8x8xf32>
    %cst_121 = arith.constant dense<0.000000e+00> : vector<8x8xf32>
    %301 = tpu.matmul %299, %300, %cst_121 {dimension_numbers = #tpu.dot_dimension_numbers<[1], [0], [0], [1], [0, 0, 1, 1], [], []>} : vector<8x8xf32>, vector<8x8xf32>, vector<8x8xf32> -> vector<8x8xf32>
    %302 = vector.extract_strided_slice %254 {offsets = [0, 24], sizes = [8, 8], strides = [1, 1]} : vector<8x32xf32> to vector<8x8xf32>
    %303 = vector.extract_strided_slice %255 {offsets = [0, 24], sizes = [8, 8], strides = [1, 1]} : vector<8x32xf32> to vector<8x8xf32>
    %cst_122 = arith.constant dense<0.000000e+00> : vector<8x8xf32>
    %304 = tpu.matmul %302, %303, %cst_122 {dimension_numbers = #tpu.dot_dimension_numbers<[1], [1], [0], [0], [0, 0, 1, 0], [], []>} : vector<8x8xf32>, vector<8x8xf32>, vector<8x8xf32> -> vector<8x8xf32>
    %cst_123 = arith.constant dense<0xFF800000> : vector<8xf32>
    %305 = vector.multi_reduction <maximumf>, %304, %cst_123 [1] : vector<8x8xf32> to vector<8xf32>
    %306 = vector.shape_cast %305 : vector<8xf32> to vector<8x1xf32>
    %307 = vector.broadcast %306 : vector<8x1xf32> to vector<8x8xf32>
    %308 = arith.subf %304, %307 : vector<8x8xf32>
    %309 = math.exp %308 : vector<8x8xf32>
    %cst_124 = arith.constant dense<0.000000e+00> : vector<8xf32>
    %310 = vector.multi_reduction <add>, %309, %cst_124 [1] : vector<8x8xf32> to vector<8xf32>
    %311 = vector.shape_cast %310 : vector<8xf32> to vector<8x1xf32>
    %312 = tpu.reciprocal %311 {approx = true} : vector<8x1xf32> -> vector<8x1xf32>
    %313 = vector.broadcast %312 : vector<8x1xf32> to vector<8x8xf32>
    %314 = arith.mulf %309, %313 : vector<8x8xf32>
    %315 = vector.extract_strided_slice %256 {offsets = [0, 24], sizes = [8, 8], strides = [1, 1]} : vector<8x32xf32> to vector<8x8xf32>
    %cst_125 = arith.constant dense<0.000000e+00> : vector<8x8xf32>
    %316 = tpu.matmul %314, %315, %cst_125 {dimension_numbers = #tpu.dot_dimension_numbers<[1], [0], [0], [1], [0, 0, 1, 1], [], []>} : vector<8x8xf32>, vector<8x8xf32>, vector<8x8xf32> -> vector<8x8xf32>
    %317 = tpu.concatenate %271, %286, %301, %316 in 1 : vector<8x8xf32>, vector<8x8xf32>, vector<8x8xf32>, vector<8x8xf32> -> vector<8x32xf32>
    %c0_126 = arith.constant 0 : index
    %c0_127 = arith.constant 0 : index
    %318 = vector.load %arg27[%c0_126, %c0_127] : memref<32x32xf32, #tpu.memory_space<vmem>>, vector<32x32xf32>
    %cst_128 = arith.constant dense<0.000000e+00> : vector<8x32xf32>
    %319 = tpu.matmul %317, %318, %cst_128 {dimension_numbers = #tpu.dot_dimension_numbers<[1], [0], [0], [1], [0, 0, 1, 1], [], []>} : vector<8x32xf32>, vector<32x32xf32>, vector<8x32xf32> -> vector<8x32xf32>
    %c0_129 = arith.constant 0 : index
    %c0_130 = arith.constant 0 : index
    %320 = vector.load %arg28[%c0_129, %c0_130] : memref<1x32xf32, #tpu.memory_space<vmem>>, vector<1x32xf32>
    %321 = vector.broadcast %320 : vector<1x32xf32> to vector<8x32xf32>
    %322 = arith.addf %319, %321 : vector<8x32xf32>
    %323 = arith.addf %248, %322 : vector<8x32xf32>
    %c0_131 = arith.constant 0 : index
    %c0_132 = arith.constant 0 : index
    %324 = vector.load %arg29[%c0_131, %c0_132] : memref<1x32xf32, #tpu.memory_space<vmem>>, vector<1x32xf32>
    %c0_133 = arith.constant 0 : index
    %c0_134 = arith.constant 0 : index
    %325 = vector.load %arg30[%c0_133, %c0_134] : memref<1x32xf32, #tpu.memory_space<vmem>>, vector<1x32xf32>
    %cst_135 = arith.constant dense<0.000000e+00> : vector<8xf32>
    %326 = vector.multi_reduction <add>, %323, %cst_135 [1] : vector<8x32xf32> to vector<8xf32>
    %327 = vector.shape_cast %326 : vector<8xf32> to vector<8x1xf32>
    %cst_136 = arith.constant 3.200000e+01 : f32
    %328 = vector.broadcast %cst_136 : f32 to vector<8x1xf32>
    %329 = arith.divf %327, %328 : vector<8x1xf32>
    %330 = vector.broadcast %329 : vector<8x1xf32> to vector<8x32xf32>
    %331 = arith.subf %323, %330 : vector<8x32xf32>
    %332 = arith.mulf %331, %331 : vector<8x32xf32>
    %cst_137 = arith.constant dense<0.000000e+00> : vector<8xf32>
    %333 = vector.multi_reduction <add>, %332, %cst_137 [1] : vector<8x32xf32> to vector<8xf32>
    %334 = vector.shape_cast %333 : vector<8xf32> to vector<8x1xf32>
    %cst_138 = arith.constant 3.200000e+01 : f32
    %335 = vector.broadcast %cst_138 : f32 to vector<8x1xf32>
    %336 = arith.divf %334, %335 : vector<8x1xf32>
    %337 = vector.broadcast %329 : vector<8x1xf32> to vector<8x32xf32>
    %338 = arith.subf %323, %337 : vector<8x32xf32>
    %cst_139 = arith.constant 9.99999974E-6 : f32
    %339 = vector.broadcast %cst_139 : f32 to vector<8x1xf32>
    %340 = arith.addf %336, %339 : vector<8x1xf32>
    %341 = math.rsqrt %340 : vector<8x1xf32>
    %342 = vector.broadcast %341 : vector<8x1xf32> to vector<8x32xf32>
    %343 = arith.mulf %338, %342 : vector<8x32xf32>
    %344 = vector.broadcast %324 : vector<1x32xf32> to vector<8x32xf32>
    %345 = arith.mulf %343, %344 : vector<8x32xf32>
    %346 = vector.broadcast %325 : vector<1x32xf32> to vector<8x32xf32>
    %347 = arith.addf %345, %346 : vector<8x32xf32>
    %c0_140 = arith.constant 0 : index
    %c0_141 = arith.constant 0 : index
    %348 = vector.load %arg31[%c0_140, %c0_141] : memref<32x32xf32, #tpu.memory_space<vmem>>, vector<32x32xf32>
    %cst_142 = arith.constant dense<0.000000e+00> : vector<8x32xf32>
    %349 = tpu.matmul %347, %348, %cst_142 {dimension_numbers = #tpu.dot_dimension_numbers<[1], [0], [0], [1], [0, 0, 1, 1], [], []>} : vector<8x32xf32>, vector<32x32xf32>, vector<8x32xf32> -> vector<8x32xf32>
    %c0_143 = arith.constant 0 : index
    %c0_144 = arith.constant 0 : index
    %350 = vector.load %arg32[%c0_143, %c0_144] : memref<1x32xf32, #tpu.memory_space<vmem>>, vector<1x32xf32>
    %351 = vector.broadcast %350 : vector<1x32xf32> to vector<8x32xf32>
    %352 = arith.addf %349, %351 : vector<8x32xf32>
    %c0_145 = arith.constant 0 : index
    %c0_146 = arith.constant 0 : index
    %353 = vector.load %arg33[%c0_145, %c0_146] : memref<32x64xf32, #tpu.memory_space<vmem>>, vector<32x64xf32>
    %cst_147 = arith.constant dense<0.000000e+00> : vector<10x64xf32>
    %354 = tpu.matmul %1, %353, %cst_147 {dimension_numbers = #tpu.dot_dimension_numbers<[1], [0], [0], [1], [0, 0, 1, 1], [], []>} : vector<10x32xf32>, vector<32x64xf32>, vector<10x64xf32> -> vector<10x64xf32>
    %c0_148 = arith.constant 0 : index
    %c0_149 = arith.constant 0 : index
    %355 = vector.load %arg34[%c0_148, %c0_149] : memref<1x64xf32, #tpu.memory_space<vmem>>, vector<1x64xf32>
    %356 = vector.broadcast %355 : vector<1x64xf32> to vector<10x64xf32>
    %357 = arith.addf %354, %356 : vector<10x64xf32>
    %358 = vector.extract_strided_slice %357 {offsets = [0, 0], sizes = [10, 32], strides = [1, 1]} : vector<10x64xf32> to vector<10x32xf32>
    %359 = vector.extract_strided_slice %357 {offsets = [0, 32], sizes = [10, 32], strides = [1, 1]} : vector<10x64xf32> to vector<10x32xf32>
    %360 = vector.extract_strided_slice %352 {offsets = [0, 0], sizes = [8, 8], strides = [1, 1]} : vector<8x32xf32> to vector<8x8xf32>
    %361 = vector.extract_strided_slice %358 {offsets = [0, 0], sizes = [10, 8], strides = [1, 1]} : vector<10x32xf32> to vector<10x8xf32>
    %cst_150 = arith.constant dense<0.000000e+00> : vector<8x10xf32>
    %362 = tpu.matmul %360, %361, %cst_150 {dimension_numbers = #tpu.dot_dimension_numbers<[1], [1], [0], [0], [0, 0, 1, 0], [], []>} : vector<8x8xf32>, vector<10x8xf32>, vector<8x10xf32> -> vector<8x10xf32>
    %cst_151 = arith.constant dense<0xFF800000> : vector<8xf32>
    %363 = vector.multi_reduction <maximumf>, %362, %cst_151 [1] : vector<8x10xf32> to vector<8xf32>
    %364 = vector.shape_cast %363 : vector<8xf32> to vector<8x1xf32>
    %365 = vector.broadcast %364 : vector<8x1xf32> to vector<8x10xf32>
    %366 = arith.subf %362, %365 : vector<8x10xf32>
    %367 = math.exp %366 : vector<8x10xf32>
    %cst_152 = arith.constant dense<0.000000e+00> : vector<8xf32>
    %368 = vector.multi_reduction <add>, %367, %cst_152 [1] : vector<8x10xf32> to vector<8xf32>
    %369 = vector.shape_cast %368 : vector<8xf32> to vector<8x1xf32>
    %370 = vector.broadcast %369 : vector<8x1xf32> to vector<8x10xf32>
    %371 = arith.divf %367, %370 : vector<8x10xf32>
    %372 = vector.extract_strided_slice %359 {offsets = [0, 0], sizes = [10, 8], strides = [1, 1]} : vector<10x32xf32> to vector<10x8xf32>
    %cst_153 = arith.constant dense<0.000000e+00> : vector<8x8xf32>
    %373 = tpu.matmul %371, %372, %cst_153 {dimension_numbers = #tpu.dot_dimension_numbers<[1], [0], [0], [1], [0, 0, 1, 1], [], []>} : vector<8x10xf32>, vector<10x8xf32>, vector<8x8xf32> -> vector<8x8xf32>
    %374 = vector.extract_strided_slice %352 {offsets = [0, 8], sizes = [8, 8], strides = [1, 1]} : vector<8x32xf32> to vector<8x8xf32>
    %375 = vector.extract_strided_slice %358 {offsets = [0, 8], sizes = [10, 8], strides = [1, 1]} : vector<10x32xf32> to vector<10x8xf32>
    %cst_154 = arith.constant dense<0.000000e+00> : vector<8x10xf32>
    %376 = tpu.matmul %374, %375, %cst_154 {dimension_numbers = #tpu.dot_dimension_numbers<[1], [1], [0], [0], [0, 0, 1, 0], [], []>} : vector<8x8xf32>, vector<10x8xf32>, vector<8x10xf32> -> vector<8x10xf32>
    %cst_155 = arith.constant dense<0xFF800000> : vector<8xf32>
    %377 = vector.multi_reduction <maximumf>, %376, %cst_155 [1] : vector<8x10xf32> to vector<8xf32>
    %378 = vector.shape_cast %377 : vector<8xf32> to vector<8x1xf32>
    %379 = vector.broadcast %378 : vector<8x1xf32> to vector<8x10xf32>
    %380 = arith.subf %376, %379 : vector<8x10xf32>
    %381 = math.exp %380 : vector<8x10xf32>
    %cst_156 = arith.constant dense<0.000000e+00> : vector<8xf32>
    %382 = vector.multi_reduction <add>, %381, %cst_156 [1] : vector<8x10xf32> to vector<8xf32>
    %383 = vector.shape_cast %382 : vector<8xf32> to vector<8x1xf32>
    %384 = vector.broadcast %383 : vector<8x1xf32> to vector<8x10xf32>
    %385 = arith.divf %381, %384 : vector<8x10xf32>
    %386 = vector.extract_strided_slice %359 {offsets = [0, 8], sizes = [10, 8], strides = [1, 1]} : vector<10x32xf32> to vector<10x8xf32>
    %cst_157 = arith.constant dense<0.000000e+00> : vector<8x8xf32>
    %387 = tpu.matmul %385, %386, %cst_157 {dimension_numbers = #tpu.dot_dimension_numbers<[1], [0], [0], [1], [0, 0, 1, 1], [], []>} : vector<8x10xf32>, vector<10x8xf32>, vector<8x8xf32> -> vector<8x8xf32>
    %388 = vector.extract_strided_slice %352 {offsets = [0, 16], sizes = [8, 8], strides = [1, 1]} : vector<8x32xf32> to vector<8x8xf32>
    %389 = vector.extract_strided_slice %358 {offsets = [0, 16], sizes = [10, 8], strides = [1, 1]} : vector<10x32xf32> to vector<10x8xf32>
    %cst_158 = arith.constant dense<0.000000e+00> : vector<8x10xf32>
    %390 = tpu.matmul %388, %389, %cst_158 {dimension_numbers = #tpu.dot_dimension_numbers<[1], [1], [0], [0], [0, 0, 1, 0], [], []>} : vector<8x8xf32>, vector<10x8xf32>, vector<8x10xf32> -> vector<8x10xf32>
    %cst_159 = arith.constant dense<0xFF800000> : vector<8xf32>
    %391 = vector.multi_reduction <maximumf>, %390, %cst_159 [1] : vector<8x10xf32> to vector<8xf32>
    %392 = vector.shape_cast %391 : vector<8xf32> to vector<8x1xf32>
    %393 = vector.broadcast %392 : vector<8x1xf32> to vector<8x10xf32>
    %394 = arith.subf %390, %393 : vector<8x10xf32>
    %395 = math.exp %394 : vector<8x10xf32>
    %cst_160 = arith.constant dense<0.000000e+00> : vector<8xf32>
    %396 = vector.multi_reduction <add>, %395, %cst_160 [1] : vector<8x10xf32> to vector<8xf32>
    %397 = vector.shape_cast %396 : vector<8xf32> to vector<8x1xf32>
    %398 = vector.broadcast %397 : vector<8x1xf32> to vector<8x10xf32>
    %399 = arith.divf %395, %398 : vector<8x10xf32>
    %400 = vector.extract_strided_slice %359 {offsets = [0, 16], sizes = [10, 8], strides = [1, 1]} : vector<10x32xf32> to vector<10x8xf32>
    %cst_161 = arith.constant dense<0.000000e+00> : vector<8x8xf32>
    %401 = tpu.matmul %399, %400, %cst_161 {dimension_numbers = #tpu.dot_dimension_numbers<[1], [0], [0], [1], [0, 0, 1, 1], [], []>} : vector<8x10xf32>, vector<10x8xf32>, vector<8x8xf32> -> vector<8x8xf32>
    %402 = vector.extract_strided_slice %352 {offsets = [0, 24], sizes = [8, 8], strides = [1, 1]} : vector<8x32xf32> to vector<8x8xf32>
    %403 = vector.extract_strided_slice %358 {offsets = [0, 24], sizes = [10, 8], strides = [1, 1]} : vector<10x32xf32> to vector<10x8xf32>
    %cst_162 = arith.constant dense<0.000000e+00> : vector<8x10xf32>
    %404 = tpu.matmul %402, %403, %cst_162 {dimension_numbers = #tpu.dot_dimension_numbers<[1], [1], [0], [0], [0, 0, 1, 0], [], []>} : vector<8x8xf32>, vector<10x8xf32>, vector<8x10xf32> -> vector<8x10xf32>
    %cst_163 = arith.constant dense<0xFF800000> : vector<8xf32>
    %405 = vector.multi_reduction <maximumf>, %404, %cst_163 [1] : vector<8x10xf32> to vector<8xf32>
    %406 = vector.shape_cast %405 : vector<8xf32> to vector<8x1xf32>
    %407 = vector.broadcast %406 : vector<8x1xf32> to vector<8x10xf32>
    %408 = arith.subf %404, %407 : vector<8x10xf32>
    %409 = math.exp %408 : vector<8x10xf32>
    %cst_164 = arith.constant dense<0.000000e+00> : vector<8xf32>
    %410 = vector.multi_reduction <add>, %409, %cst_164 [1] : vector<8x10xf32> to vector<8xf32>
    %411 = vector.shape_cast %410 : vector<8xf32> to vector<8x1xf32>
    %412 = vector.broadcast %411 : vector<8x1xf32> to vector<8x10xf32>
    %413 = arith.divf %409, %412 : vector<8x10xf32>
    %414 = vector.extract_strided_slice %359 {offsets = [0, 24], sizes = [10, 8], strides = [1, 1]} : vector<10x32xf32> to vector<10x8xf32>
    %cst_165 = arith.constant dense<0.000000e+00> : vector<8x8xf32>
    %415 = tpu.matmul %413, %414, %cst_165 {dimension_numbers = #tpu.dot_dimension_numbers<[1], [0], [0], [1], [0, 0, 1, 1], [], []>} : vector<8x10xf32>, vector<10x8xf32>, vector<8x8xf32> -> vector<8x8xf32>
    %416 = tpu.concatenate %373, %387, %401, %415 in 1 : vector<8x8xf32>, vector<8x8xf32>, vector<8x8xf32>, vector<8x8xf32> -> vector<8x32xf32>
    %c0_166 = arith.constant 0 : index
    %c0_167 = arith.constant 0 : index
    %c0_168 = arith.constant 0 : index
    %c0_169 = arith.constant 0 : index
    %417 = vector.load %arg48[%c0_166, %c0_167, %c0_168, %c0_169] : memref<1x4x8x10xf32, #tpu.memory_space<vmem>>, vector<1x1x8x10xf32>
    %418 = vector.shape_cast %417 : vector<1x1x8x10xf32> to vector<8x10xf32>
    %419 = vector.shape_cast %371 : vector<8x10xf32> to vector<1x1x8x10xf32>
    tpu.vector_store %arg48[%c0_166, %c0_167, %c0_168, %c0_169], %419 {strides = array<i32>} : memref<1x4x8x10xf32, #tpu.memory_space<vmem>>, vector<1x1x8x10xf32>,
    %c0_170 = arith.constant 0 : index
    %c1 = arith.constant 1 : index
    %c0_171 = arith.constant 0 : index
    %c0_172 = arith.constant 0 : index
    %420 = vector.load %arg48[%c0_170, %c1, %c0_171, %c0_172] : memref<1x4x8x10xf32, #tpu.memory_space<vmem>>, vector<1x1x8x10xf32>
    %421 = vector.shape_cast %420 : vector<1x1x8x10xf32> to vector<8x10xf32>
    %422 = vector.shape_cast %385 : vector<8x10xf32> to vector<1x1x8x10xf32>
    tpu.vector_store %arg48[%c0_170, %c1, %c0_171, %c0_172], %422 {strides = array<i32>} : memref<1x4x8x10xf32, #tpu.memory_space<vmem>>, vector<1x1x8x10xf32>,
    %c0_173 = arith.constant 0 : index
    %c2 = arith.constant 2 : index
    %c0_174 = arith.constant 0 : index
    %c0_175 = arith.constant 0 : index
    %423 = vector.load %arg48[%c0_173, %c2, %c0_174, %c0_175] : memref<1x4x8x10xf32, #tpu.memory_space<vmem>>, vector<1x1x8x10xf32>
    %424 = vector.shape_cast %423 : vector<1x1x8x10xf32> to vector<8x10xf32>
    %425 = vector.shape_cast %399 : vector<8x10xf32> to vector<1x1x8x10xf32>
    tpu.vector_store %arg48[%c0_173, %c2, %c0_174, %c0_175], %425 {strides = array<i32>} : memref<1x4x8x10xf32, #tpu.memory_space<vmem>>, vector<1x1x8x10xf32>,
    %c0_176 = arith.constant 0 : index
    %c3 = arith.constant 3 : index
    %c0_177 = arith.constant 0 : index
    %c0_178 = arith.constant 0 : index
    %426 = vector.load %arg48[%c0_176, %c3, %c0_177, %c0_178] : memref<1x4x8x10xf32, #tpu.memory_space<vmem>>, vector<1x1x8x10xf32>
    %427 = vector.shape_cast %426 : vector<1x1x8x10xf32> to vector<8x10xf32>
    %428 = vector.shape_cast %413 : vector<8x10xf32> to vector<1x1x8x10xf32>
    tpu.vector_store %arg48[%c0_176, %c3, %c0_177, %c0_178], %428 {strides = array<i32>} : memref<1x4x8x10xf32, #tpu.memory_space<vmem>>, vector<1x1x8x10xf32>,
    %c0_179 = arith.constant 0 : index
    %c0_180 = arith.constant 0 : index
    %429 = vector.load %arg35[%c0_179, %c0_180] : memref<32x32xf32, #tpu.memory_space<vmem>>, vector<32x32xf32>
    %cst_181 = arith.constant dense<0.000000e+00> : vector<8x32xf32>
    %430 = tpu.matmul %416, %429, %cst_181 {dimension_numbers = #tpu.dot_dimension_numbers<[1], [0], [0], [1], [0, 0, 1, 1], [], []>} : vector<8x32xf32>, vector<32x32xf32>, vector<8x32xf32> -> vector<8x32xf32>
    %c0_182 = arith.constant 0 : index
    %c0_183 = arith.constant 0 : index
    %431 = vector.load %arg36[%c0_182, %c0_183] : memref<1x32xf32, #tpu.memory_space<vmem>>, vector<1x32xf32>
    %432 = vector.broadcast %431 : vector<1x32xf32> to vector<8x32xf32>
    %433 = arith.addf %430, %432 : vector<8x32xf32>
    %434 = arith.addf %347, %433 : vector<8x32xf32>
    %c0_184 = arith.constant 0 : index
    %c0_185 = arith.constant 0 : index
    %435 = vector.load %arg37[%c0_184, %c0_185] : memref<1x32xf32, #tpu.memory_space<vmem>>, vector<1x32xf32>
    %c0_186 = arith.constant 0 : index
    %c0_187 = arith.constant 0 : index
    %436 = vector.load %arg38[%c0_186, %c0_187] : memref<1x32xf32, #tpu.memory_space<vmem>>, vector<1x32xf32>
    %cst_188 = arith.constant dense<0.000000e+00> : vector<8xf32>
    %437 = vector.multi_reduction <add>, %434, %cst_188 [1] : vector<8x32xf32> to vector<8xf32>
    %438 = vector.shape_cast %437 : vector<8xf32> to vector<8x1xf32>
    %cst_189 = arith.constant 3.200000e+01 : f32
    %439 = vector.broadcast %cst_189 : f32 to vector<8x1xf32>
    %440 = arith.divf %438, %439 : vector<8x1xf32>
    %441 = vector.broadcast %440 : vector<8x1xf32> to vector<8x32xf32>
    %442 = arith.subf %434, %441 : vector<8x32xf32>
    %443 = arith.mulf %442, %442 : vector<8x32xf32>
    %cst_190 = arith.constant dense<0.000000e+00> : vector<8xf32>
    %444 = vector.multi_reduction <add>, %443, %cst_190 [1] : vector<8x32xf32> to vector<8xf32>
    %445 = vector.shape_cast %444 : vector<8xf32> to vector<8x1xf32>
    %cst_191 = arith.constant 3.200000e+01 : f32
    %446 = vector.broadcast %cst_191 : f32 to vector<8x1xf32>
    %447 = arith.divf %445, %446 : vector<8x1xf32>
    %448 = vector.broadcast %440 : vector<8x1xf32> to vector<8x32xf32>
    %449 = arith.subf %434, %448 : vector<8x32xf32>
    %cst_192 = arith.constant 9.99999974E-6 : f32
    %450 = vector.broadcast %cst_192 : f32 to vector<8x1xf32>
    %451 = arith.addf %447, %450 : vector<8x1xf32>
    %452 = math.rsqrt %451 : vector<8x1xf32>
    %453 = vector.broadcast %452 : vector<8x1xf32> to vector<8x32xf32>
    %454 = arith.mulf %449, %453 : vector<8x32xf32>
    %455 = vector.broadcast %435 : vector<1x32xf32> to vector<8x32xf32>
    %456 = arith.mulf %454, %455 : vector<8x32xf32>
    %457 = vector.broadcast %436 : vector<1x32xf32> to vector<8x32xf32>
    %458 = arith.addf %456, %457 : vector<8x32xf32>
    %c0_193 = arith.constant 0 : index
    %c0_194 = arith.constant 0 : index
    %459 = vector.load %arg39[%c0_193, %c0_194] : memref<32x64xf32, #tpu.memory_space<vmem>>, vector<32x64xf32>
    %cst_195 = arith.constant dense<0.000000e+00> : vector<8x64xf32>
    %460 = tpu.matmul %458, %459, %cst_195 {dimension_numbers = #tpu.dot_dimension_numbers<[1], [0], [0], [1], [0, 0, 1, 1], [], []>} : vector<8x32xf32>, vector<32x64xf32>, vector<8x64xf32> -> vector<8x64xf32>
    %c0_196 = arith.constant 0 : index
    %c0_197 = arith.constant 0 : index
    %461 = vector.load %arg40[%c0_196, %c0_197] : memref<1x64xf32, #tpu.memory_space<vmem>>, vector<1x64xf32>
    %462 = vector.broadcast %461 : vector<1x64xf32> to vector<8x64xf32>
    %463 = arith.addf %460, %462 : vector<8x64xf32>
    %cst_198 = arith.constant 0.000000e+00 : f32
    %464 = vector.broadcast %cst_198 : f32 to vector<8x64xf32>
    %465 = arith.maximumf %463, %464 : vector<8x64xf32>
    %c0_199 = arith.constant 0 : index
    %c0_200 = arith.constant 0 : index
    %466 = vector.load %arg41[%c0_199, %c0_200] : memref<64x32xf32, #tpu.memory_space<vmem>>, vector<64x32xf32>
    %cst_201 = arith.constant dense<0.000000e+00> : vector<8x32xf32>
    %467 = tpu.matmul %465, %466, %cst_201 {dimension_numbers = #tpu.dot_dimension_numbers<[1], [0], [0], [1], [0, 0, 1, 1], [], []>} : vector<8x64xf32>, vector<64x32xf32>, vector<8x32xf32> -> vector<8x32xf32>
    %c0_202 = arith.constant 0 : index
    %c0_203 = arith.constant 0 : index
    %468 = vector.load %arg42[%c0_202, %c0_203] : memref<1x32xf32, #tpu.memory_space<vmem>>, vector<1x32xf32>
    %469 = vector.broadcast %468 : vector<1x32xf32> to vector<8x32xf32>
    %470 = arith.addf %467, %469 : vector<8x32xf32>
    %471 = arith.addf %458, %470 : vector<8x32xf32>
    %c0_204 = arith.constant 0 : index
    %c0_205 = arith.constant 0 : index
    %472 = vector.load %arg43[%c0_204, %c0_205] : memref<1x32xf32, #tpu.memory_space<vmem>>, vector<1x32xf32>
    %c0_206 = arith.constant 0 : index
    %c0_207 = arith.constant 0 : index
    %473 = vector.load %arg44[%c0_206, %c0_207] : memref<1x32xf32, #tpu.memory_space<vmem>>, vector<1x32xf32>
    %cst_208 = arith.constant dense<0.000000e+00> : vector<8xf32>
    %474 = vector.multi_reduction <add>, %471, %cst_208 [1] : vector<8x32xf32> to vector<8xf32>
    %475 = vector.shape_cast %474 : vector<8xf32> to vector<8x1xf32>
    %cst_209 = arith.constant 3.200000e+01 : f32
    %476 = vector.broadcast %cst_209 : f32 to vector<8x1xf32>
    %477 = arith.divf %475, %476 : vector<8x1xf32>
    %478 = vector.broadcast %477 : vector<8x1xf32> to vector<8x32xf32>
    %479 = arith.subf %471, %478 : vector<8x32xf32>
    %480 = arith.mulf %479, %479 : vector<8x32xf32>
    %cst_210 = arith.constant dense<0.000000e+00> : vector<8xf32>
    %481 = vector.multi_reduction <add>, %480, %cst_210 [1] : vector<8x32xf32> to vector<8xf32>
    %482 = vector.shape_cast %481 : vector<8xf32> to vector<8x1xf32>
    %cst_211 = arith.constant 3.200000e+01 : f32
    %483 = vector.broadcast %cst_211 : f32 to vector<8x1xf32>
    %484 = arith.divf %482, %483 : vector<8x1xf32>
    %485 = vector.broadcast %477 : vector<8x1xf32> to vector<8x32xf32>
    %486 = arith.subf %471, %485 : vector<8x32xf32>
    %cst_212 = arith.constant 9.99999974E-6 : f32
    %487 = vector.broadcast %cst_212 : f32 to vector<8x1xf32>
    %488 = arith.addf %484, %487 : vector<8x1xf32>
    %489 = math.rsqrt %488 : vector<8x1xf32>
    %490 = vector.broadcast %489 : vector<8x1xf32> to vector<8x32xf32>
    %491 = arith.mulf %486, %490 : vector<8x32xf32>
    %492 = vector.broadcast %472 : vector<1x32xf32> to vector<8x32xf32>
    %493 = arith.mulf %491, %492 : vector<8x32xf32>
    %494 = vector.broadcast %473 : vector<1x32xf32> to vector<8x32xf32>
    %495 = arith.addf %493, %494 : vector<8x32xf32>
    %c0_213 = arith.constant 0 : index
    %c0_214 = arith.constant 0 : index
    %496 = vector.load %arg45[%c0_213, %c0_214] : memref<32x50xf32, #tpu.memory_space<vmem>>, vector<32x50xf32>
    %cst_215 = arith.constant dense<0.000000e+00> : vector<8x50xf32>
    %497 = tpu.matmul %495, %496, %cst_215 {dimension_numbers = #tpu.dot_dimension_numbers<[1], [0], [0], [1], [0, 0, 1, 1], [], []>} : vector<8x32xf32>, vector<32x50xf32>, vector<8x50xf32> -> vector<8x50xf32>
    %c0_216 = arith.constant 0 : index
    %c0_217 = arith.constant 0 : index
    %498 = vector.load %arg46[%c0_216, %c0_217] : memref<1x50xf32, #tpu.memory_space<vmem>>, vector<1x50xf32>
    %499 = vector.broadcast %498 : vector<1x50xf32> to vector<8x50xf32>
    %500 = arith.addf %497, %499 : vector<8x50xf32>
    %c0_218 = arith.constant 0 : index
    %c0_219 = arith.constant 0 : index
    %c0_220 = arith.constant 0 : index
    %501 = vector.load %arg47[%c0_218, %c0_219, %c0_220] : memref<1x8x50xf32, #tpu.memory_space<vmem>>, vector<1x8x50xf32>
    %502 = vector.shape_cast %501 : vector<1x8x50xf32> to vector<8x50xf32>
    %503 = vector.shape_cast %500 : vector<8x50xf32> to vector<1x8x50xf32>
    tpu.vector_store %arg47[%c0_218, %c0_219, %c0_220], %503 {strides = array<i32>} : memref<1x8x50xf32, #tpu.memory_space<vmem>>, vector<1x8x50xf32>,
    return
  }
  func.func @transform_0(%arg0: i32) -> (i32, i32, i32) {
    %c0_i32 = arith.constant 0 : i32
    %c0_i32_0 = arith.constant 0 : i32
    %c0_i32_1 = arith.constant 0 : i32
    return %arg0, %c0_i32, %c0_i32_0 : i32, i32, i32
  }
  func.func @transform_1(%arg0: i32) -> (i32, i32) {
    %c0_i32 = arith.constant 0 : i32
    %c0_i32_0 = arith.constant 0 : i32
    %c0_i32_1 = arith.constant 0 : i32
    return %c0_i32, %c0_i32_0 : i32, i32
  }
  func.func @transform_2(%arg0: i32) -> (i32, i32, i32) {
    %c0_i32 = arith.constant 0 : i32
    %c0_i32_0 = arith.constant 0 : i32
    %c0_i32_1 = arith.constant 0 : i32
    return %arg0, %c0_i32, %c0_i32_0 : i32, i32, i32
  }
  func.func @transform_3(%arg0: i32) -> (i32, i32) {
    %c0_i32 = arith.constant 0 : i32
    %c0_i32_0 = arith.constant 0 : i32
    %c0_i32_1 = arith.constant 0 : i32
    return %c0_i32, %c0_i32_0 : i32, i32
  }
  func.func @transform_4(%arg0: i32) -> (i32, i32) {
    %c0_i32 = arith.constant 0 : i32
    %c0_i32_0 = arith.constant 0 : i32
    %c0_i32_1 = arith.constant 0 : i32
    return %c0_i32, %c0_i32_0 : i32, i32
  }
  func.func @transform_5(%arg0: i32) -> (i32, i32) {
    %c0_i32 = arith.constant 0 : i32
    %c0_i32_0 = arith.constant 0 : i32
    %c0_i32_1 = arith.constant 0 : i32
    return %c0_i32, %c0_i32_0 : i32, i32
  }
  func.func @transform_6(%arg0: i32) -> (i32, i32) {
    %c0_i32 = arith.constant 0 : i32
    %c0_i32_0 = arith.constant 0 : i32
    %c0_i32_1 = arith.constant 0 : i32
    return %c0_i32, %c0_i32_0 : i32, i32
  }
  func.func @transform_7(%arg0: i32) -> (i32, i32) {
    %c0_i32 = arith.constant 0 : i32
    %c0_i32_0 = arith.constant 0 : i32
    %c0_i32_1 = arith.constant 0 : i32
    return %c0_i32, %c0_i32_0 : i32, i32
  }
  func.func @transform_8(%arg0: i32) -> (i32, i32) {
    %c0_i32 = arith.constant 0 : i32
    %c0_i32_0 = arith.constant 0 : i32
    %c0_i32_1 = arith.constant 0 : i32
    return %c0_i32, %c0_i32_0 : i32, i32
  }
  func.func @transform_9(%arg0: i32) -> (i32, i32) {
    %c0_i32 = arith.constant 0 : i32
    %c0_i32_0 = arith.constant 0 : i32
    %c0_i32_1 = arith.constant 0 : i32
    return %c0_i32, %c0_i32_0 : i32, i32
  }
  func.func @transform_10(%arg0: i32) -> (i32, i32) {
    %c0_i32 = arith.constant 0 : i32
    %c0_i32_0 = arith.constant 0 : i32
    %c0_i32_1 = arith.constant 0 : i32
    return %c0_i32, %c0_i32_0 : i32, i32
  }
  func.func @transform_11(%arg0: i32) -> (i32, i32) {
    %c0_i32 = arith.constant 0 : i32
    %c0_i32_0 = arith.constant 0 : i32
    %c0_i32_1 = arith.constant 0 : i32
    return %c0_i32, %c0_i32_0 : i32, i32
  }
  func.func @transform_12(%arg0: i32) -> (i32, i32) {
    %c0_i32 = arith.constant 0 : i32
    %c0_i32_0 = arith.constant 0 : i32
    %c0_i32_1 = arith.constant 0 : i32
    return %c0_i32, %c0_i32_0 : i32, i32
  }
  func.func @transform_13(%arg0: i32) -> (i32, i32) {
    %c0_i32 = arith.constant 0 : i32
    %c0_i32_0 = arith.constant 0 : i32
    %c0_i32_1 = arith.constant 0 : i32
    return %c0_i32, %c0_i32_0 : i32, i32
  }
  func.func @transform_14(%arg0: i32) -> (i32, i32) {
    %c0_i32 = arith.constant 0 : i32
    %c0_i32_0 = arith.constant 0 : i32
    %c0_i32_1 = arith.constant 0 : i32
    return %c0_i32, %c0_i32_0 : i32, i32
  }
  func.func @transform_15(%arg0: i32) -> (i32, i32) {
    %c0_i32 = arith.constant 0 : i32
    %c0_i32_0 = arith.constant 0 : i32
    %c0_i32_1 = arith.constant 0 : i32
    return %c0_i32, %c0_i32_0 : i32, i32
  }
  func.func @transform_16(%arg0: i32) -> (i32, i32) {
    %c0_i32 = arith.constant 0 : i32
    %c0_i32_0 = arith.constant 0 : i32
    %c0_i32_1 = arith.constant 0 : i32
    return %c0_i32, %c0_i32_0 : i32, i32
  }
  func.func @transform_17(%arg0: i32) -> (i32, i32) {
    %c0_i32 = arith.constant 0 : i32
    %c0_i32_0 = arith.constant 0 : i32
    %c0_i32_1 = arith.constant 0 : i32
    return %c0_i32, %c0_i32_0 : i32, i32
  }
  func.func @transform_18(%arg0: i32) -> (i32, i32) {
    %c0_i32 = arith.constant 0 : i32
    %c0_i32_0 = arith.constant 0 : i32
    %c0_i32_1 = arith.constant 0 : i32
    return %c0_i32, %c0_i32_0 : i32, i32
  }
  func.func @transform_19(%arg0: i32) -> (i32, i32) {
    %c0_i32 = arith.constant 0 : i32
    %c0_i32_0 = arith.constant 0 : i32
    %c0_i32_1 = arith.constant 0 : i32
    return %c0_i32, %c0_i32_0 : i32, i32
  }
  func.func @transform_20(%arg0: i32) -> (i32, i32) {
    %c0_i32 = arith.constant 0 : i32
    %c0_i32_0 = arith.constant 0 : i32
    %c0_i32_1 = arith.constant 0 : i32
    return %c0_i32, %c0_i32_0 : i32, i32
  }
  func.func @transform_21(%arg0: i32) -> (i32, i32) {
    %c0_i32 = arith.constant 0 : i32
    %c0_i32_0 = arith.constant 0 : i32
    %c0_i32_1 = arith.constant 0 : i32
    return %c0_i32, %c0_i32_0 : i32, i32
  }
  func.func @transform_22(%arg0: i32) -> (i32, i32) {
    %c0_i32 = arith.constant 0 : i32
    %c0_i32_0 = arith.constant 0 : i32
    %c0_i32_1 = arith.constant 0 : i32
    return %c0_i32, %c0_i32_0 : i32, i32
  }
  func.func @transform_23(%arg0: i32) -> (i32, i32) {
    %c0_i32 = arith.constant 0 : i32
    %c0_i32_0 = arith.constant 0 : i32
    %c0_i32_1 = arith.constant 0 : i32
    return %c0_i32, %c0_i32_0 : i32, i32
  }
  func.func @transform_24(%arg0: i32) -> (i32, i32) {
    %c0_i32 = arith.constant 0 : i32
    %c0_i32_0 = arith.constant 0 : i32
    %c0_i32_1 = arith.constant 0 : i32
    return %c0_i32, %c0_i32_0 : i32, i32
  }
  func.func @transform_25(%arg0: i32) -> (i32, i32) {
    %c0_i32 = arith.constant 0 : i32
    %c0_i32_0 = arith.constant 0 : i32
    %c0_i32_1 = arith.constant 0 : i32
    return %c0_i32, %c0_i32_0 : i32, i32
  }
  func.func @transform_26(%arg0: i32) -> (i32, i32) {
    %c0_i32 = arith.constant 0 : i32
    %c0_i32_0 = arith.constant 0 : i32
    %c0_i32_1 = arith.constant 0 : i32
    return %c0_i32, %c0_i32_0 : i32, i32
  }
  func.func @transform_27(%arg0: i32) -> (i32, i32) {
    %c0_i32 = arith.constant 0 : i32
    %c0_i32_0 = arith.constant 0 : i32
    %c0_i32_1 = arith.constant 0 : i32
    return %c0_i32, %c0_i32_0 : i32, i32
  }
  func.func @transform_28(%arg0: i32) -> (i32, i32) {
    %c0_i32 = arith.constant 0 : i32
    %c0_i32_0 = arith.constant 0 : i32
    %c0_i32_1 = arith.constant 0 : i32
    return %c0_i32, %c0_i32_0 : i32, i32
  }
  func.func @transform_29(%arg0: i32) -> (i32, i32) {
    %c0_i32 = arith.constant 0 : i32
    %c0_i32_0 = arith.constant 0 : i32
    %c0_i32_1 = arith.constant 0 : i32
    return %c0_i32, %c0_i32_0 : i32, i32
  }
  func.func @transform_30(%arg0: i32) -> (i32, i32) {
    %c0_i32 = arith.constant 0 : i32
    %c0_i32_0 = arith.constant 0 : i32
    %c0_i32_1 = arith.constant 0 : i32
    return %c0_i32, %c0_i32_0 : i32, i32
  }
  func.func @transform_31(%arg0: i32) -> (i32, i32) {
    %c0_i32 = arith.constant 0 : i32
    %c0_i32_0 = arith.constant 0 : i32
    %c0_i32_1 = arith.constant 0 : i32
    return %c0_i32, %c0_i32_0 : i32, i32
  }
  func.func @transform_32(%arg0: i32) -> (i32, i32) {
    %c0_i32 = arith.constant 0 : i32
    %c0_i32_0 = arith.constant 0 : i32
    %c0_i32_1 = arith.constant 0 : i32
    return %c0_i32, %c0_i32_0 : i32, i32
  }
  func.func @transform_33(%arg0: i32) -> (i32, i32) {
    %c0_i32 = arith.constant 0 : i32
    %c0_i32_0 = arith.constant 0 : i32
    %c0_i32_1 = arith.constant 0 : i32
    return %c0_i32, %c0_i32_0 : i32, i32
  }
  func.func @transform_34(%arg0: i32) -> (i32, i32) {
    %c0_i32 = arith.constant 0 : i32
    %c0_i32_0 = arith.constant 0 : i32
    %c0_i32_1 = arith.constant 0 : i32
    return %c0_i32, %c0_i32_0 : i32, i32
  }
  func.func @transform_35(%arg0: i32) -> (i32, i32) {
    %c0_i32 = arith.constant 0 : i32
    %c0_i32_0 = arith.constant 0 : i32
    %c0_i32_1 = arith.constant 0 : i32
    return %c0_i32, %c0_i32_0 : i32, i32
  }
  func.func @transform_36(%arg0: i32) -> (i32, i32) {
    %c0_i32 = arith.constant 0 : i32
    %c0_i32_0 = arith.constant 0 : i32
    %c0_i32_1 = arith.constant 0 : i32
    return %c0_i32, %c0_i32_0 : i32, i32
  }
  func.func @transform_37(%arg0: i32) -> (i32, i32) {
    %c0_i32 = arith.constant 0 : i32
    %c0_i32_0 = arith.constant 0 : i32
    %c0_i32_1 = arith.constant 0 : i32
    return %c0_i32, %c0_i32_0 : i32, i32
  }
  func.func @transform_38(%arg0: i32) -> (i32, i32) {
    %c0_i32 = arith.constant 0 : i32
    %c0_i32_0 = arith.constant 0 : i32
    %c0_i32_1 = arith.constant 0 : i32
    return %c0_i32, %c0_i32_0 : i32, i32
  }
  func.func @transform_39(%arg0: i32) -> (i32, i32) {
    %c0_i32 = arith.constant 0 : i32
    %c0_i32_0 = arith.constant 0 : i32
    %c0_i32_1 = arith.constant 0 : i32
    return %c0_i32, %c0_i32_0 : i32, i32
  }
  func.func @transform_40(%arg0: i32) -> (i32, i32) {
    %c0_i32 = arith.constant 0 : i32
    %c0_i32_0 = arith.constant 0 : i32
    %c0_i32_1 = arith.constant 0 : i32
    return %c0_i32, %c0_i32_0 : i32, i32
  }
  func.func @transform_41(%arg0: i32) -> (i32, i32) {
    %c0_i32 = arith.constant 0 : i32
    %c0_i32_0 = arith.constant 0 : i32
    %c0_i32_1 = arith.constant 0 : i32
    return %c0_i32, %c0_i32_0 : i32, i32
  }
  func.func @transform_42(%arg0: i32) -> (i32, i32) {
    %c0_i32 = arith.constant 0 : i32
    %c0_i32_0 = arith.constant 0 : i32
    %c0_i32_1 = arith.constant 0 : i32
    return %c0_i32, %c0_i32_0 : i32, i32
  }
  func.func @transform_43(%arg0: i32) -> (i32, i32) {
    %c0_i32 = arith.constant 0 : i32
    %c0_i32_0 = arith.constant 0 : i32
    %c0_i32_1 = arith.constant 0 : i32
    return %c0_i32, %c0_i32_0 : i32, i32
  }
  func.func @transform_44(%arg0: i32) -> (i32, i32) {
    %c0_i32 = arith.constant 0 : i32
    %c0_i32_0 = arith.constant 0 : i32
    %c0_i32_1 = arith.constant 0 : i32
    return %c0_i32, %c0_i32_0 : i32, i32
  }
  func.func @transform_45(%arg0: i32) -> (i32, i32) {
    %c0_i32 = arith.constant 0 : i32
    %c0_i32_0 = arith.constant 0 : i32
    %c0_i32_1 = arith.constant 0 : i32
    return %c0_i32, %c0_i32_0 : i32, i32
  }
  func.func @transform_46(%arg0: i32) -> (i32, i32, i32) {
    %c0_i32 = arith.constant 0 : i32
    %c0_i32_0 = arith.constant 0 : i32
    %c0_i32_1 = arith.constant 0 : i32
    return %arg0, %c0_i32, %c0_i32_0 : i32, i32, i32
  }
  func.func @transform_47(%arg0: i32) -> (i32, i32, i32, i32) {
    %c0_i32 = arith.constant 0 : i32
    %c0_i32_0 = arith.constant 0 : i32
    %c0_i32_1 = arith.constant 0 : i32
    %c0_i32_2 = arith.constant 0 : i32
    return %arg0, %c0_i32, %c0_i32_0, %c0_i32_1 : i32, i32, i32, i32
  }
}

</mosaic_0001>

<bundles_post_ra>
// kernel: decoder_forward.1
= control target key start
LH: loop header
LB: loop body
LE: loop exit
PB: predicated region body
PF: predicated region fallthrough
CT: control target
= control target key end

     0   :  { %s7326_s6 = smov 1   ;;  %s7327_s10 = smov 2   ;;  %s8465_s0 = inlined_call_operand.smem [shape: u32[48], index: -1, kind: input, shape index: {}] }
   0x1   :  { %s7407_s5 = sld [smem:[%s8465_s0]]   ;;  %s7328_s14 = smov 3  }
   0x2   :  { %s7412_s9 = sld [smem:[%s8465_s0 + %s7326_s6]]   ;;  %s7329_s18 = smov 4  }
   0x3   :  { %s7417_s13 = sld [smem:[%s8465_s0 + %s7327_s10]]   ;;  %s7330_s22 = smov 5  }
   0x4   :  { %s7422_s17 = sld [smem:[%s8465_s0 + %s7328_s14]]   ;;  %s7331_s26 = smov 6  }
   0x5   :  { %s7427_s21 = sld [smem:[%s8465_s0 + %s7329_s18]]   ;;  %s7332_s30 = smov 7  }
   0x6   :  { %s7432_s25 = sld [smem:[%s8465_s0 + %s7330_s22]]   ;;  %s7333_s4 = smov 8  }
   0x7   :  { %8518 = sst [smem:[#allocation23_spill]] %s7407_s5  ;;  %s7334_s10 = smov 9  }
   0x8   :  { %8519 = sst [smem:[#allocation24_spill]] %s7412_s9  ;;  %s7335_s15 = smov 10  }
   0x9   :  { %8520 = sst [smem:[#allocation25_spill]] %s7417_s13  ;;  %s7336_s20 = smov 11  }
   0xa   :  { %s7437_s29 = sld [smem:[%s8465_s0 + %s7331_s26]]   ;;  %s7337_s26 = smov 12  }
   0xb   :  { %s7442_s3 = sld [smem:[%s8465_s0 + %s7332_s30]]   ;;  %s7338_s1 = smov 13  }
   0xc   :  { %s7447_s8 = sld [smem:[%s8465_s0 + %s7333_s4]]   ;;  %s7339_s7 = smov 14  }
   0xd   :  { %s7452_s14 = sld [smem:[%s8465_s0 + %s7334_s10]]   ;;  %s7341_s22 = smov 16  }
   0xe   :  { %s7457_s19 = sld [smem:[%s8465_s0 + %s7335_s15]]   ;;  %s7340_s15 = smov 15  }
   0xf   :  { %s7462_s24 = sld [smem:[%s8465_s0 + %s7336_s20]]   ;;  %s7342_s28 = smov 17  }
  0x10   :  { %s7467_s30 = sld [smem:[%s8465_s0 + %s7337_s26]]  }
  0x11   :  { %8521 = sst [smem:[#allocation26_spill]] %s7442_s3 }
  0x12   :  { %8522 = sst [smem:[#allocation27_spill]] %s7447_s8 }
  0x13   :  { %8523 = sst [smem:[#allocation28_spill]] %s7452_s14 }
  0x14   :  { %8524 = sst [smem:[#allocation29_spill]] %s7457_s19 }
  0x15   :  { %8525 = sst [smem:[#allocation30_spill]] %s7462_s24 }
  0x16   :  { %s7472_s6 = sld [smem:[%s8465_s0 + %s7338_s1]]  }
  0x17   :  { %s7477_s12 = sld [smem:[%s8465_s0 + %s7339_s7]]   ;;  %s7343_s7 = smov 18  }
  0x18   :  { %s7482_s20 = sld [smem:[%s8465_s0 + %s7340_s15]]   ;;  %s7344_s15 = smov 19  }
  0x19   :  { %s7487_s27 = sld [smem:[%s8465_s0 + %s7341_s22]]   ;;  %s7345_s22 = smov 20  }
  0x1a   :  { %s7492_s4 = sld [smem:[%s8465_s0 + %s7342_s28]]   ;;  %s7346_s28 = smov 21  }
  0x1c   :  { %8526 = sst [smem:[#allocation31_spill]] %s7472_s6 }
  0x1d   :  { %8527 = sst [smem:[#allocation32_spill]] %s7477_s12 }
  0x1e   :  { %8528 = sst [smem:[#allocation33_spill]] %s7482_s20 }
  0x1f   :  { %8529 = sst [smem:[#allocation34_spill]] %s7487_s27 }
  0x20   :  { %8530 = sst [smem:[#allocation35_spill]] %s7492_s4 }
  0x21   :  { %s7497_s12 = sld [smem:[%s8465_s0 + %s7343_s7]]   ;;  %s7347_s7 = smov 22  }
  0x22   :  { %s7502_s20 = sld [smem:[%s8465_s0 + %s7344_s15]]   ;;  %s7348_s15 = smov 23  }
  0x23   :  { %s7507_s27 = sld [smem:[%s8465_s0 + %s7345_s22]]   ;;  %s7349_s22 = smov 24  }
  0x24   :  { %s7512_s4 = sld [smem:[%s8465_s0 + %s7346_s28]]   ;;  %s7350_s28 = smov 25  }
  0x27   :  { %8531 = sst [smem:[#allocation36_spill]] %s7497_s12 }
  0x28   :  { %8532 = sst [smem:[#allocation37_spill]] %s7502_s20 }
  0x29   :  { %8533 = sst [smem:[#allocation38_spill]] %s7507_s27 }
  0x2a   :  { %8534 = sst [smem:[#allocation39_spill]] %s7512_s4 }
  0x2b   :  { %s7517_s12 = sld [smem:[%s8465_s0 + %s7347_s7]]   ;;  %s7351_s7 = smov 26  }
  0x2c   :  { %s7522_s20 = sld [smem:[%s8465_s0 + %s7348_s15]]   ;;  %s7352_s15 = smov 27  }
  0x2d   :  { %s7527_s27 = sld [smem:[%s8465_s0 + %s7349_s22]]   ;;  %s7353_s22 = smov 28  }
  0x2e   :  { %s7532_s4 = sld [smem:[%s8465_s0 + %s7350_s28]]   ;;  %s7354_s28 = smov 29  }
  0x31   :  { %8535 = sst [smem:[#allocation40_spill]] %s7517_s12 }
  0x32   :  { %8536 = sst [smem:[#allocation41_spill]] %s7522_s20 }
  0x33   :  { %8537 = sst [smem:[#allocation42_spill]] %s7527_s27 }
  0x34   :  { %8538 = sst [smem:[#allocation43_spill]] %s7532_s4 }
  0x35   :  { %s7537_s12 = sld [smem:[%s8465_s0 + %s7351_s7]]   ;;  %s7355_s7 = smov 30  }
  0x36   :  { %s7542_s20 = sld [smem:[%s8465_s0 + %s7352_s15]]   ;;  %s7356_s15 = smov 31  }
  0x37   :  { %s7547_s27 = sld [smem:[%s8465_s0 + %s7353_s22]]   ;;  %s7357_s22 = smov 32  }
  0x38   :  { %s7552_s4 = sld [smem:[%s8465_s0 + %s7354_s28]]   ;;  %s7358_s28 = smov 33  }
  0x3b   :  { %8539 = sst [smem:[#allocation44_spill]] %s7537_s12 }
  0x3c   :  { %8540 = sst [smem:[#allocation45_spill]] %s7542_s20 }
  0x3d   :  { %8541 = sst [smem:[#allocation46_spill]] %s7547_s27 }
  0x3e   :  { %8542 = sst [smem:[#allocation47_spill]] %s7552_s4 }
  0x3f   :  { %s7557_s12 = sld [smem:[%s8465_s0 + %s7355_s7]]   ;;  %s7359_s7 = smov 34  }
  0x40   :  { %s7562_s20 = sld [smem:[%s8465_s0 + %s7356_s15]]   ;;  %s7360_s15 = smov 35  }
  0x41   :  { %s7567_s27 = sld [smem:[%s8465_s0 + %s7357_s22]]   ;;  %s7361_s22 = smov 36  }
  0x42   :  { %s7572_s4 = sld [smem:[%s8465_s0 + %s7358_s28]]   ;;  %s7362_s28 = smov 37  }
  0x45   :  { %8543 = sst [smem:[#allocation48_spill]] %s7557_s12 }
  0x46   :  { %8544 = sst [smem:[#allocation49_spill]] %s7562_s20 }
  0x47   :  { %8545 = sst [smem:[#allocation50_spill]] %s7567_s27 }
  0x48   :  { %8546 = sst [smem:[#allocation51_spill]] %s7572_s4 }
  0x49   :  { %s7577_s12 = sld [smem:[%s8465_s0 + %s7359_s7]]   ;;  %s7363_s7 = smov 38  }
  0x4a   :  { %s7582_s20 = sld [smem:[%s8465_s0 + %s7360_s15]]   ;;  %s7364_s15 = smov 39  }
  0x4b   :  { %s7587_s27 = sld [smem:[%s8465_s0 + %s7361_s22]]   ;;  %s7365_s22 = smov 40  }
  0x4c   :  { %s7592_s4 = sld [smem:[%s8465_s0 + %s7362_s28]]   ;;  %s7366_s28 = smov 41  }
  0x4d   :  { %s7607_s24 = sld [smem:[%s8465_s0 + %s7365_s22]]   ;;  %s7369_s22 = smov 44  }
  0x4e   :  { %s7612_s6 = sld [smem:[%s8465_s0 + %s7366_s28]]   ;;  %s7370_s28 = smov 45  }
  0x4f   :  { %8547 = sst [smem:[#allocation52_spill]] %s7577_s12 }
  0x50   :  { %8548 = sst [smem:[#allocation53_spill]] %s7582_s20 }
  0x51   :  { %s7597_s12 = sld [smem:[%s8465_s0 + %s7363_s7]]   ;;  %s7367_s7 = smov 42  }
  0x52   :  { %8549 = sst [smem:[#allocation54_spill]] %s7592_s4 }
  0x53   :  { %s7602_s20 = sld [smem:[%s8465_s0 + %s7364_s15]]   ;;  %s7368_s15 = smov 43  }
  0x54   :  { %8551 = sst [smem:[#allocation56_spill]] %s7607_s24 }
  0x55   :  { %8552 = sst [smem:[#allocation57_spill]] %s7612_s6 }
  0x56   :  { %s7622_s14 = sld [smem:[%s8465_s0 + %s7368_s15]]   ;;  %s7372_s15 = smov 47  }
  0x57   :  { %8550 = sst [smem:[#allocation55_spill]] %s7597_s12 }
  0x58   :  { %s7617_s12 = sld [smem:[%s8465_s0 + %s7367_s7]]   ;;  %s7371_s7 = smov 46  }
  0x59   :  { %s7627_s24 = sld [smem:[%s8465_s0 + %s7369_s22]]  }
  0x5a   :  { %s7632_s8 = sld [smem:[%s8465_s0 + %s7370_s28]]  }
  0x5b   :  { %s7637_s19 = sld [smem:[%s8465_s0 + %s7371_s7]]  }
  0x5c   :  { %s7642_s13 = sld [smem:[%s8465_s0 + %s7372_s15]]  }
  0x60   :  { %8553 = sst [smem:[#allocation58_spill]] %s7632_s8 }
  0x61   :  { %101 = vsyncpa [#allocation3], 0 }
  0x62   :  { %102 = vsyncpa [#allocation6], 0 }
  0x63   :  { %103 = vsyncpa [#allocation9], 0 }
  0x64   :  { %104 = vsyncpa [#allocation12], 0 }
  0x65   :  { %105 = vsyncpa [#allocation4], 0 }
  0x66   :  { %107 = vsyncpa [#allocation4 + $0x1], 0 }
  0x67   :  { %108 = vsyncpa [#allocation16], 0 }
  0x68   :  { %110 = vsyncpa [#allocation16 + $0x1], 0  ;;  %s7644_s22 = smov 0   ;;  %s7646_s23 = smov 0  }
  0x69   :  { %s7648_s26 = smov 0   ;;  %s7650_s28 = smov 0  }
  0x6a LB: > { %8554 = sst [smem:[#allocation59_spill]] %s7312_s22  ;;  %s7665_s0 = sadd.s32 4294967295, %s7324_s28   ;;  %s7324_s28 = sphi %s7650_s28, %s8631_s28   ;;  %s7320_s26 = sphi %s7648_s26, %s8633_s26   ;;  %s7316_s23 = sphi %s7646_s23, %s8635_s23   ;;  %s7312_s22 = sphi %s7644_s22, %s8634_s22  }
  0x6b   : > { %8555 = sst [smem:[#allocation60_spill]] %s7320_s26  ;;  %s6089_s1 = sadd.s32 4294967294, %s7324_s28  }
  0x6c   : > { %8556 = sst [smem:[#allocation61_spill]] %s7324_s28  ;;  %s7669_s2 = sadd.s32 1, %s7324_s28  }
  0x6d   : > { %8557 = sst [smem:[#allocation62_spill]] %s7669_s2  ;;  %s1099_s7 = sadd.s32 1, %s7320_s26 }
  0x6e   : > { %s1096_s10 = ssub.s32 %s7324_s28, %s7669_s2  ;;  %p1109_p0 = scmp.ne.s32.totalorder %s7320_s26, %s7316_s23 }
  0x6f   : > { %p1097_p1 = scmp.eq.s32.totalorder %s1096_s10, 0  ;;  %p1110_p2 = scmp.eq.s32.totalorder %s7665_s0, 1 }
  0x70   : > { %p1115_p3 = scmp.ne.s32.totalorder %s7316_s23, %s7312_s22  ;;  %p1116_p4 = scmp.eq.s32.totalorder %s6089_s1, 1 }
  0x71   : > { %s7680_s11 = scalar_select %p1097_p1, %s7320_s26, %s1099_s7  }
  0x72   : > { %p7682_p5 = por %p1110_p2, %p1109_p0  ;;  %p7686_p6 = por %p1116_p4, %p1115_p3 }
  0x73   : > { %8558 = sst [smem:[#allocation63_spill]] %s7680_s11  ;;  %p6090_p7 = scmp.ge.s32.totalorder %s7324_s28, 1 }
  0x74   : > { %s8559_s15 = scalar_select %p7682_p5, 1, 0 }
  0x75   : > { %s8560_s16 = scalar_select %p7686_p6, 1, 0 }
  0x76   : > { %p1149_p8 = scmp.lt.s32.totalorder %s7324_s28, 3  ;;  %p8482_p9 = scmp.eq.s32.totalorder %s7665_s0, 0 }
  0x77   : > { %8561 = sst [smem:[#allocation64_spill]] %s8560_s16  ;;  %s7373_s10 = smov [#allocation5]  }
  0x78   : > { %p7693_p10 = pnand %p6090_p7, %p1149_p8  ;;  %s1275_s1 = sshll.u32 %s7373_s10, 4  ;;  %s1276_s1 = int_to_ptr.vmem [resolvable:$true] %s1275_s1 }
  0x79   : > { %s7374_s7 = smov [#allocation8]   ;;  %s7375_s2 = smov [#allocation11]  }
  0x7a   : > { %s8562_s18 = scalar_select %p7693_p10, 1, 0 }
  0x7b   : > { %p6813_p11 = pneg %p7693_p10  ;;  %s1303_s11 = sshll.u32 %s7374_s7, 4  ;;  %s1304_s11 = int_to_ptr.vmem [resolvable:$true] %s1303_s11 }
  0x7c   : > { %s1325_s16 = sshll.u32 %s7375_s2, 4  ;;  %s7047_s10 = scalar_lea.vmem %s1276_s1, 16  ;;  %s7705_s16 = int_to_ptr.vmem [resolvable:$true] %s1325_s16 }
  0x7d   : > { %p7701_p12 = pnand %p8482_p9, %p6813_p11  ;;  %p7048_p0 = scmp.ne.s32.totalorder %s1276_s1, %s7047_s10 }
  0x7e   : > { %s7054_s7 = scalar_lea.vmem %s1276_s1, 32  ;;  %p7055_p3 = scmp.lt.s32.totalorder %s1276_s1, %s1276_s1 }
  0x7f   : > { %p7709_p13 = pneg %p7701_p12  ;;  %p7056_p4 = scmp.lt.s32.totalorder %s7054_s7, %s7047_s10 }
  0x81   : > { %p7050_p1 = pnand %p7048_p0, %p7709_p13  ;;  %p7057_p7 = por %p7056_p4, %p7055_p3 }
  0x83   : > { %p7051_p2 = pneg %p7050_p1 }
  0x85   : > { %p7058_p8 = pnand %p7057_p7, %p7051_p2 }
  0x87   : > { %7061 = shalt.err (!%p7058_p8)
}
  0x88   : > { %s8565_s4 = sld [smem:[#allocation54_spill]]  ;;  %s7073_s2 = scalar_lea.vmem %s1304_s11, 16 }
  0x89   : > { %p7074_p11 = scmp.ne.s32.totalorder %s1304_s11, %s7073_s2  ;;  %s7080_s28 = scalar_lea.vmem %s1304_s11, 32 }
  0x8a   : > { %p7081_p5 = scmp.lt.s32.totalorder %s1304_s11, %s1304_s11  ;;  %p7082_p0 = scmp.lt.s32.totalorder %s7080_s28, %s7073_s2 }
  0x8b   : > { %p7076_p9 = pnand %p7074_p11, %p7709_p13 }
  0x8c   : > { %p7083_p1 = por %p7082_p0, %p7081_p5 }
  0x8d   : > { %p7077_p6 = pneg %p7076_p9 }
  0x8e   : > { %6819 = dma.hbm_to_vmem [thread:$0]  (!%p7701_p12), %s8565_s4, 16, %s1276_s1, [#allocation6]  }
  0x8f   : > { %p7084_p10 = pnand %p7083_p1, %p7077_p6 }
  0x91   : > { %7087 = shalt.err (!%p7084_p10)
}
  0x92   : > { %s8566_s6 = sld [smem:[#allocation57_spill]]  ;;  %s7099_s1 = scalar_lea.vmem %s7705_s16, 16 }
  0x93   : > { %p7100_p2 = scmp.ne.s32.totalorder %s7705_s16, %s7099_s1  ;;  %s7106_s10 = scalar_lea.vmem %s7705_s16, 32 }
  0x94   : > { %p7107_p4 = scmp.lt.s32.totalorder %s7705_s16, %s7705_s16  ;;  %p7108_p5 = scmp.lt.s32.totalorder %s7106_s10, %s7099_s1 }
  0x95   : > { %p7102_p3 = pnand %p7100_p2, %p7709_p13 }
  0x96   : > { %p7109_p6 = por %p7108_p5, %p7107_p4 }
  0x97   : > { %p7103_p9 = pneg %p7102_p3 }
  0x98   : > { %6825 = dma.hbm_to_vmem [thread:$0]  (!%p7701_p12), %s8566_s6, 16, %s1304_s11, [#allocation9]  }
  0x99   : > { %p7110_p10 = pnand %p7109_p6, %p7103_p9 }
  0x9b   : > { %7113 = shalt.err (!%p7110_p10)
}
  0x9c   : > { %6831 = dma.hbm_to_vmem [thread:$0]  (!%p7701_p12), %s7622_s14, 16, %s7705_s16, [#allocation12]  }
  0x9d   : > { %s7376_s28 = smov [#allocation2]   ;;  %s7377_s7 = smov [#allocation7]  }
  0x9e   : > { %s1264_s11 = sshll.u32 %s7376_s28, 4  ;;  %s1289_s2 = sshll.u32 %s7377_s7, 4  ;;  %s1265_s11 = int_to_ptr.vmem [resolvable:$true] %s1264_s11  ;;  %s1290_s2 = int_to_ptr.vmem [resolvable:$true] %s1289_s2 }
  0x9f   : > { %s7125_s4 = scalar_lea.vmem %s1265_s11, 16  ;;  %s7132_s1 = scalar_lea.vmem %s1265_s11, 32 }
  0xa0   : > { %p7126_p7 = scmp.ne.s32.totalorder %s1265_s11, %s7125_s4  ;;  %p7133_p0 = scmp.lt.s32.totalorder %s1265_s11, %s1265_s11 }
  0xa1   : > { %p7134_p1 = scmp.lt.s32.totalorder %s7132_s1, %s7125_s4 }
  0xa2   : > { %p7128_p8 = pnand %p7126_p7, %p7709_p13 }
  0xa3   : > { %p7135_p2 = por %p7134_p1, %p7133_p0 }
  0xa4   : > { %p7129_p11 = pneg %p7128_p8 }
  0xa6   : > { %p7136_p3 = pnand %p7135_p2, %p7129_p11 }
  0xa8   : > { %7139 = shalt.err (!%p7136_p3)
}
  0xa9   : > { %6816 = dma.hbm_to_vmem [thread:$0]  (!%p7701_p12), %s7587_s27, 16, %s1265_s11, [#allocation3]  }
  0xaa   : > { %s7151_s16 = scalar_lea.vmem %s1290_s2, 16  ;;  %s7158_s10 = scalar_lea.vmem %s1290_s2, 32 }
  0xab   : > { %p7152_p9 = scmp.ne.s32.totalorder %s1290_s2, %s7151_s16  ;;  %p7159_p6 = scmp.lt.s32.totalorder %s1290_s2, %s1290_s2 }
  0xac   : > { %p7160_p10 = scmp.lt.s32.totalorder %s7158_s10, %s7151_s16 }
  0xad   : > { %p7154_p4 = pnand %p7152_p9, %p7709_p13 }
  0xae   : > { %p7161_p7 = por %p7160_p10, %p7159_p6 }
  0xaf   : > { %p7155_p5 = pneg %p7154_p4 }
  0xb1   : > { %p7162_p8 = pnand %p7161_p7, %p7155_p5 }
  0xb3   : > { %7165 = shalt.err (!%p7162_p8)
}
  0xb4   : > { %6822 = dma.hbm_to_vmem [thread:$0]  (!%p7701_p12), %s7602_s20, 16, %s1290_s2, [#allocation6]  }
  0xb5   : > { %s7378_s4 = smov [#allocation10]   ;;  %s7379_s11 = smov [#allocation13]  }
  0xb6   : > { %s1314_s28 = sshll.u32 %s7378_s4, 4  ;;  %s1339_s7 = sshll.u32 %s7379_s11, 4  ;;  %s1315_s28 = int_to_ptr.vmem [resolvable:$true] %s1314_s28  ;;  %s1340_s7 = int_to_ptr.vmem [resolvable:$true] %s1339_s7 }
  0xb7   : > { %s7177_s1 = scalar_lea.vmem %s1315_s28, 16  ;;  %s7184_s6 = scalar_lea.vmem %s1315_s28, 32 }
  0xb8   : > { %p7178_p11 = scmp.ne.s32.totalorder %s1315_s28, %s7177_s1  ;;  %p7185_p2 = scmp.lt.s32.totalorder %s1315_s28, %s1315_s28 }
  0xb9   : > { %p7186_p3 = scmp.lt.s32.totalorder %s7184_s6, %s7177_s1 }
  0xba   : > { %p7180_p0 = pnand %p7178_p11, %p7709_p13 }
  0xbb   : > { %p7187_p9 = por %p7186_p3, %p7185_p2 }
  0xbc   : > { %p7181_p1 = pneg %p7180_p0 }
  0xbe   : > { %p7188_p4 = pnand %p7187_p9, %p7181_p1 }
  0xc0   : > { %7191 = shalt.err (!%p7188_p4)
}
  0xc1   : > { %6828 = dma.hbm_to_vmem [thread:$0]  (!%p7701_p12), %s7617_s12, 16, %s1315_s28, [#allocation9]  }
  0xc2   : > { %s7203_s2 = scalar_lea.vmem %s1340_s7, 16  ;;  %s7210_s16 = scalar_lea.vmem %s1340_s7, 32 }
  0xc3   : > { %p7204_p5 = scmp.ne.s32.totalorder %s1340_s7, %s7203_s2  ;;  %p7211_p7 = scmp.lt.s32.totalorder %s1340_s7, %s1340_s7 }
  0xc4   : > { %p7212_p8 = scmp.lt.s32.totalorder %s7210_s16, %s7203_s2 }
  0xc5   : > { %p7206_p6 = pnand %p7204_p5, %p7709_p13 }
  0xc6   : > { %p7213_p11 = por %p7212_p8, %p7211_p7 }
  0xc7   : > { %p7207_p10 = pneg %p7206_p6 }
  0xc9   : > { %p7214_p0 = pnand %p7213_p11, %p7207_p10 }
  0xcb   : > { %7217 = shalt.err (!%p7214_p0)
}
  0xcc   : > { %s8567_s8 = sld [smem:[#allocation58_spill]]  ;;  %p8568_p1 = scmp.ne.s32.totalorder %s8562_s18, 0 }
  0xcd   : > { %p8569_p2 = scmp.eq.s32.totalorder (!%p8568_p1), %s7665_s0, 0 }
  0xce   : > { %1367 = sbr.rel (%p8568_p1) target bundleno = 10726 (0x29e6), region = 204 }
  0xd2   : > { %6834 = dma.hbm_to_vmem [thread:$0]  (!%p7701_p12), %s8567_s8, 16, %s1340_s7, [#allocation12]  }
  0xd3   : > { %7287 = dma.done.wait (%p8569_p2), [#allocation3], 16   ;;  %p8570_p3 = pmov %p8569_p2 }
  0xd4   : > { %p8571_p13 = pmov %p8569_p2 }
  0xd5   : > { %7289 = vsyncadd (%p8570_p3), [#allocation3], 4294967280 }
  0xd6   : > { %7291 = dma.done.wait (%p8571_p13), [#allocation6], 32   ;;  %p8572_p9 = pmov %p8569_p2 }
  0xd7   : > { %p8573_p4 = pmov %p8569_p2 }
  0xd8   : > { %7293 = vsyncadd (%p8572_p9), [#allocation6], 4294967264 }
  0xd9   : > { %7295 = dma.done.wait (%p8573_p4), [#allocation9], 32   ;;  %p8574_p12 = pmov %p8569_p2 }
  0xda   : > { %p8575_p5 = pmov %p8569_p2 }
  0xdb   : > { %7297 = vsyncadd (%p8574_p12), [#allocation9], 4294967264 }
  0xdc   : > { %7299 = dma.done.wait (%p8575_p5), [#allocation12], 32   ;;  %p8576_p6 = pmov %p8569_p2 }
  0xdd   : > { %s8577_s5 = sld [smem:[#allocation23_spill]]  ;;  %p1512_p10 = scmp.lt.s32.totalorder %s7665_s0, 1  ;;  %v7380_v0 = vmov 0.0   ;;  %vm7381_vm0 = vmmov 0   ;;  %v1525_v1 = vld [vmem:[%s7422_s17 + $0x8] sm:$0xff]  ;;  %v1524_v2 = vld [vmem:[%s7422_s17] sm:$0xff] }
  0xde   : > { %7301 = vsyncadd (%p8576_p6), [#allocation12], 4294967264  ;;  %6401 = vmatprep.subr.mxu0 %v7380_v0  ;;  %6405 = vmatprep.mubr.msk.f32.mxu0 %vm7381_vm0, %v7380_v0  ;;  %vm1526_vm1 = vcmask 130048   ;;  %v1606_v4 = vld [vmem:[%s7427_s21 + $0x18] sm:$0xff]  ;;  %s8578_s9 = sld [smem:[#allocation24_spill]]  ;;  %v1605_v5 = vld [vmem:[%s7427_s21 + $0x10] sm:$0xff] }
  0xdf   : > { %s7777_s6 = scalar_select %p1512_p10, %s7665_s0, 1  ;;  %6408 = vmatprep.subr.mxu1 %v7380_v0  ;;  %6416 = vmatprep.mubr.msk.f32.mxu1 %vm7381_vm0, %v7380_v0  ;;  %v1604_v6 = vld [vmem:[%s7427_s21 + $0x8] sm:$0xff]  ;;  %v1603_v7 = vld [vmem:[%s7427_s21] sm:$0xff]  ;;  %vm1614_vm2 = vcmask 261120   ;;  %vm1691_vm3 = vcmask 64512   ;;  %vm2362_vm4 = vcmask 195584  }
  0xe0   : > { %6402 = vmatpush3.msra.mxu0 %v1525_v1  ;;  %6409 = vmatpush3.msra.mxu1 %v1606_v4  ;;  %v6113_v13 = vld [vmem:[%s7432_s25] ss:$0 sm:$0xff]  ;;  %s8502_s18 = smov 120   ;;  %s8506_s10 = smov 96   ;;  %vm2734_vm5 = vcmask 80896   ;;  %vm2754_vm6 = vcmask 1041408  }
  0xe1   : > { %s6109_s22 = sshll.u32 %s7777_s6, 3  ;;  %6403 = vmatprep.subr.mxu0 %v7380_v0  ;;  %6410 = vmatprep.subr.mxu1 %v7380_v0  ;;  %s8498_s4 = smov 80   ;;  %vm3575_vm7 = vcmask 523264  }
  0xe2   : > { %6404 = vmatpush3.msra.mxu0 %v1524_v2  ;;  %6411 = vmatpush3.msra.mxu1 %v1605_v5  ;;  %s8510_s28 = smov 88   ;;  %s8496_s11 = smov 72  }
  0xe3   : > { %s1515_s26 = scalar_lea.vmem %s8577_s5, %s6109_s22  ;;  %6419 = vmatprep.subr.mxu0 %v7380_v0  ;;  %6412 = vmatprep.subr.mxu1 %v7380_v0  ;;  %s8504_s7 = smov 112  }
  0xe4   : > { %v1523_v3 = vld [vmem:[%s1515_s26] sm:$0xff]  ;;  %6413 = vmatpush3.msra.mxu1 %v1604_v6  ;;  %s8500_s1 = smov 104   ;;  %s8489_s2 = smov 56  }
  0xe5   : > { %6406 = vmatmul.mubr.msk.f32.vlgmr.msra.gmra.mxu0 %vm1526_vm1, %v1523_v3  ;;  %6414 = vmatprep.subr.mxu1 %v7380_v0  ;;  %v1601_v9 = vld [vmem:[%s8578_s9] sm:$0xff]  ;;  %s8488_s16 = smov 64   ;;  %s8487_s22 = smov 48  }
  0xe6   : > { %6421 = vmatprep.mubr.msk.f32.mxu0 %vm7381_vm0, %v7380_v0  ;;  %6415 = vmatpush3.msra.mxu1 %v1603_v7  ;;  %s8486_s26 = smov 40   ;;  %s8579_s3 = sld [smem:[#allocation26_spill]] }
  0xe7   : > { %6429 = vmatprep.subr.mxu1 %v7380_v0  ;;  %s8610_s5 = smov 40   ;;  %s8615_s8 = sld [smem:[#allocation48_spill]] }
  0xe8   : > { %s8619_s9 = sld [smem:[#allocation49_spill]]  ;;  %p8626_p8 = scmp.ne.s32.totalorder %s8559_s15, 0 }
 0x1a5   : > { %v1596_v8 = vpop.f32.mrf.mxu0 }
 0x1a6   : > { %v1600_v10 = vmul.f32 5.656854, %v1596_v8 }
 0x1a7   : > { %v6407_v11 = vpop.f32.mrf.mxu0 }
 0x1a8   : > { %v7800_v12 = vadd.f32 %v1601_v9, %v1600_v10  ;;  %v2367_v9 = vld [vmem:[%s7437_s29 + $0x18] sm:$0xff] }
 0x1aa   : > { %6417 = vmatmul.mubr.msk.f32.vlgmr.msra.gmra.mxu1 %vm1614_vm2, %v7800_v12 }
 0x1ab   : > { %6431 = vmatprep.mubr.msk.f32.mxu1 %vm7381_vm0, %v7380_v0 }
 0x26a   : > { %v1684_v14 = vpop.f32.mrf.mxu1 }
 0x26b   : > { %v7807_v15 = vadd.f32 %v6113_v13, %v1684_v14 }
 0x26c   : > { %v6418_v16 = vpop.f32.mrf.mxu1 }
 0x26d   : > { %1853 = vrot.lane.b32.xlu1 %v7807_v15, %s8502_s18  ;;  %1689 = vrot.lane.b32.xlu0 %v7807_v15, %s8506_s10  ;;  %v2365_v16 = vld [vmem:[%s7437_s29 + $0x8] sm:$0xff] }
 0x271   : > { %2020 = vrot.lane.b32.xlu1 %v7807_v15, %s8498_s4  ;;  %1855 = vrot.lane.b32.xlu0 %v7807_v15, %s8510_s28 }
 0x275   : > { %2185 = vrot.lane.b32.xlu1 %v7807_v15, %s8496_s11  ;;  %2018 = vrot.lane.b32.xlu0 %v7807_v15, %s8504_s7 }
 0x279   : > { %2183 = vrot.lane.b32.xlu0 %v7807_v15, %s8500_s1 }
 0x2df   : > { %v1854_v17 = vpop.permute.xlu1 %1853  ;;  %v1690_v18 = vpop.permute.xlu0 %1689 }
 0x2e0   : > { %6420 = vmatpush3.xpose.msk.msra.mxu0 %vm1691_vm3, %v1690_v18 }
 0x2e1   : > { %6424 = vmatprep.subr.mxu0 %v7380_v0 }
 0x2e3   : > { %6422 = vmatmul.mubr.msk.f32.vlgmr.msra.gmra.mxu0 %vm1691_vm3, %v7807_v15  ;;  %v1856_v19 = vpop.permute.xlu0 %1855  ;;  %v2021_v20 = vpop.permute.xlu1 %2020 }
 0x2e4   : > { %6430 = vmatpush3.xpose.msk.msra.mxu1 %vm1691_vm3, %v1856_v19  ;;  %6426 = vmatprep.mubr.msk.f32.mxu0 %vm7381_vm0, %v7380_v0 }
 0x2e5   : > { %6439 = vmatprep.subr.mxu1 %v7380_v0 }
 0x2e7   : > { %6432 = vmatmul.mubr.msk.f32.vlgmr.msra.gmra.mxu1 %vm1691_vm3, %v1854_v17  ;;  %v2019_v21 = vpop.permute.xlu0 %2018  ;;  %v2186_v22 = vpop.permute.xlu1 %2185  ;;  %v2364_v17 = vld [vmem:[%s7437_s29] sm:$0xff] }
 0x2e8   : > { %6440 = vmatpush3.xpose.msk.msra.mxu1 %vm1691_vm3, %v2021_v20  ;;  %6441 = vmatprep.mubr.msk.f32.mxu1 %vm7381_vm0, %v7380_v0 }
 0x2e9   : > { %6449 = vmatprep.subr.mxu1 %v7380_v0 }
 0x2eb   : > { %6442 = vmatmul.mubr.msk.f32.vlgmr.msra.gmra.mxu1 %vm1691_vm3, %v2019_v21  ;;  %v2184_v23 = vpop.permute.xlu0 %2183 }
 0x2ec   : > { %6450 = vmatpush3.xpose.msk.msra.mxu1 %vm1691_vm3, %v2186_v22  ;;  %6451 = vmatprep.mubr.msk.f32.mxu1 %vm7381_vm0, %v7380_v0 }
 0x2ed   : > { %6459 = vmatprep.subr.mxu1 %v7380_v0 }
 0x2ef   : > { %6452 = vmatmul.mubr.msk.f32.vlgmr.msra.gmra.mxu1 %vm1691_vm3, %v2184_v23 }
 0x2f0   : > { %6467 = vmatprep.mubr.msk.f32.mxu1 %vm7381_vm0, %v7380_v0  ;;  %6460 = vmatpush3.msra.mxu1 %v2367_v9 }
 0x2f1   : > { %6461 = vmatprep.subr.mxu1 %v7380_v0 }
 0x3a3   : > { %v1762_v24 = vpop.f32.mrf.mxu0 }
 0x3a4   : > { %v1766_v25 = vsel %vm1691_vm3, %v1762_v24, -inf }
 0x3a5   : > { %1767 = vmax.xlane.f32.xlu1 %v1766_v25  ;;  %v6423_v26 = vpop.f32.mrf.mxu0 }
 0x3a7   : > { %v1927_v27 = vpop.f32.mrf.mxu1 }
 0x3a8   : > { %v1931_v28 = vsel %vm1691_vm3, %v1927_v27, -inf }
 0x3a9   : > { %1932 = vmax.xlane.f32.xlu0 %v1931_v28  ;;  %v6433_v29 = vpop.f32.mrf.mxu1  ;;  %v6127_v28 = vld [vmem:[%s8579_s3] ss:$0 sm:$0xff]  ;;  %s8606_s3 = smov 72  }
 0x3ab   : > { %v2092_v30 = vpop.f32.mrf.mxu1 }
 0x3ac   : > { %v2096_v31 = vsel %vm1691_vm3, %v2092_v30, -inf }
 0x3ad   : > { %2097 = vmax.xlane.f32.xlu0 %v2096_v31  ;;  %v6443_v32 = vpop.f32.mrf.mxu1 }
 0x3af   : > { %v2257_v33 = vpop.f32.mrf.mxu1 }
 0x3b0   : > { %v2261_v34 = vsel %vm1691_vm3, %v2257_v33, -inf }
 0x3b1   : > { %v6453_v35 = vpop.f32.mrf.mxu1  ;;  %2262 = vmax.xlane.f32.xlu1 %v2261_v34 }
 0x3c2   : > { %1942 = vrot.lane.b32.xlu1 %v7807_v15, %s8489_s2  ;;  %s8580_s2 = sld [smem:[#allocation25_spill]] }
 0x42e   : > { %v1768_v36 = vpop.xlane.xlu1 %1767 }
 0x42f   : > { %v1769_v37 = vsub.f32 %v1762_v24, %v1768_v36 }
 0x431   : > { %v1770_v38 = vmul.f32 1.442695, %v1769_v37 }
 0x432   : > { %v1933_v39 = vpop.xlane.xlu0 %1932 }
 0x433   : > { %6960 = vpow2.f32 %v1770_v38  ;;  %v1934_v40 = vsub.f32 %v1927_v27, %v1933_v39  ;;  %v2566_v39 = vld [vmem:[%s7467_s30 + $0x18] sm:$0xff] }
 0x435   : > { %v1935_v41 = vmul.f32 1.442695, %v1934_v40  ;;  %v2565_v40 = vld [vmem:[%s7467_s30 + $0x10] sm:$0xff] }
 0x436   : > { %v2098_v51 = vpop.xlane.xlu0 %2097 }
 0x437   : > { %6962 = vpow2.f32 %v1935_v41  ;;  %v2099_v52 = vsub.f32 %v2092_v30, %v2098_v51  ;;  %v2563_v41 = vld [vmem:[%s7467_s30] sm:$0xff] }
 0x439   : > { %v2100_v53 = vmul.f32 1.442695, %v2099_v52 }
 0x43a   : > { %v2263_v42 = vpop.xlane.xlu1 %2262 }
 0x43b   : > { %v2264_v43 = vsub.f32 %v2257_v33, %v2263_v42 }
 0x43d   : > { %v2265_v44 = vmul.f32 1.442695, %v2264_v43 }
 0x43e   : > { %v1943_v56 = vpop.permute.xlu1 %1942 }
 0x43f   : > { %6964 = vpow2.f32 %v2265_v44 }
 0x440   : > { %v6961_v45 = vpop.eup %6960  ;;  %6966 = vpow2.f32 %v2100_v53 }
 0x441   : > { %v1772_v46 = vsel %vm1691_vm3, %v6961_v45, 0.0 }
 0x442   : > { %1773 = vadd.xlane.f32.xlu0 %v1772_v46 }
 0x444   : > { %v6963_v47 = vpop.eup %6962 }
 0x445   : > { %v1937_v48 = vsel %vm1691_vm3, %v6963_v47, 0.0 }
 0x446   : > { %1938 = vadd.xlane.f32.xlu1 %v1937_v48 }
 0x44c   : > { %v6965_v49 = vpop.eup %6964 }
 0x44d   : > { %v2267_v50 = vsel %vm1691_vm3, %v6965_v49, 0.0  ;;  %v6967_v54 = vpop.eup %6966 }
 0x44e   : > { %2268 = vadd.xlane.f32.xlu1 %v2267_v50  ;;  %v2102_v55 = vsel %vm1691_vm3, %v6967_v54, 0.0 }
 0x458   : > { %1777 = vrot.lane.b32.xlu0 %v7807_v15, %s8488_s16  ;;  %s8490_s16 = smov 24  }
 0x45f   : > { %2107 = vrot.lane.b32.xlu1 %v7807_v15, %s8487_s22  ;;  %s8492_s22 = smov 16  }
 0x477   : > { %2103 = vadd.xlane.f32.xlu0 %v2102_v55 }
 0x48d   : > { %2272 = vrot.lane.b32.xlu0 %v7807_v15, %s8486_s26  ;;  %s8494_s26 = smov 8   ;;  %v2366_v15 = vld [vmem:[%s7437_s29 + $0x10] sm:$0xff] }
 0x48e   : > { %6462 = vmatpush3.msra.mxu1 %v2366_v15 }
 0x48f   : > { %6463 = vmatprep.subr.mxu1 %v7380_v0 }
 0x490   : > { %6464 = vmatpush3.msra.mxu1 %v2365_v16 }
 0x491   : > { %6465 = vmatprep.subr.mxu1 %v7380_v0 }
 0x492   : > { %6466 = vmatpush3.msra.mxu1 %v2364_v17 }
 0x493   : > { %6481 = vmatprep.subr.mxu1 %v2566_v39 }
 0x4cb   : > { %v1774_v57 = vpop.xlane.xlu0 %1773 }
 0x4cc   : > { %6968 = vrcp.f32 %v1774_v57 }
 0x4cf   : > { %v1778_v58 = vpop.permute.xlu0 %1777  ;;  %v1939_v59 = vpop.xlane.xlu1 %1938 }
 0x4d0   : > { %6970 = vrcp.f32 %v1939_v59  ;;  %6425 = vmatpush3.msra.mxu0 %v1778_v58 }
 0x4d1   : > { %6434 = vmatprep.subr.mxu0 %v7380_v0 }
 0x4d7   : > { %v2269_v61 = vpop.xlane.xlu1 %2268 }
 0x4d9   : > { %v6969_v60 = vpop.eup %6968 }
 0x4da   : > { %v1776_v62 = vmul.f32 %v6969_v60, %v6961_v45 }
 0x4db   : > { %v2108_v2 = vpop.permute.xlu1 %2107 }
 0x4dc   : > { %6427 = vmatmul.mubr.msk.f32.vlgmr.msra.gmra.mxu0 %vm1691_vm3, %v1776_v62 }
 0x4dd   : > { %v6971_v63 = vpop.eup %6970  ;;  %6435 = vmatpush3.msra.mxu0 %v1943_v56  ;;  %6436 = vmatprep.mubr.msk.f32.mxu0 %vm7381_vm0, %v7380_v0 }
 0x4de   : > { %6444 = vmatprep.subr.mxu0 %v7380_v0  ;;  %v1941_v1 = vmul.f32 %v6971_v63, %v6963_v47 }
 0x4e0   : > { %6437 = vmatmul.mubr.msk.f32.vlgmr.msra.gmra.mxu0 %vm1691_vm3, %v1941_v1 }
 0x4e1   : > { %6445 = vmatpush3.msra.mxu0 %v2108_v2  ;;  %6446 = vmatprep.mubr.msk.f32.mxu0 %vm7381_vm0, %v7380_v0 }
 0x4e2   : > { %6454 = vmatprep.subr.mxu0 %v7380_v0 }
 0x500   : > { %v2104_v3 = vpop.xlane.xlu0 %2103 }
 0x501   : > { %6972 = vrcp.f32 %v2104_v3 }
 0x502   : > { %6974 = vrcp.f32 %v2269_v61 }
 0x504   : > { %v2273_v7 = vpop.permute.xlu0 %2272 }
 0x50e   : > { %v6973_v4 = vpop.eup %6972 }
 0x50f   : > { %v2106_v5 = vmul.f32 %v6973_v4, %v6967_v54  ;;  %v6975_v6 = vpop.eup %6974 }
 0x510   : > { %v2271_v8 = vmul.f32 %v6975_v6, %v6965_v49 }
 0x511   : > { %6447 = vmatmul.mubr.msk.f32.vlgmr.msra.gmra.mxu0 %vm1691_vm3, %v2106_v5 }
 0x512   : > { %6455 = vmatpush3.msra.mxu0 %v2273_v7  ;;  %6456 = vmatprep.mubr.msk.f32.mxu0 %vm7381_vm0, %v7380_v0 }
 0x513   : > { %6470 = vmatprep.subr.mxu0 %v7380_v0 }
 0x515   : > { %6457 = vmatmul.mubr.msk.f32.vlgmr.msra.gmra.mxu0 %vm1691_vm3, %v2271_v8 }
 0x516   : > { %6478 = vmatprep.mubr.msk.f32.mxu0 %vm7381_vm0, %v7380_v0 }
 0x59c   : > { %v1849_v10 = vpop.f32.mrf.mxu0 }
 0x59e   : > { %v6428_v11 = vpop.f32.mrf.mxu0 }
 0x5a0   : > { %v2014_v13 = vpop.f32.mrf.mxu0 }
 0x5a1   : > { %2349 = vrot.lane.b32.xlu1 %v2014_v13, %s8494_s26 }
 0x5a2   : > { %v6438_v14 = vpop.f32.mrf.mxu0 }
 0x5d1   : > { %v2179_v18 = vpop.f32.mrf.mxu0 }
 0x5d2   : > { %2353 = vrot.lane.b32.xlu0 %v2179_v18, %s8492_s22  ;;  %s6231_s22 = sshll.u32 %s7777_s6, 4  ;;  %s8582_s6 = sld [smem:[#allocation27_spill]] }
 0x5d3   : > { %v6448_v19 = vpop.f32.mrf.mxu0  ;;  %s1520_s26 = scalar_lea.vmem %s8580_s2, %s6231_s22  ;;  %s8583_s2 = sld [smem:[#allocation28_spill]] }
 0x5d4   : > { %v7900_v42 = vld [vmem:[%s1520_s26] sm:$0xff]  ;;  %v7902_v43 = vld [vmem:[%s1520_s26 + $0x8] sm:$0x3]  ;;  %s8584_s22 = sld [smem:[#allocation31_spill]] }
 0x5d5   : > { %v2344_v20 = vpop.f32.mrf.mxu0  ;;  %s8585_s26 = sld [smem:[#allocation30_spill]] }
 0x5d6   : > { %2357 = vrot.lane.b32.xlu1 %v2344_v20, %s8490_s16  ;;  %s8581_s16 = sld [smem:[#allocation29_spill]] }
 0x5d7   : > { %v6458_v21 = vpop.f32.mrf.mxu0 }
 0x5d8   : > { %v6129_v52 = vld [vmem:[%s8582_s6] ss:$0 sm:$0xff]  ;;  %s8586_s6 = smov 8  }
 0x5d9   : > { %v6130_v54 = vld [vmem:[%s8583_s2] ss:$0 sm:$0xff]  ;;  %s8587_s2 = sld [smem:[#allocation32_spill]] }
 0x5da   : > { %v6133_v57 = vld [vmem:[%s8584_s22] ss:$0 sm:$0xff]  ;;  %s8588_s22 = smov 16  }
 0x5db   : > { %v6131_v62 = vld [vmem:[%s8585_s26] ss:$0 sm:$0xff]  ;;  %s8589_s26 = sld [smem:[#allocation33_spill]] }
 0x5dc   : > { %v2482_v44 = vld [vmem:[%s8581_s16 + $0x18] sm:$0xff]  ;;  %v2481_v45 = vld [vmem:[%s8581_s16 + $0x10] sm:$0xff]  ;;  %v2480_v46 = vld [vmem:[%s8581_s16 + $0x8] sm:$0xff] }
 0x5dd   : > { %6471 = vmatpush3.msra.mxu0 %v2482_v44  ;;  %v2479_v47 = vld [vmem:[%s8581_s16] sm:$0xff] }
 0x5de   : > { %6472 = vmatprep.subr.mxu0 %v7380_v0 }
 0x5df   : > { %6473 = vmatpush3.msra.mxu0 %v2481_v45 }
 0x5e0   : > { %6474 = vmatprep.subr.mxu0 %v7380_v0 }
 0x5e1   : > { %6475 = vmatpush3.msra.mxu0 %v2480_v46 }
 0x5e2   : > { %6476 = vmatprep.subr.mxu0 %v7380_v0 }
 0x5e3   : > { %6477 = vmatpush3.msra.mxu0 %v2479_v47 }
 0x5e4   : > { %6492 = vmatprep.subr.mxu0 %v7380_v0 }
 0x613   : > { %v2350_v22 = vpop.permute.xlu1 %2349 }
 0x614   : > { %v2360_v24 = vsel %vm1691_vm3, %v1849_v10, %v2350_v22 }
 0x644   : > { %v2354_v23 = vpop.permute.xlu0 %2353 }
 0x645   : > { %v2361_v25 = vsel %vm1526_vm1, %v2360_v24, %v2354_v23 }
 0x648   : > { %v2358_v26 = vpop.permute.xlu1 %2357 }
 0x649   : > { %v2363_v27 = vsel %vm2362_vm4, %v2361_v25, %v2358_v26 }
 0x64a   : > { %6468 = vmatmul.mubr.msk.f32.vlgmr.msra.gmra.mxu1 %vm1614_vm2, %v2363_v27 }
 0x64b   : > { %6482 = vmatpush3.msra.mxu1 %v2566_v39  ;;  %6489 = vmatprep.mubr.msk.f32.mxu1 %vm1614_vm2, %v7900_v42 }
 0x64c   : > { %6483 = vmatprep.subr.mxu1 %v2565_v40 }
 0x64d   : > { %6484 = vmatpush3.msra.mxu1 %v2565_v40 }
 0x70a   : > { %v2444_v29 = vpop.f32.mrf.mxu1 }
 0x70b   : > { %v2445_v30 = vadd.f32 %v6127_v28, %v2444_v29 }
 0x70c   : > { %v6469_v31 = vpop.f32.mrf.mxu1 }
 0x70d   : > { %v2448_v32 = vadd.f32 %v2445_v30, %v7800_v12  ;;  %v2564_v12 = vld [vmem:[%s7467_s30 + $0x8] sm:$0xff] }
 0x70e   : > { %6485 = vmatprep.subr.mxu1 %v2564_v12 }
 0x70f   : > { %v2451_v33 = vsel %vm1614_vm2, %v2448_v32, 0.0  ;;  %6486 = vmatpush3.msra.mxu1 %v2564_v12 }
 0x710   : > { %2452 = vadd.xlane.f32.xlu0 %v2451_v33  ;;  %6487 = vmatprep.subr.mxu1 %v2563_v41 }
 0x711   : > { %6488 = vmatpush3.msra.mxu1 %v2563_v41 }
 0x712   : > { %6490 = vmatmul.mubr.msk.f32.vlgmr.msra.gmra.mxu1 %vm1614_vm2, %v7902_v43  ;;  %6499 = vmatprep.subr.mxu1 %v7380_v0 }
 0x713   : > { %6503 = vmatprep.mubr.msk.f32.mxu1 %vm7381_vm0, %v7380_v0 }
 0x799   : > { %v2453_v34 = vpop.xlane.xlu0 %2452 }
 0x79a   : > { %v2455_v35 = vmul.f32 0.03125, %v2453_v34 }
 0x79c   : > { %v2456_v36 = vsub.f32 %v2448_v32, %v2455_v35 }
 0x79e   : > { %v2457_v37 = vmul.f32 %v2456_v36, %v2456_v36 }
 0x7a0   : > { %v2458_v38 = vsel %vm1614_vm2, %v2457_v37, 0.0 }
 0x7a1   : > { %2459 = vadd.xlane.f32.xlu1 %v2458_v38 }
 0x7d2   : > { %v6491_v58 = vpop.f32.mrf.mxu1 }
 0x7d3   : > { %v7928_v59 = vadd.f32 %v6491_v58, %v6133_v57 }
 0x7d4   : > { %v2646_v60 = vpop.f32.mrf.mxu1 }
 0x7d5   : > { %2831 = vrot.lane.b32.xlu0 %v7928_v59, %s8502_s18  ;;  %v7934_v61 = vadd.f32 %v6133_v57, %v2646_v60 }
 0x7d7   : > { %2829 = vrot.lane.b32.xlu1 %v7934_v61, %s8502_s18 }
 0x82a   : > { %v2460_v48 = vpop.xlane.xlu1 %2459 }
 0x82b   : > { %v2461_v49 = vmul.f32 0.03125, %v2460_v48 }
 0x82d   : > { %v2462_v50 = vadd.f32 1e-05, %v2461_v49 }
 0x82f   : > { %6976 = vrsqrt.f32 %v2462_v50 }
 0x83c   : > { %v6977_v51 = vpop.eup %6976 }
 0x83d   : > { %v2464_v53 = vmul.f32 %v6977_v51, %v2456_v36 }
 0x83f   : > { %v2471_v55 = vmul.f32 %v6129_v52, %v2464_v53 }
 0x841   : > { %v7921_v56 = vadd.f32 %v6130_v54, %v2471_v55 }
 0x843   : > { %6479 = vmatmul.mubr.msk.f32.vlgmr.msra.gmra.mxu0 %vm1614_vm2, %v7921_v56 }
 0x844   : > { %6496 = vmatprep.mubr.msk.f32.mxu0 %vm7381_vm0, %v7380_v0  ;;  %6493 = vmatpush3.xpose.msk.msra.mxu0 %vm1691_vm3, %v7928_v59 }
 0x845   : > { %6494 = vmatprep.subr.mxu0 %v7380_v0 }
 0x847   : > { %v2832_v2 = vpop.permute.xlu0 %2831 }
 0x848   : > { %6495 = vmatpush3.xpose.msk.msra.mxu0 %vm1691_vm3, %v7934_v61 }
 0x849   : > { %6506 = vmatprep.subr.mxu0 %v7380_v0  ;;  %v2830_v4 = vpop.permute.xlu1 %2829 }
 0x903   : > { %v2559_v63 = vpop.f32.mrf.mxu0 }
 0x904   : > { %v7943_v1 = vadd.f32 %v6131_v62, %v2559_v63 }
 0x905   : > { %v6480_v3 = vpop.f32.mrf.mxu0 }
 0x906   : > { %2827 = vrot.lane.b32.xlu0 %v7943_v1, %s8502_s18  ;;  %6497 = vmatmul.mubr.msk.f32.vlgmr.msra.gmra.mxu0 %vm1691_vm3, %v7943_v1  ;;  %s8594_s18 = sld [smem:[#allocation35_spill]] }
 0x907   : > { %6507 = vmatpush3.xpose.msk.msra.mxu0 %vm1691_vm3, %v2832_v2  ;;  %6510 = vmatprep.mubr.msk.f32.mxu0 %vm7381_vm0, %v7380_v0 }
 0x908   : > { %6508 = vmatprep.subr.mxu0 %v7380_v0 }
 0x90b   : > { %6509 = vmatpush3.xpose.msk.msra.mxu0 %vm1691_vm3, %v2830_v4 }
 0x90c   : > { %6527 = vmatprep.subr.mxu0 %v7380_v0 }
 0x978   : > { %v2828_v5 = vpop.permute.xlu0 %2827 }
 0x979   : > { %6511 = vmatmul.mubr.msk.f32.vlgmr.msra.gmra.mxu0 %vm1691_vm3, %v2828_v5 }
 0x97a   : > { %6531 = vmatprep.mubr.msk.f32.mxu0 %vm7381_vm0, %v7380_v0 }
 0x9c6   : > { %v2730_v6 = vpop.f32.mrf.mxu0 }
 0x9c7   : > { %v2735_v7 = vsel %vm2734_vm5, %v2730_v6, -inf }
 0x9c8   : > { %2736 = vmax.xlane.f32.xlu1 %v2735_v7  ;;  %v6498_v8 = vpop.f32.mrf.mxu0 }
 0x9d9   : > { %2746 = vrot.lane.b32.xlu1 %v7934_v61, %s8506_s10 }
 0x9dd   : > { %2922 = vrot.lane.b32.xlu1 %v7928_v59, %s8510_s28 }
 0x9e1   : > { %3004 = vrot.lane.b32.xlu1 %v7928_v59, %s8504_s7 }
 0xa39   : > { %v2905_v9 = vpop.f32.mrf.mxu0 }
 0xa3a   : > { %v2909_v10 = vsel %vm2734_vm5, %v2905_v9, -inf }
 0xa3b   : > { %2910 = vmax.xlane.f32.xlu0 %v2909_v10  ;;  %v6512_v11 = vpop.f32.mrf.mxu0 }
 0xa3c   : > { %v3363_v11 = vld [vmem:[%s8587_s2 + $0x10] sm:$0xff] }
 0xa51   : > { %2748 = vrot.lane.b32.xlu0 %v7928_v59, %s8506_s10  ;;  %v2737_v13 = vpop.xlane.xlu1 %2736  ;;  %s8596_s10 = sld [smem:[#allocation39_spill]] }
 0xa52   : > { %v2738_v14 = vsub.f32 %v2730_v6, %v2737_v13  ;;  %v3362_v13 = vld [vmem:[%s8587_s2 + $0x8] sm:$0xff] }
 0xa54   : > { %v2739_v15 = vmul.f32 1.442695, %v2738_v14  ;;  %v3361_v14 = vld [vmem:[%s8587_s2] sm:$0xff] }
 0xa55   : > { %v2747_v22 = vpop.permute.xlu1 %2746 }
 0xa56   : > { %6978 = vpow2.f32 %v2739_v15 }
 0xa59   : > { %v2923_v28 = vpop.permute.xlu1 %2922 }
 0xa5d   : > { %v3005_v30 = vpop.permute.xlu1 %3004 }
 0xa63   : > { %v6979_v16 = vpop.eup %6978 }
 0xa64   : > { %v2741_v17 = vsel %vm2734_vm5, %v6979_v16, 0.0 }
 0xa70   : > { %2742 = vadd.xlane.f32.xlu0 %v2741_v17 }
 0xa86   : > { %2920 = vrot.lane.b32.xlu0 %v7934_v61, %s8510_s28 }
 0xa8a   : > { %3002 = vrot.lane.b32.xlu0 %v7934_v61, %s8504_s7 }
 0xac4   : > { %v2911_v18 = vpop.xlane.xlu0 %2910 }
 0xac5   : > { %v2912_v19 = vsub.f32 %v2905_v9, %v2911_v18 }
 0xac7   : > { %v2913_v20 = vmul.f32 1.442695, %v2912_v19 }
 0xac8   : > { %v2749_v21 = vpop.permute.xlu0 %2748 }
 0xac9   : > { %6980 = vpow2.f32 %v2913_v20  ;;  %6500 = vmatpush3.msk.msra.mxu1 %vm2754_vm6, %v2749_v21 }
 0xaca   : > { %6501 = vmatprep.subr.mxu1 %v7380_v0 }
 0xacb   : > { %6502 = vmatpush3.msra.mxu1 %v2747_v22 }
 0xacc   : > { %6513 = vmatprep.subr.mxu1 %v7380_v0 }
 0xad6   : > { %v6981_v23 = vpop.eup %6980 }
 0xad7   : > { %v2915_v24 = vsel %vm2734_vm5, %v6981_v23, 0.0 }
 0xad8   : > { %2916 = vadd.xlane.f32.xlu1 %v2915_v24 }
 0xae9   : > { %3000 = vrot.lane.b32.xlu1 %v7943_v1, %s8504_s7  ;;  %s8595_s7 = sld [smem:[#allocation37_spill]] }
 0xaed   : > { %3093 = vrot.lane.b32.xlu1 %v7934_v61, %s8498_s4 }
 0xaf9   : > { %v2743_v25 = vpop.xlane.xlu0 %2742 }
 0xafa   : > { %6982 = vrcp.f32 %v2743_v25 }
 0xafd   : > { %v2921_v29 = vpop.permute.xlu0 %2920 }
 0xb01   : > { %v3003_v34 = vpop.permute.xlu0 %3002 }
 0xb07   : > { %v6983_v26 = vpop.eup %6982 }
 0xb08   : > { %v2745_v27 = vmul.f32 %v6983_v26, %v6979_v16 }
 0xb0a   : > { %6504 = vmatmul.mubr.msk.f32.vlgmr.msra.gmra.mxu1 %vm2734_vm5, %v2745_v27 }
 0xb0b   : > { %6514 = vmatpush3.msk.msra.mxu1 %vm2754_vm6, %v2923_v28  ;;  %6517 = vmatprep.mubr.msk.f32.mxu1 %vm7381_vm0, %v7380_v0 }
 0xb0c   : > { %6515 = vmatprep.subr.mxu1 %v7380_v0 }
 0xb0d   : > { %6516 = vmatpush3.msra.mxu1 %v2921_v29 }
 0xb0e   : > { %6520 = vmatprep.subr.mxu1 %v7380_v0 }
 0xb61   : > { %v2917_v31 = vpop.xlane.xlu1 %2916 }
 0xb62   : > { %6984 = vrcp.f32 %v2917_v31 }
 0xb65   : > { %v3001_v35 = vpop.permute.xlu1 %3000 }
 0xb69   : > { %v3094_v48 = vpop.permute.xlu1 %3093 }
 0xb6f   : > { %v6985_v32 = vpop.eup %6984 }
 0xb70   : > { %v2919_v33 = vmul.f32 %v6985_v32, %v6981_v23  ;;  %v6156_v23 = vld [vmem:[%s8589_s26] ss:$0 sm:$0xff]  ;;  %s8593_s26 = sld [smem:[#allocation34_spill]] }
 0xb72   : > { %6518 = vmatmul.mubr.msk.f32.vlgmr.msra.gmra.mxu1 %vm2734_vm5, %v2919_v33 }
 0xb73   : > { %6521 = vmatpush3.xpose.msk.msra.mxu1 %vm1691_vm3, %v3005_v30  ;;  %6524 = vmatprep.mubr.msk.f32.mxu1 %vm7381_vm0, %v7380_v0 }
 0xb74   : > { %6522 = vmatprep.subr.mxu1 %v7380_v0 }
 0xb77   : > { %6523 = vmatpush3.xpose.msk.msra.mxu1 %vm1691_vm3, %v3003_v34 }
 0xb78   : > { %6541 = vmatprep.subr.mxu1 %v7380_v0 }
 0xb7a   : > { %6525 = vmatmul.mubr.msk.f32.vlgmr.msra.gmra.mxu1 %vm1691_vm3, %v3001_v35 }
 0xb7b   : > { %6545 = vmatprep.mubr.msk.f32.mxu1 %vm7381_vm0, %v7380_v0 }
 0xbca   : > { %v7997_v36 = vpop.f32.mrf.mxu1 }
 0xbcc   : > { %v6505_v37 = vpop.f32.mrf.mxu1 }
 0xc32   : > { %v2996_v38 = vpop.f32.mrf.mxu1 }
 0xc34   : > { %v6519_v39 = vpop.f32.mrf.mxu1 }
 0xc3a   : > { %v3078_v40 = vpop.f32.mrf.mxu1 }
 0xc3b   : > { %v3082_v12 = vsel %vm2734_vm5, %v3078_v40, -inf }
 0xc3c   : > { %3083 = vmax.xlane.f32.xlu0 %v3082_v12  ;;  %v6526_v41 = vpop.f32.mrf.mxu1 }
 0xc52   : > { %3095 = vrot.lane.b32.xlu0 %v7928_v59, %s8498_s4  ;;  %s8591_s4 = sld [smem:[#allocation36_spill]] }
 0xc56   : > { %3177 = vrot.lane.b32.xlu0 %v7928_v59, %s8500_s1 }
 0xc58   : > { %v3478_v34 = vld [vmem:[%s8591_s4 + $0x18] sm:$0xff]  ;;  %v3477_v35 = vld [vmem:[%s8591_s4 + $0x10] sm:$0xff] }
 0xc5a   : > { %3173 = vrot.lane.b32.xlu0 %v7943_v1, %s8500_s1 }
 0xcc5   : > { %v3084_v44 = vpop.xlane.xlu0 %3083 }
 0xcc6   : > { %v3085_v45 = vsub.f32 %v3078_v40, %v3084_v44 }
 0xcc8   : > { %v3086_v46 = vmul.f32 1.442695, %v3085_v45 }
 0xcc9   : > { %v3096_v47 = vpop.permute.xlu0 %3095 }
 0xcca   : > { %6986 = vpow2.f32 %v3086_v46  ;;  %6528 = vmatpush3.msk.msra.mxu0 %vm2754_vm6, %v3096_v47  ;;  %v6158_v47 = vld [vmem:[%s8593_s26] ss:$0 sm:$0xff]  ;;  %s8600_s26 = sld [smem:[#allocation43_spill]] }
 0xccb   : > { %6529 = vmatprep.subr.mxu0 %v7380_v0 }
 0xccc   : > { %6530 = vmatpush3.msra.mxu0 %v3094_v48 }
 0xccd   : > { %6534 = vmatprep.subr.mxu0 %v7380_v0  ;;  %v3178_v54 = vpop.permute.xlu0 %3177 }
 0xcd1   : > { %v3174_v57 = vpop.permute.xlu0 %3173 }
 0xcd7   : > { %v6987_v49 = vpop.eup %6986 }
 0xcd8   : > { %v3088_v50 = vsel %vm2734_vm5, %v6987_v49, 0.0 }
 0xcd9   : > { %3089 = vadd.xlane.f32.xlu1 %v3088_v50 }
 0xcea   : > { %3175 = vrot.lane.b32.xlu1 %v7934_v61, %s8500_s1  ;;  %s8592_s1 = sld [smem:[#allocation38_spill]] }
 0xcf0   : > { %v3567_v37 = vld [vmem:[%s8592_s1 + $0x38] sm:$0xff]  ;;  %v3565_v39 = vld [vmem:[%s8592_s1 + $0x28] sm:$0xff]  ;;  %v3564_v40 = vld [vmem:[%s8592_s1 + $0x20] sm:$0xff] }
 0xcf1   : > { %v3563_v12 = vld [vmem:[%s8592_s1 + $0x18] sm:$0xff] }
 0xd62   : > { %v3090_v51 = vpop.xlane.xlu1 %3089 }
 0xd63   : > { %6988 = vrcp.f32 %v3090_v51 }
 0xd66   : > { %v3176_v55 = vpop.permute.xlu1 %3175 }
 0xd70   : > { %v6989_v52 = vpop.eup %6988 }
 0xd71   : > { %v3092_v53 = vmul.f32 %v6989_v52, %v6987_v49  ;;  %v6159_v49 = vld [vmem:[%s8594_s18] ss:$0 sm:$0xff]  ;;  %v3562_v52 = vld [vmem:[%s8592_s1 + $0x10] sm:$0xff]  ;;  %s8597_s18 = sld [smem:[#allocation42_spill]] }
 0xd73   : > { %6532 = vmatmul.mubr.msk.f32.vlgmr.msra.gmra.mxu0 %vm2734_vm5, %v3092_v53  ;;  %v3561_v53 = vld [vmem:[%s8592_s1 + $0x8] sm:$0xff] }
 0xd74   : > { %6535 = vmatpush3.xpose.msk.msra.mxu0 %vm1691_vm3, %v3178_v54  ;;  %6538 = vmatprep.mubr.msk.f32.mxu0 %vm7381_vm0, %v7380_v0  ;;  %v3560_v54 = vld [vmem:[%s8592_s1] sm:$0xff] }
 0xd75   : > { %6536 = vmatprep.subr.mxu0 %v7380_v0 }
 0xd78   : > { %6537 = vmatpush3.xpose.msk.msra.mxu0 %vm1691_vm3, %v3176_v55  ;;  %v6160_v55 = vld [vmem:[%s8595_s7] ss:$0 sm:$0xff]  ;;  %s8599_s7 = sld [smem:[#allocation41_spill]] }
 0xd79   : > { %6559 = vmatprep.subr.mxu0 %v7380_v0 }
 0xd7b   : > { %6539 = vmatmul.mubr.msk.f32.vlgmr.msra.gmra.mxu0 %vm1691_vm3, %v3174_v57 }
 0xd7c   : > { %6567 = vmatprep.mubr.msk.f32.mxu0 %vm7381_vm0, %v7380_v0  ;;  %6560 = vmatpush3.msra.mxu0 %v3478_v34 }
 0xd7d   : > { %6561 = vmatprep.subr.mxu0 %v7380_v0 }
 0xd7e   : > { %6562 = vmatpush3.msra.mxu0 %v3477_v35 }
 0xd7f   : > { %6563 = vmatprep.subr.mxu0 %v7380_v0 }
 0xe33   : > { %v3169_v58 = vpop.f32.mrf.mxu0 }
 0xe35   : > { %v6533_v60 = vpop.f32.mrf.mxu0 }
 0xe3b   : > { %v3251_v62 = vpop.f32.mrf.mxu0 }
 0xe3c   : > { %v3255_v63 = vsel %vm2734_vm5, %v3251_v62, -inf }
 0xe3d   : > { %3256 = vmax.xlane.f32.xlu1 %v3255_v63  ;;  %v6540_v1 = vpop.f32.mrf.mxu0  ;;  %v6162_v63 = vld [vmem:[%s8596_s10] ss:$0 sm:$0xff]  ;;  %s8598_s10 = sld [smem:[#allocation40_spill]] }
 0xe4e   : > { %3266 = vrot.lane.b32.xlu1 %v7934_v61, %s8496_s11 }
 0xe52   : > { %3347 = vrot.lane.b32.xlu1 %v2996_v38, %s8586_s6  ;;  %v3566_v38 = vld [vmem:[%s8592_s1 + $0x30] sm:$0xff]  ;;  %s8603_s1 = smov 120  }
 0xec6   : > { %v3257_v2 = vpop.xlane.xlu1 %3256 }
 0xec7   : > { %v3258_v3 = vsub.f32 %v3251_v62, %v3257_v2 }
 0xec9   : > { %v3259_v4 = vmul.f32 1.442695, %v3258_v3 }
 0xeca   : > { %v3267_v8 = vpop.permute.xlu1 %3266 }
 0xecb   : > { %6990 = vpow2.f32 %v3259_v4 }
 0xece   : > { %v3348_v17 = vpop.permute.xlu1 %3347 }
 0xecf   : > { %v3358_v19 = vsel %vm1691_vm3, %v7997_v36, %v3348_v17  ;;  %v3475_v36 = vld [vmem:[%s8591_s4] sm:$0xff] }
 0xed8   : > { %v6991_v5 = vpop.eup %6990 }
 0xed9   : > { %v3261_v6 = vsel %vm2734_vm5, %v6991_v5, 0.0 }
 0xeda   : > { %3262 = vadd.xlane.f32.xlu0 %v3261_v6 }
 0xef0   : > { %3268 = vrot.lane.b32.xlu0 %v7928_v59, %s8496_s11  ;;  %v3364_v59 = vld [vmem:[%s8587_s2 + $0x18] sm:$0xff]  ;;  %s8590_s11 = smov 24   ;;  %s8604_s2 = smov 104  }
 0xef4   : > { %3351 = vrot.lane.b32.xlu0 %v3169_v58, %s8588_s22 }
 0xf63   : > { %v3263_v7 = vpop.xlane.xlu0 %3262 }
 0xf64   : > { %6992 = vrcp.f32 %v3263_v7 }
 0xf67   : > { %v3269_v61 = vpop.permute.xlu0 %3268 }
 0xf68   : > { %6542 = vmatpush3.msk.msra.mxu1 %vm2754_vm6, %v3269_v61 }
 0xf69   : > { %6543 = vmatprep.subr.mxu1 %v7380_v0 }
 0xf6a   : > { %6544 = vmatpush3.msra.mxu1 %v3267_v8 }
 0xf6b   : > { %6548 = vmatprep.subr.mxu1 %v7380_v0  ;;  %v3352_v18 = vpop.permute.xlu0 %3351 }
 0xf6c   : > { %v3359_v20 = vsel %vm1526_vm1, %v3358_v19, %v3352_v18  ;;  %v6164_v18 = vld [vmem:[%s8598_s10] ss:$0 sm:$0xff]  ;;  %s8601_s10 = smov 96  }
 0xf71   : > { %v6993_v9 = vpop.eup %6992 }
 0xf72   : > { %v3265_v10 = vmul.f32 %v6993_v9, %v6991_v5 }
 0xf74   : > { %6546 = vmatmul.mubr.msk.f32.vlgmr.msra.gmra.mxu1 %vm2734_vm5, %v3265_v10  ;;  %v3682_v10 = vld [vmem:[%s8597_s18 + $0x18] sm:$0xff] }
 0xf75   : > { %6556 = vmatprep.mubr.msk.f32.mxu1 %vm7381_vm0, %v7380_v0  ;;  %6549 = vmatpush3.msra.mxu1 %v3364_v59  ;;  %v3681_v59 = vld [vmem:[%s8597_s18 + $0x10] sm:$0xff] }
 0xf76   : > { %6550 = vmatprep.subr.mxu1 %v7380_v0 }
 0xf77   : > { %6551 = vmatpush3.msra.mxu1 %v3363_v11  ;;  %v3680_v11 = vld [vmem:[%s8597_s18 + $0x8] sm:$0xff] }
 0xf78   : > { %6552 = vmatprep.subr.mxu1 %v7380_v0 }
 0xf79   : > { %6553 = vmatpush3.msra.mxu1 %v3362_v13  ;;  %v3679_v13 = vld [vmem:[%s8597_s18] sm:$0xff] }
 0xf7a   : > { %6554 = vmatprep.subr.mxu1 %v7380_v0 }
 0xf7b   : > { %6555 = vmatpush3.msra.mxu1 %v3361_v14 }
 0xf7c   : > { %6570 = vmatprep.subr.mxu1 %v7380_v0 }
0x1034   : > { %v3342_v15 = vpop.f32.mrf.mxu1 }
0x1035   : > { %3355 = vrot.lane.b32.xlu1 %v3342_v15, %s8590_s11 }
0x1036   : > { %v6547_v16 = vpop.f32.mrf.mxu1 }
0x10a7   : > { %v3356_v21 = vpop.permute.xlu1 %3355 }
0x10a8   : > { %v3360_v22 = vsel %vm2362_vm4, %v3359_v20, %v3356_v21  ;;  %v6165_v20 = vld [vmem:[%s8599_s7] ss:$0 sm:$0xff]  ;;  %s8602_s7 = smov 112  }
0x10a9   : > { %6557 = vmatmul.mubr.msk.f32.vlgmr.msra.gmra.mxu1 %vm1614_vm2, %v3360_v22 }
0x10aa   : > { %6586 = vmatprep.mubr.msk.f32.mxu1 %vm7381_vm0, %v7380_v0  ;;  %6571 = vmatpush3.msra.mxu1 %v3567_v37 }
0x10ab   : > { %6572 = vmatprep.subr.mxu1 %v7380_v0 }
0x10ac   : > { %6573 = vmatpush3.msra.mxu1 %v3566_v38 }
0x10ad   : > { %6574 = vmatprep.subr.mxu1 %v7380_v0 }
0x10ae   : > { %6575 = vmatpush3.msra.mxu1 %v3565_v39 }
0x10af   : > { %6576 = vmatprep.subr.mxu1 %v7380_v0 }
0x10b0   : > { %6577 = vmatpush3.msra.mxu1 %v3564_v40 }
0x10b1   : > { %6578 = vmatprep.subr.mxu1 %v7380_v0 }
0x10b2   : > { %6579 = vmatpush3.msra.mxu1 %v3563_v12 }
0x10b3   : > { %6580 = vmatprep.subr.mxu1 %v7380_v0 }
0x10b4   : > { %6581 = vmatpush3.msra.mxu1 %v3562_v52 }
0x10b5   : > { %6582 = vmatprep.subr.mxu1 %v7380_v0 }
0x10b6   : > { %6583 = vmatpush3.msra.mxu1 %v3561_v53 }
0x10b7   : > { %6584 = vmatprep.subr.mxu1 %v7380_v0 }
0x10b8   : > { %6585 = vmatpush3.msra.mxu1 %v3560_v54 }
0x10b9   : > { %6610 = vmatprep.subr.mxu1 %v7380_v0 }
0x1169   : > { %v3441_v24 = vpop.f32.mrf.mxu1 }
0x116a   : > { %v3442_v25 = vadd.f32 %v6156_v23, %v3441_v24  ;;  %v6166_v23 = vld [vmem:[%s8600_s26] ss:$0 sm:$0xff]  ;;  %s8605_s26 = smov 80  }
0x116b   : > { %v6558_v26 = vpop.f32.mrf.mxu1 }
0x116c   : > { %v3445_v27 = vadd.f32 %v3442_v25, %v7921_v56  ;;  %v3476_v56 = vld [vmem:[%s8591_s4 + $0x8] sm:$0xff]  ;;  %s8609_s4 = smov 48  }
0x116d   : > { %6564 = vmatpush3.msra.mxu0 %v3476_v56 }
0x116e   : > { %v3448_v28 = vsel %vm1614_vm2, %v3445_v27, 0.0  ;;  %6565 = vmatprep.subr.mxu0 %v7380_v0 }
0x116f   : > { %3449 = vadd.xlane.f32.xlu0 %v3448_v28  ;;  %6566 = vmatpush3.msra.mxu0 %v3475_v36 }
0x1170   : > { %6589 = vmatprep.subr.mxu0 %v7380_v0 }
0x11f8   : > { %v3450_v29 = vpop.xlane.xlu0 %3449 }
0x11f9   : > { %v3451_v30 = vmul.f32 0.03125, %v3450_v29 }
0x11fb   : > { %v3452_v31 = vsub.f32 %v3445_v27, %v3451_v30 }
0x11fd   : > { %v3453_v32 = vmul.f32 %v3452_v31, %v3452_v31 }
0x11ff   : > { %v3454_v33 = vsel %vm1614_vm2, %v3453_v32, 0.0 }
0x1200   : > { %3455 = vadd.xlane.f32.xlu1 %v3454_v33 }
0x1289   : > { %v3456_v41 = vpop.xlane.xlu1 %3455 }
0x128a   : > { %v3457_v44 = vmul.f32 0.03125, %v3456_v41 }
0x128c   : > { %v3458_v45 = vadd.f32 1e-05, %v3457_v44 }
0x128e   : > { %6994 = vrsqrt.f32 %v3458_v45 }
0x129b   : > { %v6995_v46 = vpop.eup %6994 }
0x129c   : > { %v3460_v48 = vmul.f32 %v6995_v46, %v3452_v31 }
0x129e   : > { %v3467_v50 = vmul.f32 %v6158_v47, %v3460_v48 }
0x12a0   : > { %v3474_v51 = vadd.f32 %v6159_v49, %v3467_v50 }
0x12a2   : > { %6568 = vmatmul.mubr.msk.f32.vlgmr.msra.gmra.mxu0 %vm1614_vm2, %v3474_v51 }
0x12a3   : > { %6597 = vmatprep.mubr.msk.f32.mxu0 %vm7381_vm0, %v7380_v0  ;;  %6590 = vmatpush3.msra.mxu0 %v3682_v10 }
0x12a4   : > { %6591 = vmatprep.subr.mxu0 %v7380_v0 }
0x12a5   : > { %6592 = vmatpush3.msra.mxu0 %v3681_v59 }
0x12a6   : > { %6593 = vmatprep.subr.mxu0 %v7380_v0 }
0x12a7   : > { %6594 = vmatpush3.msra.mxu0 %v3680_v11 }
0x12a8   : > { %6595 = vmatprep.subr.mxu0 %v7380_v0 }
0x12a9   : > { %6596 = vmatpush3.msra.mxu0 %v3679_v13 }
0x12aa   : > { %6600 = vmatprep.subr.mxu0 %v7380_v0 }
0x1362   : > { %v3555_v57 = vpop.f32.mrf.mxu0 }
0x1363   : > { %v3556_v58 = vadd.f32 %v6160_v55, %v3555_v57 }
0x1364   : > { %v6569_v60 = vpop.f32.mrf.mxu0 }
0x1365   : > { %v3559_v62 = vmax.f32 %v3556_v58, 0.0 }
0x1367   : > { %6587 = vmatmul.mubr.msk.f32.vlgmr.msra.gmra.mxu1 %vm3575_vm7, %v3559_v62 }
0x1368   : > { %6612 = vmatprep.mubr.msk.f32.mxu1 %vm7381_vm0, %v7380_v0 }
0x1427   : > { %v3645_v1 = vpop.f32.mrf.mxu1 }
0x1428   : > { %v3646_v2 = vadd.f32 %v6162_v63, %v3645_v1 }
0x1429   : > { %v6588_v3 = vpop.f32.mrf.mxu1 }
0x142a   : > { %v3649_v4 = vadd.f32 %v3646_v2, %v3474_v51 }
0x142c   : > { %v3652_v5 = vsel %vm1614_vm2, %v3649_v4, 0.0 }
0x142d   : > { %3653 = vadd.xlane.f32.xlu0 %v3652_v5 }
0x14b6   : > { %v3654_v6 = vpop.xlane.xlu0 %3653 }
0x14b7   : > { %v3655_v7 = vmul.f32 0.03125, %v3654_v6 }
0x14b9   : > { %v3656_v61 = vsub.f32 %v3649_v4, %v3655_v7 }
0x14bb   : > { %v3657_v8 = vmul.f32 %v3656_v61, %v3656_v61 }
0x14bd   : > { %v3658_v9 = vsel %vm1614_vm2, %v3657_v8, 0.0 }
0x14be   : > { %3659 = vadd.xlane.f32.xlu0 %v3658_v9 }
0x1547   : > { %v3660_v14 = vpop.xlane.xlu0 %3659 }
0x1548   : > { %v3661_v15 = vmul.f32 0.03125, %v3660_v14 }
0x154a   : > { %v3662_v16 = vadd.f32 1e-05, %v3661_v15 }
0x154c   : > { %6996 = vrsqrt.f32 %v3662_v16 }
0x1559   : > { %v6997_v17 = vpop.eup %6996 }
0x155a   : > { %v3664_v19 = vmul.f32 %v6997_v17, %v3656_v61 }
0x155c   : > { %v3671_v21 = vmul.f32 %v6164_v18, %v3664_v19 }
0x155e   : > { %v8102_v22 = vadd.f32 %v6165_v20, %v3671_v21 }
0x1560   : > { %6598 = vmatmul.mubr.msk.f32.vlgmr.msra.gmra.mxu0 %vm1614_vm2, %v8102_v22 }
0x1561   : > { %6602 = vmatprep.mubr.msk.f32.mxu0 %vm7381_vm0, %v7380_v0 }
0x1620   : > { %v3759_v24 = vpop.f32.mrf.mxu0 }
0x1621   : > { %v8109_v25 = vadd.f32 %v6166_v23, %v3759_v24 }
0x1622   : > { %v6599_v26 = vpop.f32.mrf.mxu0 }
0x1623   : > { %3929 = vrot.lane.b32.xlu0 %v8109_v25, %s8510_s28  ;;  %3764 = vrot.lane.b32.xlu1 %v8109_v25, %s8601_s10  ;;  %s8607_s28 = smov 56  }
0x1627   : > { %4092 = vrot.lane.b32.xlu0 %v8109_v25, %s8602_s7  ;;  %3927 = vrot.lane.b32.xlu1 %v8109_v25, %s8603_s1 }
0x162b   : > { %4257 = vrot.lane.b32.xlu0 %v8109_v25, %s8604_s2  ;;  %4094 = vrot.lane.b32.xlu1 %v8109_v25, %s8605_s26 }
0x162f   : > { %4259 = vrot.lane.b32.xlu1 %v8109_v25, %s8606_s3 }
0x1695   : > { %v3930_v27 = vpop.permute.xlu0 %3929  ;;  %v3765_v28 = vpop.permute.xlu1 %3764 }
0x1696   : > { %6601 = vmatpush3.xpose.msk.msra.mxu0 %vm1691_vm3, %v3765_v28  ;;  %6611 = vmatpush3.xpose.msk.msra.mxu1 %vm1691_vm3, %v3930_v27 }
0x1697   : > { %6620 = vmatprep.subr.mxu1 %v7380_v0  ;;  %6605 = vmatprep.subr.mxu0 %v7380_v0 }
0x1699   : > { %6603 = vmatmul.mubr.msk.f32.vlgmr.msra.gmra.mxu0 %vm1691_vm3, %v8109_v25  ;;  %v3928_v29 = vpop.permute.xlu1 %3927  ;;  %v4093_v31 = vpop.permute.xlu0 %4092 }
0x169a   : > { %6613 = vmatmul.mubr.msk.f32.vlgmr.msra.gmra.mxu1 %vm1691_vm3, %v3928_v29  ;;  %6607 = vmatprep.mubr.msk.f32.mxu0 %vm7381_vm0, %v7380_v0 }
0x169b   : > { %6622 = vmatprep.mubr.msk.f32.mxu1 %vm7381_vm0, %v7380_v0 }
0x169d   : > { %v4095_v30 = vpop.permute.xlu1 %4094  ;;  %v4258_v33 = vpop.permute.xlu0 %4257 }
0x169e   : > { %6621 = vmatpush3.xpose.msk.msra.mxu1 %vm1691_vm3, %v4095_v30 }
0x169f   : > { %6630 = vmatprep.subr.mxu1 %v7380_v0 }
0x16a1   : > { %6623 = vmatmul.mubr.msk.f32.vlgmr.msra.gmra.mxu1 %vm1691_vm3, %v4093_v31  ;;  %v4260_v32 = vpop.permute.xlu1 %4259 }
0x16a2   : > { %6631 = vmatpush3.xpose.msk.msra.mxu1 %vm1691_vm3, %v4260_v32  ;;  %6632 = vmatprep.mubr.msk.f32.mxu1 %vm7381_vm0, %v7380_v0 }
0x16a3   : > { %6640 = vmatprep.subr.mxu1 %v7380_v0 }
0x16a5   : > { %6633 = vmatmul.mubr.msk.f32.vlgmr.msra.gmra.mxu1 %vm1691_vm3, %v4258_v33 }
0x16a6   : > { %6648 = vmatprep.mubr.msk.f32.mxu1 %vm7381_vm0, %v7380_v0 }
0x1759   : > { %v3836_v34 = vpop.f32.mrf.mxu0 }
0x175a   : > { %v4001_v35 = vpop.f32.mrf.mxu1  ;;  %v3840_v56 = vsel %vm1691_vm3, %v3836_v34, -inf }
0x175b   : > { %3841 = vmax.xlane.f32.xlu1 %v3840_v56  ;;  %v6604_v36 = vpop.f32.mrf.mxu0  ;;  %v4005_v37 = vsel %vm1691_vm3, %v4001_v35, -inf }
0x175c   : > { %4006 = vmax.xlane.f32.xlu0 %v4005_v37  ;;  %v6614_v38 = vpop.f32.mrf.mxu1 }
0x1761   : > { %v4166_v39 = vpop.f32.mrf.mxu1 }
0x1762   : > { %v4170_v40 = vsel %vm1691_vm3, %v4166_v39, -inf }
0x1763   : > { %4171 = vmax.xlane.f32.xlu0 %v4170_v40  ;;  %v6624_v12 = vpop.f32.mrf.mxu1 }
0x1765   : > { %v4331_v41 = vpop.f32.mrf.mxu1 }
0x1766   : > { %v4335_v44 = vsel %vm1691_vm3, %v4331_v41, -inf }
0x1767   : > { %v6634_v45 = vpop.f32.mrf.mxu1  ;;  %4336 = vmax.xlane.f32.xlu1 %v4335_v44 }
0x1778   : > { %4016 = vrot.lane.b32.xlu1 %v8109_v25, %s8607_s28  ;;  %s8608_s28 = smov 64  }
0x17e4   : > { %v3842_v46 = vpop.xlane.xlu1 %3841 }
0x17e5   : > { %v3843_v47 = vsub.f32 %v3836_v34, %v3842_v46  ;;  %v4007_v48 = vpop.xlane.xlu0 %4006 }
0x17e6   : > { %v4008_v49 = vsub.f32 %v4001_v35, %v4007_v48 }
0x17e7   : > { %v3844_v50 = vmul.f32 1.442695, %v3843_v47 }
0x17e8   : > { %v4009_v51 = vmul.f32 1.442695, %v4008_v49 }
0x17e9   : > { %6998 = vpow2.f32 %v3844_v50 }
0x17ea   : > { %7000 = vpow2.f32 %v4009_v51 }
0x17ec   : > { %v4172_v1 = vpop.xlane.xlu0 %4171 }
0x17ed   : > { %v4173_v2 = vsub.f32 %v4166_v39, %v4172_v1 }
0x17ef   : > { %v4174_v3 = vmul.f32 1.442695, %v4173_v2 }
0x17f0   : > { %v4337_v52 = vpop.xlane.xlu1 %4336 }
0x17f1   : > { %v4338_v53 = vsub.f32 %v4331_v41, %v4337_v52 }
0x17f3   : > { %v4339_v54 = vmul.f32 1.442695, %v4338_v53  ;;  %v4554_v53 = vld [vmem:[%s8615_s8 + $0x18] sm:$0xff] }
0x17f4   : > { %v4017_v6 = vpop.permute.xlu1 %4016 }
0x17f5   : > { %7002 = vpow2.f32 %v4339_v54  ;;  %v4553_v54 = vld [vmem:[%s8615_s8 + $0x10] sm:$0xff] }
0x17f6   : > { %v6999_v55 = vpop.eup %6998  ;;  %7004 = vpow2.f32 %v4174_v3 }
0x17f7   : > { %v7001_v57 = vpop.eup %7000  ;;  %v3846_v58 = vsel %vm1691_vm3, %v6999_v55, 0.0 }
0x17f8   : > { %3847 = vadd.xlane.f32.xlu0 %v3846_v58  ;;  %v4011_v60 = vsel %vm1691_vm3, %v7001_v57, 0.0 }
0x17f9   : > { %4012 = vadd.xlane.f32.xlu1 %v4011_v60 }
0x1802   : > { %v7003_v62 = vpop.eup %7002 }
0x1803   : > { %v4341_v63 = vsel %vm1691_vm3, %v7003_v62, 0.0  ;;  %v7005_v4 = vpop.eup %7004 }
0x1804   : > { %4342 = vadd.xlane.f32.xlu1 %v4341_v63  ;;  %v4176_v5 = vsel %vm1691_vm3, %v7005_v4, 0.0 }
0x180e   : > { %3851 = vrot.lane.b32.xlu0 %v8109_v25, %s8608_s28  ;;  %s8613_s28 = sld [smem:[#allocation50_spill]] }
0x1815   : > { %4181 = vrot.lane.b32.xlu1 %v8109_v25, %s8609_s4  ;;  %s8612_s4 = sld [smem:[#allocation45_spill]] }
0x181b   : > { %v6180_v39 = vld [vmem:[%s8612_s4] ss:$0 sm:$0xff]  ;;  %s8616_s4 = sld [smem:[#allocation46_spill]] }
0x1821   : > { %v6182_v63 = vld [vmem:[%s8616_s4] ss:$0 sm:$0xff]  ;;  %s6232_s4 = sshll.u32 %s7665_s0, 9 }
0x182d   : > { %4177 = vadd.xlane.f32.xlu0 %v4176_v5 }
0x1843   : > { %4346 = vrot.lane.b32.xlu0 %v8109_v25, %s8610_s5  ;;  %s8611_s5 = sld [smem:[#allocation44_spill]] }
0x1849   : > { %v4440_v21 = vld [vmem:[%s8611_s5 + $0x18] sm:$0xff]  ;;  %v4439_v27 = vld [vmem:[%s8611_s5 + $0x10] sm:$0xff]  ;;  %v4438_v28 = vld [vmem:[%s8611_s5 + $0x8] sm:$0xff] }
0x184a   : > { %6641 = vmatpush3.msra.mxu1 %v4440_v21  ;;  %v4437_v29 = vld [vmem:[%s8611_s5] sm:$0xff]  ;;  %s8614_s5 = smov %s8613_s28 }
0x184b   : > { %6642 = vmatprep.subr.mxu1 %v7380_v0  ;;  %v4637_v51 = vld [vmem:[%s8614_s5 + $0x10] sm:$0xff]  ;;  %v4635_v52 = vld [vmem:[%s8614_s5] sm:$0xff] }
0x184c   : > { %6643 = vmatpush3.msra.mxu1 %v4439_v27 }
0x184d   : > { %6644 = vmatprep.subr.mxu1 %v7380_v0 }
0x184e   : > { %6645 = vmatpush3.msra.mxu1 %v4438_v28 }
0x184f   : > { %6646 = vmatprep.subr.mxu1 %v7380_v0 }
0x1850   : > { %6647 = vmatpush3.msra.mxu1 %v4437_v29 }
0x1881   : > { %v3848_v7 = vpop.xlane.xlu0 %3847 }
0x1882   : > { %7006 = vrcp.f32 %v3848_v7  ;;  %v4013_v61 = vpop.xlane.xlu1 %4012 }
0x1883   : > { %7008 = vrcp.f32 %v4013_v61 }
0x1885   : > { %v3852_v8 = vpop.permute.xlu0 %3851 }
0x1886   : > { %6606 = vmatpush3.msra.mxu0 %v3852_v8 }
0x1887   : > { %6615 = vmatprep.subr.mxu0 %v7380_v0 }
0x188d   : > { %v4343_v10 = vpop.xlane.xlu1 %4342 }
0x188f   : > { %v7007_v9 = vpop.eup %7006 }
0x1890   : > { %v3850_v59 = vmul.f32 %v7007_v9, %v6999_v55  ;;  %v7009_v11 = vpop.eup %7008  ;;  %v4552_v55 = vld [vmem:[%s8615_s8 + $0x8] sm:$0xff]  ;;  %v6184_v9 = vld [vmem:[%s8619_s9] ss:$0 sm:$0xff]  ;;  %s8620_s9 = smov 88  }
0x1891   : > { %v4015_v13 = vmul.f32 %v7009_v11, %v7001_v57  ;;  %v4182_v14 = vpop.permute.xlu1 %4181  ;;  %v4551_v57 = vld [vmem:[%s8615_s8] sm:$0xff] }
0x1892   : > { %6608 = vmatmul.mubr.msk.f32.vlgmr.msra.gmra.mxu0 %vm1691_vm3, %v3850_v59 }
0x1893   : > { %6616 = vmatpush3.msra.mxu0 %v4017_v6  ;;  %6617 = vmatprep.mubr.msk.f32.mxu0 %vm7381_vm0, %v7380_v0 }
0x1894   : > { %6625 = vmatprep.subr.mxu0 %v7380_v0 }
0x1896   : > { %6618 = vmatmul.mubr.msk.f32.vlgmr.msra.gmra.mxu0 %vm1691_vm3, %v4015_v13 }
0x1897   : > { %6626 = vmatpush3.msra.mxu0 %v4182_v14  ;;  %6627 = vmatprep.mubr.msk.f32.mxu0 %vm7381_vm0, %v7380_v0 }
0x1898   : > { %6635 = vmatprep.subr.mxu0 %v7380_v0 }
0x18b6   : > { %v4178_v15 = vpop.xlane.xlu0 %4177 }
0x18b7   : > { %7010 = vrcp.f32 %v4178_v15 }
0x18b8   : > { %7012 = vrcp.f32 %v4343_v10 }
0x18ba   : > { %v4347_v19 = vpop.permute.xlu0 %4346 }
0x18c4   : > { %v7011_v16 = vpop.eup %7010 }
0x18c5   : > { %v4180_v17 = vmul.f32 %v7011_v16, %v7005_v4  ;;  %v7013_v18 = vpop.eup %7012 }
0x18c6   : > { %v4345_v20 = vmul.f32 %v7013_v18, %v7003_v62 }
0x18c7   : > { %6628 = vmatmul.mubr.msk.f32.vlgmr.msra.gmra.mxu0 %vm1691_vm3, %v4180_v17 }
0x18c8   : > { %6636 = vmatpush3.msra.mxu0 %v4347_v19  ;;  %6637 = vmatprep.mubr.msk.f32.mxu0 %vm7381_vm0, %v7380_v0 }
0x18c9   : > { %6651 = vmatprep.subr.mxu0 %v7380_v0 }
0x18cb   : > { %6638 = vmatmul.mubr.msk.f32.vlgmr.msra.gmra.mxu0 %vm1691_vm3, %v4345_v20 }
0x18cc   : > { %6659 = vmatprep.mubr.msk.f32.mxu0 %vm7381_vm0, %v7380_v0  ;;  %6652 = vmatpush3.msra.mxu0 %v4554_v53 }
0x18cd   : > { %6653 = vmatprep.subr.mxu0 %v7380_v0 }
0x18ce   : > { %6654 = vmatpush3.msra.mxu0 %v4553_v54 }
0x18cf   : > { %6655 = vmatprep.subr.mxu0 %v7380_v0 }
0x18d0   : > { %6656 = vmatpush3.msra.mxu0 %v4552_v55 }
0x18d1   : > { %6657 = vmatprep.subr.mxu0 %v7380_v0 }
0x18d2   : > { %6658 = vmatpush3.msra.mxu0 %v4551_v57 }
0x18d3   : > { %6673 = vmatprep.subr.mxu0 %v7380_v0 }
0x1952   : > { %v3923_v23 = vpop.f32.mrf.mxu0 }
0x1954   : > { %v6609_v24 = vpop.f32.mrf.mxu0 }
0x1956   : > { %v4088_v25 = vpop.f32.mrf.mxu0 }
0x1957   : > { %4423 = vrot.lane.b32.xlu1 %v4088_v25, %s8586_s6 }
0x1958   : > { %v6619_v26 = vpop.f32.mrf.mxu0 }
0x1987   : > { %v4253_v30 = vpop.f32.mrf.mxu0 }
0x1988   : > { %4427 = vrot.lane.b32.xlu0 %v4253_v30, %s8588_s22 }
0x1989   : > { %v6629_v31 = vpop.f32.mrf.mxu0 }
0x198b   : > { %v4418_v32 = vpop.f32.mrf.mxu0 }
0x198c   : > { %4431 = vrot.lane.b32.xlu1 %v4418_v32, %s8590_s11 }
0x198d   : > { %v6639_v33 = vpop.f32.mrf.mxu0 }
0x19c9   : > { %v4424_v34 = vpop.permute.xlu1 %4423 }
0x19ca   : > { %v4434_v56 = vsel %vm1691_vm3, %v3923_v23, %v4424_v34 }
0x19fa   : > { %v4428_v35 = vpop.permute.xlu0 %4427 }
0x19fb   : > { %v4435_v36 = vsel %vm1526_vm1, %v4434_v56, %v4428_v35 }
0x19fe   : > { %v4432_v37 = vpop.permute.xlu1 %4431 }
0x19ff   : > { %v4436_v38 = vsel %vm2362_vm4, %v4435_v36, %v4432_v37 }
0x1a00   : > { %6649 = vmatmul.mubr.msk.f32.vlgmr.msra.gmra.mxu1 %vm1614_vm2, %v4436_v38 }
0x1a01   : > { %6670 = vmatprep.mubr.msk.f32.mxu1 %vm1614_vm2, %v7900_v42  ;;  %v4638_v42 = vld [vmem:[%s8613_s28 + $0x18] sm:$0xff]  ;;  %s8617_s28 = sld [smem:[#allocation47_spill]] }
0x1a02   : > { %6662 = vmatprep.subr.mxu1 %v4638_v42 }
0x1a03   : > { %6663 = vmatpush3.msra.mxu1 %v4638_v42 }
0x1a04   : > { %6664 = vmatprep.subr.mxu1 %v4637_v51 }
0x1a05   : > { %6665 = vmatpush3.msra.mxu1 %v4637_v51 }
0x1a07   : > { %v6183_v2 = vld [vmem:[%s8617_s28] ss:$0 sm:$0xff]  ;;  %s8408_s28 = scalar_lea.hbm %s7642_s13, %s6232_s4 }
0x1ac0   : > { %v4517_v40 = vpop.f32.mrf.mxu1 }
0x1ac1   : > { %v4518_v12 = vadd.f32 %v6180_v39, %v4517_v40 }
0x1ac2   : > { %v6650_v41 = vpop.f32.mrf.mxu1 }
0x1ac3   : > { %v4521_v44 = vadd.f32 %v4518_v12, %v8102_v22  ;;  %v4636_v22 = vld [vmem:[%s8614_s5 + $0x8] sm:$0xff]  ;;  %s8618_s5 = sld [smem:[#allocation51_spill]] }
0x1ac4   : > { %6666 = vmatprep.subr.mxu1 %v4636_v22 }
0x1ac5   : > { %v4524_v45 = vsel %vm1614_vm2, %v4521_v44, 0.0  ;;  %6667 = vmatpush3.msra.mxu1 %v4636_v22 }
0x1ac6   : > { %4525 = vadd.xlane.f32.xlu0 %v4524_v45  ;;  %6668 = vmatprep.subr.mxu1 %v4635_v52 }
0x1ac7   : > { %6669 = vmatpush3.msra.mxu1 %v4635_v52 }
0x1ac8   : > { %6671 = vmatmul.mubr.msk.f32.vlgmr.msra.gmra.mxu1 %vm1614_vm2, %v7902_v43  ;;  %6680 = vmatprep.subr.mxu1 %v7380_v0 }
0x1ac9   : > { %6684 = vmatprep.mubr.msk.f32.mxu1 %vm7381_vm0, %v7380_v0  ;;  %v6186_v5 = vld [vmem:[%s8618_s5] ss:$0 sm:$0xff] }
0x1b4f   : > { %v4526_v46 = vpop.xlane.xlu0 %4525 }
0x1b50   : > { %v4527_v47 = vmul.f32 0.03125, %v4526_v46 }
0x1b52   : > { %v4528_v48 = vsub.f32 %v4521_v44, %v4527_v47 }
0x1b54   : > { %v4529_v49 = vmul.f32 %v4528_v48, %v4528_v48 }
0x1b56   : > { %v4530_v50 = vsel %vm1614_vm2, %v4529_v49, 0.0 }
0x1b57   : > { %4531 = vadd.xlane.f32.xlu1 %v4530_v50 }
0x1b88   : > { %v6672_v6 = vpop.f32.mrf.mxu1 }
0x1b89   : > { %v8224_v7 = vadd.f32 %v6672_v6, %v6186_v5 }
0x1b8a   : > { %v4712_v61 = vpop.f32.mrf.mxu1 }
0x1b8b   : > { %4895 = vrot.lane.b32.xlu0 %v8224_v7, %s8603_s1  ;;  %v8230_v8 = vadd.f32 %v6186_v5, %v4712_v61 }
0x1b8d   : > { %4893 = vrot.lane.b32.xlu1 %v8230_v8, %s8603_s1 }
0x1be0   : > { %v4532_v43 = vpop.xlane.xlu1 %4531 }
0x1be1   : > { %v4533_v58 = vmul.f32 0.03125, %v4532_v43 }
0x1be3   : > { %v4534_v60 = vadd.f32 1e-05, %v4533_v58 }
0x1be5   : > { %7014 = vrsqrt.f32 %v4534_v60 }
0x1bf2   : > { %v7015_v62 = vpop.eup %7014 }
0x1bf3   : > { %v4536_v1 = vmul.f32 %v7015_v62, %v4528_v48 }
0x1bf5   : > { %v4543_v3 = vmul.f32 %v6182_v63, %v4536_v1 }
0x1bf7   : > { %v8217_v4 = vadd.f32 %v6183_v2, %v4543_v3 }
0x1bf9   : > { %6660 = vmatmul.mubr.msk.f32.vlgmr.msra.gmra.mxu0 %vm1614_vm2, %v8217_v4 }
0x1bfa   : > { %6677 = vmatprep.mubr.msk.f32.mxu0 %vm7381_vm0, %v7380_v0  ;;  %6674 = vmatpush3.xpose.msk.msra.mxu0 %vm1691_vm3, %v8224_v7 }
0x1bfb   : > { %6675 = vmatprep.subr.mxu0 %v7380_v0 }
0x1bfd   : > { %v4896_v11 = vpop.permute.xlu0 %4895 }
0x1bfe   : > { %6676 = vmatpush3.xpose.msk.msra.mxu0 %vm1691_vm3, %v8230_v8 }
0x1bff   : > { %6687 = vmatprep.subr.mxu0 %v7380_v0  ;;  %v4894_v14 = vpop.permute.xlu1 %4893 }
0x1cb9   : > { %v4631_v10 = vpop.f32.mrf.mxu0 }
0x1cba   : > { %v8239_v59 = vadd.f32 %v6184_v9, %v4631_v10 }
0x1cbb   : > { %v6661_v13 = vpop.f32.mrf.mxu0 }
0x1cbc   : > { %4891 = vrot.lane.b32.xlu0 %v8239_v59, %s8603_s1  ;;  %6678 = vmatmul.mubr.msk.f32.vlgmr.msra.gmra.mxu0 %vm1691_vm3, %v8239_v59  ;;  %s8278_s1 = sand.u32 1, %s7316_s23  }
0x1cbd   : > { %6688 = vmatpush3.xpose.msk.msra.mxu0 %vm1691_vm3, %v4896_v11  ;;  %6691 = vmatprep.mubr.msk.f32.mxu0 %vm7381_vm0, %v7380_v0 }
0x1cbe   : > { %6689 = vmatprep.subr.mxu0 %v7380_v0 }
0x1cc1   : > { %6690 = vmatpush3.xpose.msk.msra.mxu0 %vm1691_vm3, %v4894_v14 }
0x1cc2   : > { %6708 = vmatprep.subr.mxu0 %v7380_v0 }
0x1d2e   : > { %v4892_v15 = vpop.permute.xlu0 %4891 }
0x1d2f   : > { %6692 = vmatmul.mubr.msk.f32.vlgmr.msra.gmra.mxu0 %vm1691_vm3, %v4892_v15 }
0x1d30   : > { %6712 = vmatprep.mubr.msk.f32.mxu0 %vm7381_vm0, %v7380_v0 }
0x1d7c   : > { %v4796_v16 = vpop.f32.mrf.mxu0 }
0x1d7d   : > { %v4800_v17 = vsel %vm2734_vm5, %v4796_v16, -inf }
0x1d7e   : > { %4801 = vmax.xlane.f32.xlu1 %v4800_v17  ;;  %v6679_v18 = vpop.f32.mrf.mxu0 }
0x1d8f   : > { %4811 = vrot.lane.b32.xlu1 %v8230_v8, %s8601_s10 }
0x1d93   : > { %4986 = vrot.lane.b32.xlu1 %v8224_v7, %s8620_s9 }
0x1d97   : > { %5068 = vrot.lane.b32.xlu1 %v8224_v7, %s8602_s7 }
0x1def   : > { %v4969_v19 = vpop.f32.mrf.mxu0 }
0x1df0   : > { %v4973_v20 = vsel %vm2734_vm5, %v4969_v19, -inf }
0x1df1   : > { %4974 = vmax.xlane.f32.xlu0 %v4973_v20  ;;  %v6693_v21 = vpop.f32.mrf.mxu0 }
0x1e07   : > { %4813 = vrot.lane.b32.xlu0 %v8224_v7, %s8601_s10  ;;  %v4802_v23 = vpop.xlane.xlu1 %4801  ;;  %s6108_s10 = sshll.u32 %s8278_s1, 5 }
0x1e08   : > { %v4803_v24 = vsub.f32 %v4796_v16, %v4802_v23  ;;  %s8282_s5 = scalar_lea.vmem [#allocation15], %s6108_s10 }
0x1e0a   : > { %v4804_v25 = vmul.f32 1.442695, %v4803_v24 }
0x1e0b   : > { %v4812_v32 = vpop.permute.xlu1 %4811 }
0x1e0c   : > { %7016 = vpow2.f32 %v4804_v25 }
0x1e0f   : > { %v4987_v37 = vpop.permute.xlu1 %4986 }
0x1e13   : > { %v5069_v39 = vpop.permute.xlu1 %5068 }
0x1e19   : > { %v7017_v26 = vpop.eup %7016 }
0x1e1a   : > { %v4806_v27 = vsel %vm2734_vm5, %v7017_v26, 0.0 }
0x1e26   : > { %4807 = vadd.xlane.f32.xlu0 %v4806_v27 }
0x1e3c   : > { %4984 = vrot.lane.b32.xlu0 %v8230_v8, %s8620_s9  ;;  %s5841_s9 = scalar_lea.sflag [#allocation16], %s8278_s1 }
0x1e40   : > { %5066 = vrot.lane.b32.xlu0 %v8230_v8, %s8602_s7 }
0x1e7a   : > { %v4975_v28 = vpop.xlane.xlu0 %4974 }
0x1e7b   : > { %v4976_v29 = vsub.f32 %v4969_v19, %v4975_v28 }
0x1e7d   : > { %v4977_v30 = vmul.f32 1.442695, %v4976_v29 }
0x1e7e   : > { %v4814_v31 = vpop.permute.xlu0 %4813 }
0x1e7f   : > { %7018 = vpow2.f32 %v4977_v30  ;;  %6681 = vmatpush3.msk.msra.mxu1 %vm2754_vm6, %v4814_v31 }
0x1e80   : > { %6682 = vmatprep.subr.mxu1 %v7380_v0 }
0x1e81   : > { %6683 = vmatpush3.msra.mxu1 %v4812_v32 }
0x1e82   : > { %6694 = vmatprep.subr.mxu1 %v7380_v0 }
0x1e8c   : > { %v7019_v33 = vpop.eup %7018 }
0x1e8d   : > { %v4979_v34 = vsel %vm2734_vm5, %v7019_v33, 0.0 }
0x1e8e   : > { %4980 = vadd.xlane.f32.xlu1 %v4979_v34 }
0x1e9f   : > { %5064 = vrot.lane.b32.xlu1 %v8239_v59, %s8602_s7 }
0x1ea3   : > { %5157 = vrot.lane.b32.xlu1 %v8230_v8, %s8605_s26 }
0x1eaf   : > { %v4808_v35 = vpop.xlane.xlu0 %4807 }
0x1eb0   : > { %7020 = vrcp.f32 %v4808_v35 }
0x1eb3   : > { %v4985_v38 = vpop.permute.xlu0 %4984 }
0x1eb7   : > { %v5067_v44 = vpop.permute.xlu0 %5066 }
0x1ebd   : > { %v7021_v56 = vpop.eup %7020 }
0x1ebe   : > { %v4810_v36 = vmul.f32 %v7021_v56, %v7017_v26 }
0x1ec0   : > { %6685 = vmatmul.mubr.msk.f32.vlgmr.msra.gmra.mxu1 %vm2734_vm5, %v4810_v36  ;;  %5425 = vst.msk [vmem:[%s8282_s5] sm:$0xff] %vm2734_vm5, %v4810_v36 }
0x1ec1   : > { %6695 = vmatpush3.msk.msra.mxu1 %vm2754_vm6, %v4987_v37  ;;  %6698 = vmatprep.mubr.msk.f32.mxu1 %vm7381_vm0, %v7380_v0 }
0x1ec2   : > { %6696 = vmatprep.subr.mxu1 %v7380_v0 }
0x1ec3   : > { %6697 = vmatpush3.msra.mxu1 %v4985_v38 }
0x1ec4   : > { %6701 = vmatprep.subr.mxu1 %v7380_v0 }
0x1f17   : > { %v4981_v40 = vpop.xlane.xlu1 %4980 }
0x1f18   : > { %7022 = vrcp.f32 %v4981_v40 }
0x1f1b   : > { %v5065_v45 = vpop.permute.xlu1 %5064 }
0x1f1f   : > { %v5158_v55 = vpop.permute.xlu1 %5157 }
0x1f25   : > { %v7023_v12 = vpop.eup %7022 }
0x1f26   : > { %v4983_v41 = vmul.f32 %v7023_v12, %v7019_v33 }
0x1f28   : > { %6699 = vmatmul.mubr.msk.f32.vlgmr.msra.gmra.mxu1 %vm2734_vm5, %v4983_v41  ;;  %6209 = vst.msk [vmem:[%s8282_s5 + $0x8] sm:$0xff] %vm2734_vm5, %v4983_v41 }
0x1f29   : > { %6702 = vmatpush3.xpose.msk.msra.mxu1 %vm1691_vm3, %v5069_v39  ;;  %6705 = vmatprep.mubr.msk.f32.mxu1 %vm7381_vm0, %v7380_v0 }
0x1f2a   : > { %6703 = vmatprep.subr.mxu1 %v7380_v0 }
0x1f2d   : > { %6704 = vmatpush3.xpose.msk.msra.mxu1 %vm1691_vm3, %v5067_v44 }
0x1f2e   : > { %6722 = vmatprep.subr.mxu1 %v7380_v0 }
0x1f30   : > { %6706 = vmatmul.mubr.msk.f32.vlgmr.msra.gmra.mxu1 %vm1691_vm3, %v5065_v45 }
0x1f31   : > { %6726 = vmatprep.mubr.msk.f32.mxu1 %vm7381_vm0, %v7380_v0 }
0x1f80   : > { %v8303_v46 = vpop.f32.mrf.mxu1 }
0x1f82   : > { %v6686_v47 = vpop.f32.mrf.mxu1 }
0x1fe8   : > { %v5060_v48 = vpop.f32.mrf.mxu1 }
0x1fea   : > { %v6700_v49 = vpop.f32.mrf.mxu1 }
0x1ff0   : > { %v5142_v50 = vpop.f32.mrf.mxu1 }
0x1ff1   : > { %v5146_v42 = vsel %vm2734_vm5, %v5142_v50, -inf }
0x1ff2   : > { %5147 = vmax.xlane.f32.xlu0 %v5146_v42  ;;  %v6707_v51 = vpop.f32.mrf.mxu1 }
0x2008   : > { %5159 = vrot.lane.b32.xlu0 %v8224_v7, %s8605_s26  ;;  %s5867_s26 = sshll.u32 %s8282_s5, 4  ;;  %s8405_s26 = int_to_ptr.vmem [resolvable:$true] %s5867_s26 }
0x2009   : > { %s7218_s10 = scalar_lea.vmem %s8405_s26, 512 }
0x200a   : > { %p7219_p7 = scmp.ne.s32.totalorder %s8405_s26, %s7218_s10 }
0x200c   : > { %5241 = vrot.lane.b32.xlu0 %v8224_v7, %s8604_s2  ;;  %p7220_p11 = pnand %p7219_p7, %p8626_p8 }
0x200e   : > { %p7221_p0 = pneg %p7220_p11 }
0x2010   : > { %5237 = vrot.lane.b32.xlu0 %v8239_v59, %s8604_s2 }
0x207b   : > { %v5148_v22 = vpop.xlane.xlu0 %5147 }
0x207c   : > { %v5149_v52 = vsub.f32 %v5142_v50, %v5148_v22 }
0x207e   : > { %v5150_v53 = vmul.f32 1.442695, %v5149_v52  ;;  %v6214_v52 = vld [vmem:[#allocation2] ss:$0 sm:$0xff] }
0x207f   : > { %v5160_v54 = vpop.permute.xlu0 %5159 }
0x2080   : > { %7024 = vpow2.f32 %v5150_v53  ;;  %6709 = vmatpush3.msk.msra.mxu0 %vm2754_vm6, %v5160_v54  ;;  %v6215_v54 = vld [vmem:[#allocation5] ss:$0 sm:$0xff] }
0x2081   : > { %6710 = vmatprep.subr.mxu0 %v7380_v0 }
0x2082   : > { %6711 = vmatpush3.msra.mxu0 %v5158_v55 }
0x2083   : > { %6715 = vmatprep.subr.mxu0 %v7380_v0  ;;  %v5242_v63 = vpop.permute.xlu0 %5241 }
0x2087   : > { %v5238_v2 = vpop.permute.xlu0 %5237 }
0x208d   : > { %v7025_v57 = vpop.eup %7024 }
0x208e   : > { %v5152_v43 = vsel %vm2734_vm5, %v7025_v57, 0.0 }
0x208f   : > { %5153 = vadd.xlane.f32.xlu1 %v5152_v43 }
0x20a0   : > { %5239 = vrot.lane.b32.xlu1 %v8230_v8, %s8604_s2  ;;  %s8621_s2 = sld [smem:[#allocation52_spill]] }
0x20a6   : > { %v5434_v19 = vld [vmem:[%s8621_s2 + $0x10] sm:$0xff]  ;;  %v5433_v20 = vld [vmem:[%s8621_s2 + $0x8] sm:$0xff]  ;;  %v5432_v21 = vld [vmem:[%s8621_s2] sm:$0xff] }
0x2118   : > { %v5154_v58 = vpop.xlane.xlu1 %5153 }
0x2119   : > { %7026 = vrcp.f32 %v5154_v58 }
0x211c   : > { %v5240_v1 = vpop.permute.xlu1 %5239 }
0x2126   : > { %v7027_v60 = vpop.eup %7026 }
0x2127   : > { %v5156_v62 = vmul.f32 %v7027_v60, %v7025_v57 }
0x2129   : > { %6713 = vmatmul.mubr.msk.f32.vlgmr.msra.gmra.mxu0 %vm2734_vm5, %v5156_v62  ;;  %6210 = vst.msk [vmem:[%s8282_s5 + $0x10] sm:$0xff] %vm2734_vm5, %v5156_v62  ;;  %v6216_v62 = vld [vmem:[#allocation7] ss:$0 sm:$0xff] }
0x212a   : > { %6716 = vmatpush3.xpose.msk.msra.mxu0 %vm1691_vm3, %v5242_v63  ;;  %6719 = vmatprep.mubr.msk.f32.mxu0 %vm7381_vm0, %v7380_v0 }
0x212b   : > { %6717 = vmatprep.subr.mxu0 %v7380_v0 }
0x212e   : > { %6718 = vmatpush3.xpose.msk.msra.mxu0 %vm1691_vm3, %v5240_v1 }
0x212f   : > { %6740 = vmatprep.subr.mxu0 %v7380_v0 }
0x2131   : > { %6720 = vmatmul.mubr.msk.f32.vlgmr.msra.gmra.mxu0 %vm1691_vm3, %v5238_v2 }
0x2132   : > { %6748 = vmatprep.mubr.msk.f32.mxu0 %vm7381_vm0, %v7380_v0 }
0x21e9   : > { %v5233_v3 = vpop.f32.mrf.mxu0 }
0x21eb   : > { %v6714_v5 = vpop.f32.mrf.mxu0 }
0x21ec   : > { %v6218_v5 = vld [vmem:[#allocation8] ss:$0 sm:$0xff] }
0x21f1   : > { %v5315_v6 = vpop.f32.mrf.mxu0 }
0x21f2   : > { %v5319_v61 = vsel %vm2734_vm5, %v5315_v6, -inf }
0x21f3   : > { %5320 = vmax.xlane.f32.xlu1 %v5319_v61  ;;  %v6721_v9 = vpop.f32.mrf.mxu0 }
0x2204   : > { %5330 = vrot.lane.b32.xlu1 %v8230_v8, %s8606_s3 }
0x2208   : > { %5411 = vrot.lane.b32.xlu1 %v5060_v48, %s8586_s6 }
0x227c   : > { %v5321_v10 = vpop.xlane.xlu1 %5320 }
0x227d   : > { %v5322_v59 = vsub.f32 %v5315_v6, %v5321_v10 }
0x227f   : > { %v5323_v11 = vmul.f32 1.442695, %v5322_v59 }
0x2280   : > { %v5331_v16 = vpop.permute.xlu1 %5330 }
0x2281   : > { %7028 = vpow2.f32 %v5323_v11 }
0x2284   : > { %v5412_v25 = vpop.permute.xlu1 %5411 }
0x2285   : > { %v5422_v27 = vsel %vm1691_vm3, %v8303_v46, %v5412_v25 }
0x228e   : > { %v7029_v13 = vpop.eup %7028 }
0x228f   : > { %v5325_v14 = vsel %vm2734_vm5, %v7029_v13, 0.0 }
0x2290   : > { %5326 = vadd.xlane.f32.xlu0 %v5325_v14 }
0x22a6   : > { %5332 = vrot.lane.b32.xlu0 %v8224_v7, %s8606_s3  ;;  %v5435_v7 = vld [vmem:[%s8621_s2 + $0x18] sm:$0xff]  ;;  %s8622_s3 = sld [smem:[#allocation53_spill]] }
0x22aa   : > { %5415 = vrot.lane.b32.xlu0 %v5233_v3, %s8588_s22  ;;  %s8623_s22 = sld [smem:[#allocation55_spill]] }
0x22ac   : > { %v6212_v31 = vld [vmem:[%s8622_s3] ss:$0 sm:$0xff]  ;;  %s7396_s3 = smov [#allocation15]  }
0x22b0   : > { %s8624_s7 = smov %s8623_s22  ;;  %v5549_v12 = vld [vmem:[%s8623_s22 + $0x18] sm:$0xff]  ;;  %s7222_s22 = sshll.u32 %s7396_s3, 4  ;;  %s7223_s22 = int_to_ptr.vmem [resolvable:$false] %s7222_s22 }
0x22b1   : > { %6741 = vmatpush3.msra.mxu0 %v5549_v12  ;;  %v5548_v41 = vld [vmem:[%s8624_s7 + $0x10] sm:$0xff]  ;;  %v5546_v44 = vld [vmem:[%s8624_s7] sm:$0xff]  ;;  %s7224_s2 = scalar_lea.vmem %s7223_s22, 1024  ;;  %p7225_p1 = scmp.lt.s32.totalorder %s8405_s26, %s7223_s22 }
0x22b2   : > { %6742 = vmatprep.subr.mxu0 %v7380_v0  ;;  %p7226_p2 = scmp.lt.s32.totalorder %s7224_s2, %s7218_s10 }
0x22b3   : > { %6743 = vmatpush3.msra.mxu0 %v5548_v41 }
0x22b4   : > { %6744 = vmatprep.subr.mxu0 %v7380_v0  ;;  %p7227_p3 = por %p7226_p2, %p7225_p1 }
0x22b6   : > { %p7228_p13 = pnand %p7227_p3, %p7221_p0 }
0x2319   : > { %v5327_v15 = vpop.xlane.xlu0 %5326 }
0x231a   : > { %7030 = vrcp.f32 %v5327_v15 }
0x231d   : > { %v5333_v8 = vpop.permute.xlu0 %5332 }
0x231e   : > { %6723 = vmatpush3.msk.msra.mxu1 %vm2754_vm6, %v5333_v8 }
0x231f   : > { %6724 = vmatprep.subr.mxu1 %v7380_v0 }
0x2320   : > { %6725 = vmatpush3.msra.mxu1 %v5331_v16  ;;  %v5752_v16 = vld [vmem:[%s7627_s24 + $0x18] sm:$0xff] }
0x2321   : > { %6729 = vmatprep.subr.mxu1 %v7380_v0  ;;  %v5416_v26 = vpop.permute.xlu0 %5415 }
0x2322   : > { %v5423_v28 = vsel %vm1526_vm1, %v5422_v27, %v5416_v26  ;;  %v6221_v26 = vld [vmem:[#allocation11] ss:$0 sm:$0xff] }
0x2327   : > { %v7031_v17 = vpop.eup %7030 }
0x2328   : > { %v5329_v18 = vmul.f32 %v7031_v17, %v7029_v13  ;;  %v5751_v17 = vld [vmem:[%s7627_s24 + $0x10] sm:$0xff] }
0x232a   : > { %6727 = vmatmul.mubr.msk.f32.vlgmr.msra.gmra.mxu1 %vm2734_vm5, %v5329_v18  ;;  %6211 = vst.msk [vmem:[%s8282_s5 + $0x18] sm:$0xff] %vm2734_vm5, %v5329_v18  ;;  %v5750_v18 = vld [vmem:[%s7627_s24 + $0x8] sm:$0xff] }
0x232b   : > { %6737 = vmatprep.mubr.msk.f32.mxu1 %vm7381_vm0, %v7380_v0  ;;  %6730 = vmatpush3.msra.mxu1 %v5435_v7  ;;  %v5749_v7 = vld [vmem:[%s7627_s24] sm:$0xff] }
0x232c   : > { %6731 = vmatprep.subr.mxu1 %v7380_v0 }
0x232d   : > { %6732 = vmatpush3.msra.mxu1 %v5434_v19 }
0x232e   : > { %6733 = vmatprep.subr.mxu1 %v7380_v0 }
0x232f   : > { %6734 = vmatpush3.msra.mxu1 %v5433_v20 }
0x2330   : > { %6735 = vmatprep.subr.mxu1 %v7380_v0 }
0x2331   : > { %6736 = vmatpush3.msra.mxu1 %v5432_v21 }
0x2332   : > { %6751 = vmatprep.subr.mxu1 %v7380_v0 }
0x23ea   : > { %v5406_v23 = vpop.f32.mrf.mxu1 }
0x23eb   : > { %5419 = vrot.lane.b32.xlu1 %v5406_v23, %s8590_s11  ;;  %s8625_s11 = sld [smem:[#allocation56_spill]] }
0x23ec   : > { %v6728_v24 = vpop.f32.mrf.mxu1 }
0x23ed   : > { %v6220_v24 = vld [vmem:[#allocation10] ss:$0 sm:$0xff] }
0x23f1   : > { %v5638_v45 = vld [vmem:[%s8625_s11 + $0x38] sm:$0xff]  ;;  %v5637_v46 = vld [vmem:[%s8625_s11 + $0x30] sm:$0xff]  ;;  %v5636_v47 = vld [vmem:[%s8625_s11 + $0x28] sm:$0xff] }
0x23f2   : > { %v5635_v48 = vld [vmem:[%s8625_s11 + $0x20] sm:$0xff]  ;;  %v5634_v49 = vld [vmem:[%s8625_s11 + $0x18] sm:$0xff]  ;;  %v5633_v43 = vld [vmem:[%s8625_s11 + $0x10] sm:$0xff] }
0x23f3   : > { %v5632_v58 = vld [vmem:[%s8625_s11 + $0x8] sm:$0xff]  ;;  %v5631_v60 = vld [vmem:[%s8625_s11] sm:$0xff] }
0x245d   : > { %v5420_v29 = vpop.permute.xlu1 %5419 }
0x245e   : > { %v5424_v30 = vsel %vm2362_vm4, %v5423_v28, %v5420_v29 }
0x245f   : > { %6738 = vmatmul.mubr.msk.f32.vlgmr.msra.gmra.mxu1 %vm1614_vm2, %v5424_v30 }
0x2460   : > { %6767 = vmatprep.mubr.msk.f32.mxu1 %vm7381_vm0, %v7380_v0  ;;  %6752 = vmatpush3.msra.mxu1 %v5638_v45 }
0x2461   : > { %6753 = vmatprep.subr.mxu1 %v7380_v0 }
0x2462   : > { %6754 = vmatpush3.msra.mxu1 %v5637_v46 }
0x2463   : > { %6755 = vmatprep.subr.mxu1 %v7380_v0 }
0x2464   : > { %6756 = vmatpush3.msra.mxu1 %v5636_v47 }
0x2465   : > { %6757 = vmatprep.subr.mxu1 %v7380_v0 }
0x2466   : > { %6758 = vmatpush3.msra.mxu1 %v5635_v48 }
0x2467   : > { %6759 = vmatprep.subr.mxu1 %v7380_v0 }
0x2468   : > { %6760 = vmatpush3.msra.mxu1 %v5634_v49 }
0x2469   : > { %6761 = vmatprep.subr.mxu1 %v7380_v0 }
0x246a   : > { %6762 = vmatpush3.msra.mxu1 %v5633_v43 }
0x246b   : > { %6763 = vmatprep.subr.mxu1 %v7380_v0 }
0x246c   : > { %6764 = vmatpush3.msra.mxu1 %v5632_v58 }
0x246d   : > { %6765 = vmatprep.subr.mxu1 %v7380_v0 }
0x246e   : > { %6766 = vmatpush3.msra.mxu1 %v5631_v60 }
0x251f   : > { %v5512_v32 = vpop.f32.mrf.mxu1 }
0x2520   : > { %v5513_v33 = vadd.f32 %v6212_v31, %v5512_v32 }
0x2521   : > { %v6739_v34 = vpop.f32.mrf.mxu1 }
0x2522   : > { %v5516_v35 = vadd.f32 %v5513_v33, %v8217_v4  ;;  %v5547_v4 = vld [vmem:[%s8624_s7 + $0x8] sm:$0xff] }
0x2523   : > { %6745 = vmatpush3.msra.mxu0 %v5547_v4 }
0x2524   : > { %v5519_v56 = vsel %vm1614_vm2, %v5516_v35, 0.0  ;;  %6746 = vmatprep.subr.mxu0 %v7380_v0 }
0x2525   : > { %5520 = vadd.xlane.f32.xlu0 %v5519_v56  ;;  %6747 = vmatpush3.msra.mxu0 %v5546_v44 }
0x2526   : > { %6770 = vmatprep.subr.mxu0 %v7380_v0 }
0x25ae   : > { %v5521_v36 = vpop.xlane.xlu0 %5520 }
0x25af   : > { %v5522_v37 = vmul.f32 0.03125, %v5521_v36 }
0x25b1   : > { %v5523_v38 = vsub.f32 %v5516_v35, %v5522_v37 }
0x25b3   : > { %v5524_v39 = vmul.f32 %v5523_v38, %v5523_v38 }
0x25b5   : > { %v5525_v40 = vsel %vm1614_vm2, %v5524_v39, 0.0 }
0x25b6   : > { %5526 = vadd.xlane.f32.xlu1 %v5525_v40 }
0x263f   : > { %v5527_v50 = vpop.xlane.xlu1 %5526 }
0x2640   : > { %v5528_v42 = vmul.f32 0.03125, %v5527_v50 }
0x2642   : > { %v5529_v51 = vadd.f32 1e-05, %v5528_v42 }
0x2644   : > { %7032 = vrsqrt.f32 %v5529_v51 }
0x2651   : > { %v7033_v22 = vpop.eup %7032 }
0x2652   : > { %v5531_v53 = vmul.f32 %v7033_v22, %v5523_v38 }
0x2654   : > { %v5538_v55 = vmul.f32 %v6214_v52, %v5531_v53 }
0x2656   : > { %v5545_v57 = vadd.f32 %v6215_v54, %v5538_v55 }
0x2658   : > { %6749 = vmatmul.mubr.msk.f32.vlgmr.msra.gmra.mxu0 %vm1614_vm2, %v5545_v57 }
0x2659   : > { %6778 = vmatprep.mubr.msk.f32.mxu0 %vm7381_vm0, %v7380_v0  ;;  %6771 = vmatpush3.msra.mxu0 %v5752_v16 }
0x265a   : > { %6772 = vmatprep.subr.mxu0 %v7380_v0 }
0x265b   : > { %6773 = vmatpush3.msra.mxu0 %v5751_v17 }
0x265c   : > { %6774 = vmatprep.subr.mxu0 %v7380_v0 }
0x265d   : > { %6775 = vmatpush3.msra.mxu0 %v5750_v18 }
0x265e   : > { %6776 = vmatprep.subr.mxu0 %v7380_v0 }
0x265f   : > { %6777 = vmatpush3.msra.mxu0 %v5749_v7 }
0x2718   : > { %v5626_v63 = vpop.f32.mrf.mxu0 }
0x2719   : > { %v5627_v1 = vadd.f32 %v6216_v62, %v5626_v63 }
0x271a   : > { %v6750_v2 = vpop.f32.mrf.mxu0 }
0x271b   : > { %v5630_v3 = vmax.f32 %v5627_v1, 0.0 }
0x271d   : > { %6768 = vmatmul.mubr.msk.f32.vlgmr.msra.gmra.mxu1 %vm3575_vm7, %v5630_v3 }
0x27dd   : > { %v5715_v6 = vpop.f32.mrf.mxu1 }
0x27de   : > { %v5716_v61 = vadd.f32 %v6218_v5, %v5715_v6 }
0x27df   : > { %v6769_v9 = vpop.f32.mrf.mxu1 }
0x27e0   : > { %v5719_v10 = vadd.f32 %v5716_v61, %v5545_v57 }
0x27e2   : > { %v5722_v59 = vsel %vm1614_vm2, %v5719_v10, 0.0 }
0x27e3   : > { %5723 = vadd.xlane.f32.xlu0 %v5722_v59 }
0x286c   : > { %v5724_v11 = vpop.xlane.xlu0 %5723 }
0x286d   : > { %v5725_v13 = vmul.f32 0.03125, %v5724_v11 }
0x286f   : > { %v5726_v14 = vsub.f32 %v5719_v10, %v5725_v13 }
0x2871   : > { %v5727_v15 = vmul.f32 %v5726_v14, %v5726_v14 }
0x2873   : > { %v5728_v8 = vsel %vm1614_vm2, %v5727_v15, 0.0 }
0x2874   : > { %5729 = vadd.xlane.f32.xlu0 %v5728_v8 }
0x28fd   : > { %v5730_v19 = vpop.xlane.xlu0 %5729 }
0x28fe   : > { %v5731_v20 = vmul.f32 0.03125, %v5730_v19 }
0x2900   : > { %v5732_v21 = vadd.f32 1e-05, %v5731_v20 }
0x2902   : > { %7034 = vrsqrt.f32 %v5732_v21 }
0x290f   : > { %v7035_v23 = vpop.eup %7034 }
0x2910   : > { %v5734_v25 = vmul.f32 %v7035_v23, %v5726_v14 }
0x2912   : > { %v5741_v27 = vmul.f32 %v6220_v24, %v5734_v25 }
0x2914   : > { %v5748_v28 = vadd.f32 %v6221_v26, %v5741_v27 }
0x2916   : > { %6779 = vmatmul.mubr.msk.f32.vlgmr.msra.gmra.mxu0 %vm1614_vm2, %v5748_v28 }
0x2917   : > { %7231 = shalt.err (!%p7228_p13)
}
0x2918   : > { %s7232_s5 = scalar_lea.hbm %s8408_s28, 512  ;;  %s7236_s4 = scalar_lea.hbm %s7642_s13, 1024 }
0x2919   : > { %p7233_p9 = scmp.ne.s32.totalorder %s8408_s28, %s7232_s5  ;;  %p7237_p5 = scmp.lt.s32.totalorder %s8408_s28, %s7642_s13 }
0x291a   : > { %p7238_p6 = scmp.lt.s32.totalorder %s7236_s4, %s7232_s5 }
0x291b   : > { %p7234_p4 = pnand %p7233_p9, %p8626_p8 }
0x291c   : > { %p7239_p10 = por %p7238_p6, %p7237_p5 }
0x291d   : > { %p7235_p12 = pneg %p7234_p4 }
0x291f   : > { %p7240_p7 = pnand %p7239_p10, %p7235_p12 }
0x2921   : > { %7243 = shalt.err (!%p7240_p7)
}
0x2922   : > { %s7397_s2 = smov 128   ;;  %s6107_s10 = sshll.u32 %s8278_s1, 3  ;;  %v6222_v0 = vld [vmem:[#allocation13] ss:$0 sm:$0xff]  ;;  %vm5833_vm8 = vcmask 408576  }
0x2923   : > { %6810 = dma.vmem_to_hbm [thread:$0]  (%p8626_p8), %s8405_s26, 512, %s8408_s28, %s5841_s9, %s7397_s2, %s7397_s2, %s8586_s6  }
0x2924   : > { %s6226_s3 = sshll.u32 %s7665_s0, 7  ;;  %s1504_s22 = scalar_lea.vmem [#allocation14], %s6107_s10 }
0x2925   : > { %s5854_s5 = sshll.u32 %s1504_s22, 4  ;;  %s8433_s4 = scalar_lea.hbm %s7637_s19, %s6226_s3  ;;  %s5855_s5 = int_to_ptr.vmem [resolvable:$true] %s5854_s5 }
0x2926   : > { %s5836_s7 = scalar_lea.sflag [#allocation4], %s8278_s1  ;;  %s7244_s8 = scalar_lea.vmem %s5855_s5, 128 }
0x2927   : > { %p7245_p11 = scmp.ne.s32.totalorder %s5855_s5, %s7244_s8  ;;  %s7398_s6 = smov [#allocation14]  }
0x2928   : > { %s7248_s26 = sshll.u32 %s7398_s6, 4  ;;  %s7249_s26 = int_to_ptr.vmem [resolvable:$false] %s7248_s26 }
0x2929   : > { %p7246_p0 = pnand %p7245_p11, %p8626_p8  ;;  %s7250_s0 = scalar_lea.vmem %s7249_s26, 256 }
0x292a   : > { %p7251_p2 = scmp.lt.s32.totalorder %s5855_s5, %s7249_s26  ;;  %p7252_p3 = scmp.lt.s32.totalorder %s7250_s0, %s7244_s8 }
0x292b   : > { %p7247_p1 = pneg %p7246_p0 }
0x292c   : > { %p7253_p13 = por %p7252_p3, %p7251_p2 }
0x292e   : > { %p7254_p9 = pnand %p7253_p13, %p7247_p1 }
0x29d6   : > { %v5829_v29 = vpop.f32.mrf.mxu0 }
0x29d7   : > { %v5830_v30 = vadd.f32 %v6222_v0, %v5829_v29 }
0x29d8   : > { %v6780_v31 = vpop.f32.mrf.mxu0 }
0x29d9   : > { %5834 = vst.msk [vmem:[%s1504_s22] sm:$0xff] %vm5833_vm8, %v5830_v30 }
0x29da   : > { %7257 = shalt.err (!%p7254_p9)
}
0x29db   : > { %s7258_s1 = scalar_lea.hbm %s8433_s4, 128  ;;  %s7262_s28 = scalar_lea.hbm %s7637_s19, 256 }
0x29dc   : > { %p7259_p4 = scmp.ne.s32.totalorder %s8433_s4, %s7258_s1  ;;  %p7263_p6 = scmp.lt.s32.totalorder %s8433_s4, %s7637_s19 }
0x29dd   : > { %p7264_p10 = scmp.lt.s32.totalorder %s7262_s28, %s7258_s1 }
0x29de   : > { %p7260_p12 = pnand %p7259_p4, %p8626_p8 }
0x29df   : > { %p7265_p7 = por %p7264_p10, %p7263_p6 }
0x29e0   : > { %p7261_p5 = pneg %p7260_p12 }
0x29e2   : > { %p7266_p11 = pnand %p7265_p7, %p7261_p5 }
0x29e4   : > { %7269 = shalt.err (!%p7266_p11)
}
0x29e5   : > { %6809 = dma.vmem_to_hbm [thread:$0]  (%p8626_p8), %s5855_s5, 128, %s8433_s4, %s5836_s7  }
0x29e6 PF: > { %s8627_s8 = sld [smem:[#allocation61_spill]] }
0x29e7   : > { %s8628_s9 = sld [smem:[#allocation59_spill]] }
0x29e8   : > { %s8629_s2 = sld [smem:[#allocation64_spill]] }
0x29ec   : > { %p6856_p0 = scmp.ge.s32.totalorder %s8627_s8, 2 }
0x29ed   : > { %s5882_s10 = sand.u32 1, %s8628_s9  }
0x29ee   : > { %p8630_p1 = scmp.ne.s32.totalorder %s8629_s2, 0  ;;  %s5883_s3 = scalar_lea.sflag [#allocation4], %s5882_s10 }
0x29f0   : > { %p6836_p2 = pnand %p6856_p0, %p8630_p1 }
0x29f2   : > { %p6837_p3 = pneg %p6836_p2 }
0x29f4   : > { %7303 = dma.done.wait (%p6837_p3), %s5883_s3, 128  }
0x29f5   : > { %7305 = vsyncadd (%p6837_p3), %s5883_s3, 4294967168  ;;  %s5892_s22 = scalar_lea.sflag [#allocation16], %s5882_s10 }
0x29f6   : > { %7307 = dma.done.wait (%p6837_p3), %s5892_s22, 512  }
0x29f7   : > { %7309 = vsyncadd (%p6837_p3), %s5892_s22, 4294966784  ;;  %s8631_s28 = sld [smem:[#allocation62_spill]]  ;;  %s8634_s22 = smov %s7316_s23 }
0x29f8   : > { %s8632_s15 = sld [smem:[#allocation60_spill]] }
0x29f9   : > { %s8633_s26 = sld [smem:[#allocation63_spill]] }
0x29fd   : > { %p113_p8 = scmp.ge.s32.totalorder %s8631_s28, 4  }
0x29fe   : > { %s8635_s23 = smov %s8632_s15 }
0x29ff   :  { %115 = sbr.rel (!%p113_p8) target bundleno = 106 (0x6a), region = 338 }
0x2a04   :  { %5897 = vsyncpa [#allocation3], 1 }
0x2a05   :  { %5899 = vsyncpa [#allocation3 + $0x1], 1 }
0x2a06   :  { %5900 = vsyncpa [#allocation6], 1 }
0x2a07   :  { %5901 = vsyncpa [#allocation9], 1 }
0x2a08   :  { %5902 = vsyncpa [#allocation12], 1 }
0x2a09   :  { %5903 = vsyncpa [#allocation4], 1 }
0x2a0a   :  { %5905 = vsyncpa [#allocation4 + $0x1], 1 }
0x2a0b   :  { %5906 = vsyncpa [#allocation16], 1 }
0x2a0c   :  { %5908 = vsyncpa [#allocation16 + $0x1], 1 }

</bundles_post_ra>
